<compile_context>
chip_gen: v5e
topology: v5e:2x2
jax: 0.10.0
libtpu: 0.0.40
codegen_flags: <defaults>
</compile_context>

<pallas_src>
import functools

import numpy as np

import jax
import jax.numpy as jnp
from jax.experimental import pallas as pl
from jax.experimental.pallas import tpu as pltpu


def _round_up(x, m):
    return (x + m - 1) // m * m


def _compute_vmem_limit():
    cap = 128 * 1024 * 1024
    try:
        cap = int(pltpu.get_tpu_info().vmem_capacity_bytes)
    except Exception:
        pass
    return min(96 * 1024 * 1024, (cap * 3) // 4)


_VMEM_LIMIT = _compute_vmem_limit()

_LAYER_CFG = ((64, 3, 1), (128, 4, 2), (256, 6, 2), (512, 3, 2))


# ----------------------------- Pallas kernels ------------------------------

def _matmul_bn_kernel(a_ref, w_ref, s_ref, b_ref, o_ref, *, relu):
    acc = jnp.dot(a_ref[...], w_ref[...], preferred_element_type=jnp.float32)
    y = acc * s_ref[...] + b_ref[...]
    if relu:
        y = jnp.maximum(y, 0.0)
    o_ref[...] = y.astype(o_ref.dtype)


def _matmul_bn_res_kernel(a_ref, w_ref, s_ref, b_ref, r_ref, o_ref, *, relu):
    acc = jnp.dot(a_ref[...], w_ref[...], preferred_element_type=jnp.float32)
    y = acc * s_ref[...] + b_ref[...] + r_ref[...].astype(jnp.float32)
    if relu:
        y = jnp.maximum(y, 0.0)
    o_ref[...] = y.astype(o_ref.dtype)


def _tap_wide_kernel(ap_ref, ac_ref, an_ref, w_ref, s_ref, b_ref, m_ref, o_ref,
                     *, tap_offsets, tm, cin, relu):
    # Centred shift-trick 3x3 stride-1 conv operating fully in the "wide"
    # (spatially padded, flattened) layout:
    #   y[r] = sum_t A[r + off_t] @ W_t,   off_t = TM + (ki-1)*Wp + (kj-1)
    # ap/ac/an are three consecutive TM-row blocks of the wide activation;
    # the static per-tap slices stay inside [0, 3*TM).  The row mask zeroes
    # the padding ring so the output is directly consumable by the next conv.
    a = jnp.concatenate([ap_ref[...], ac_ref[...], an_ref[...]], axis=0)
    acc = jnp.zeros(o_ref.shape, jnp.float32)
    for t, off in enumerate(tap_offsets):
        acc = acc + jnp.dot(a[off:off + tm, :],
                            w_ref[t * cin:(t + 1) * cin, :],
                            preferred_element_type=jnp.float32)
    y = acc * s_ref[...] + b_ref[...]
    if relu:
        y = jnp.maximum(y, 0.0)
    o_ref[...] = jnp.where(m_ref[...] > 0.0, y, 0.0).astype(o_ref.dtype)


def _tap_wide_res_kernel(ap_ref, ac_ref, an_ref, w_ref, s_ref, b_ref, m_ref,
                         r_ref, o_ref, *, tap_offsets, tm, cin, relu):
    # Same as above + fused residual add (residual lives in the same wide layout).
    a = jnp.concatenate([ap_ref[...], ac_ref[...], an_ref[...]], axis=0)
    acc = jnp.zeros(o_ref.shape, jnp.float32)
    for t, off in enumerate(tap_offsets):
        acc = acc + jnp.dot(a[off:off + tm, :],
                            w_ref[t * cin:(t + 1) * cin, :],
                            preferred_element_type=jnp.float32)
    y = acc * s_ref[...] + b_ref[...] + r_ref[...].astype(jnp.float32)
    if relu:
        y = jnp.maximum(y, 0.0)
    o_ref[...] = jnp.where(m_ref[...] > 0.0, y, 0.0).astype(o_ref.dtype)


def _maxpool_kernel(*refs):
    o_ref = refs[-1]
    m = refs[0][...]
    for r in refs[1:-1]:
        m = jnp.maximum(m, r[...])
    o_ref[...] = m


def _head_kernel(x_ref, w_ref, b_ref, o_ref):
    # x_ref: (N, HW, C).  GAP + GMP over spatial, then the embedding Linear.
    x = x_ref[...].astype(jnp.float32)
    feat = jnp.mean(x, axis=1) + jnp.max(x, axis=1)               # (N, C)
    o_ref[...] = (jnp.dot(feat.astype(jnp.bfloat16), w_ref[...],
                          preferred_element_type=jnp.float32) + b_ref[...])


# ----------------------------- kernel wrappers ------------------------------

def _pick_tn(cout):
    if cout % 256 == 0:
        return 256
    if cout % 128 == 0:
        return 128
    return cout


def fused_matmul(a, w, scale, bias, residual=None, *, relu=True,
                 out_dtype=jnp.bfloat16):
    """act((a @ w) * scale + bias (+ residual)); a/w/residual bf16, f32 accum."""
    M, K = a.shape
    _, Nc = w.shape
    # Tile sizes chosen to divide exactly (or be the full dim) -> no pad/slice.
    TM = 256 if M % 256 == 0 else (128 if M % 128 == 0 else M)
    TN = _pick_tn(Nc)
    grid = (Nc // TN, M // TM)          # Cout tiles outer -> weight resident over M

    in_specs = [
        pl.BlockSpec((TM, K), lambda j, i: (i, 0)),
        pl.BlockSpec((K, TN), lambda j, i: (0, j)),
        pl.BlockSpec((1, TN), lambda j, i: (0, j)),
        pl.BlockSpec((1, TN), lambda j, i: (0, j)),
    ]
    args = [a, w, scale, bias]
    if residual is not None:
        in_specs.append(pl.BlockSpec((TM, TN), lambda j, i: (i, j)))
        args.append(residual)
        kernel = functools.partial(_matmul_bn_res_kernel, relu=relu)
    else:
        kernel = functools.partial(_matmul_bn_kernel, relu=relu)

    return pl.pallas_call(
        kernel,
        out_shape=jax.ShapeDtypeStruct((M, Nc), out_dtype),
        grid=grid,
        in_specs=in_specs,
        out_specs=pl.BlockSpec((TM, TN), lambda j, i: (i, j)),
        compiler_params=pltpu.CompilerParams(
            dimension_semantics=("parallel", "parallel"),
            vmem_limit_bytes=_VMEM_LIMIT,
        ),
    )(*args)


@functools.partial(jax.jit, static_argnames=("kh", "kw", "stride", "pad", "relu"))
def conv2d_im2col(x, w_flat, scale, bias, residual=None, *,
                  kh, kw, stride, pad, relu):
    """Conv (NHWC) via im2col + fused matmul.  Used for strided convs / stem."""
    N, H, W, Cin = x.shape
    Cout = w_flat.shape[1]
    if pad:
        x = jnp.pad(x, ((0, 0), (pad, pad), (pad, pad), (0, 0)))
    Hp, Wp = H + 2 * pad, W + 2 * pad
    oh = (Hp - kh) // stride + 1
    ow = (Wp - kw) // stride + 1
    if kh == 1 and kw == 1:
        a = x[:, ::stride, ::stride, :].reshape(N * oh * ow, Cin)
    else:
        cols = [x[:, i:i + stride * oh:stride, j:j + stride * ow:stride, :]
                for i in range(kh) for j in range(kw)]
        a = jnp.concatenate(cols, axis=-1).reshape(N * oh * ow, kh * kw * Cin)
    res = residual.reshape(N * oh * ow, Cout) if residual is not None else None
    y = fused_matmul(a, w_flat, scale, bias, res, relu=relu)
    return y.reshape(N, oh, ow, Cout)


# ------------------------- "wide" stride-1 conv path ------------------------

class _WideGeom:
    """Static geometry of the flat, padded ('wide') activation layout."""

    def __init__(self, N, H, W):
        self.N, self.H, self.W = N, H, W
        self.Hp, self.Wp = H + 2, W + 2
        self.R = N * self.Hp * self.Wp
        self.TM = max(256, _round_up(self.Wp + 1, 8))
        self.num_m = -(-self.R // self.TM)            # ceil(R / TM)
        self.rows = (self.num_m + 2) * self.TM        # lead block + data + tail
        # Centred tap offsets, shifted by +TM (a_prev block is prepended in-kernel).
        self.tap_offsets = tuple(self.TM + (ki - 1) * self.Wp + (kj - 1)
                                 for ki in range(3) for kj in range(3))

    def mask(self):
        # 1.0 on interior (valid output) rows, 0.0 on the padding ring / slack.
        m = np.zeros((self.rows, 1), np.float32)
        r = np.arange(self.R)
        hp = (r // self.Wp) % self.Hp
        wp = r % self.Wp
        valid = ((hp >= 1) & (hp <= self.Hp - 2) &
                 (wp >= 1) & (wp <= self.Wp - 2))
        m[self.TM:self.TM + self.R, 0] = valid.astype(np.float32)
        return jnp.asarray(m)

    def to_wide(self, x):
        xp = jnp.pad(x, ((0, 0), (1, 1), (1, 1), (0, 0)))
        a = xp.reshape(self.R, x.shape[-1])
        return jnp.pad(a, ((self.TM, self.rows - self.TM - self.R), (0, 0)))

    def from_wide(self, a):
        C = a.shape[-1]
        x = a[self.TM:self.TM + self.R].reshape(self.N, self.Hp, self.Wp, C)
        return x[:, 1:1 + self.H, 1:1 + self.W, :]


def conv3x3_wide(a_wide, mask, geom, w_flat, scale, bias, residual=None, *,
                 relu=True):
    """3x3 / stride-1 / pad-1 conv + BN (+res)(+ReLU) in the wide layout."""
    TM, num_m = geom.TM, geom.num_m
    K, Cout = w_flat.shape
    Cin = K // 9
    TN = _pick_tn(Cout)
    grid = (Cout // TN, num_m)

    in_specs = [
        pl.BlockSpec((TM, Cin), lambda j, i: (i, 0)),        # a_prev (padded blk i)
        pl.BlockSpec((TM, Cin), lambda j, i: (i + 1, 0)),    # a_cur
        pl.BlockSpec((TM, Cin), lambda j, i: (i + 2, 0)),    # a_next
        pl.BlockSpec((K, TN), lambda j, i: (0, j)),
        pl.BlockSpec((1, TN), lambda j, i: (0, j)),
        pl.BlockSpec((1, TN), lambda j, i: (0, j)),
        pl.BlockSpec((TM, 1), lambda j, i: (i + 1, 0)),      # valid-row mask
    ]
    args = [a_wide, a_wide, a_wide, w_flat, scale, bias, mask]
    if residual is not None:
        in_specs.append(pl.BlockSpec((TM, TN), lambda j, i: (i + 1, j)))
        args.append(residual)
        kernel = functools.partial(_tap_wide_res_kernel,
                                   tap_offsets=geom.tap_offsets,
                                   tm=TM, cin=Cin, relu=relu)
    else:
        kernel = functools.partial(_tap_wide_kernel,
                                   tap_offsets=geom.tap_offsets,
                                   tm=TM, cin=Cin, relu=relu)

    return pl.pallas_call(
        kernel,
        out_shape=jax.ShapeDtypeStruct((geom.rows, Cout), jnp.bfloat16),
        grid=grid,
        in_specs=in_specs,
        out_specs=pl.BlockSpec((TM, TN), lambda j, i: (i + 1, j)),
        compiler_params=pltpu.CompilerParams(
            dimension_semantics=("parallel", "parallel"),
            vmem_limit_bytes=_VMEM_LIMIT,
        ),
    )(*args)


def _stride1_blocks_wide(x, blocks):
    """Run consecutive stride-1 BasicBlocks entirely in the wide layout."""
    N, H, W, _ = x.shape
    geom = _WideGeom(N, H, W)
    mask = geom.mask()
    a = geom.to_wide(x)
    for blk in blocks:
        w1, s1, b1 = blk["conv1"]
        w2, s2, b2 = blk["conv2"]
        out = conv3x3_wide(a, mask, geom, w1, s1, b1, relu=True)
        a = conv3x3_wide(out, mask, geom, w2, s2, b2, residual=a, relu=True)
    return geom.from_wide(a)


def _stride1_blocks_im2col(x, blocks):
    """Fallback path: stride-1 BasicBlocks via im2col (residual fused)."""
    for blk in blocks:
        w1, s1, b1 = blk["conv1"]
        w2, s2, b2 = blk["conv2"]
        out = conv2d_im2col(x, w1, s1, b1, kh=3, kw=3, stride=1, pad=1,
                            relu=True)
        x = conv2d_im2col(out, w2, s2, b2, residual=x, kh=3, kw=3, stride=1,
                          pad=1, relu=True)
    return x


# ----------------------------- pooling & head -------------------------------

@jax.jit
def maxpool2d_3x3_s2_p1(x):
    """MaxPool2d(kernel=3, stride=2, padding=1) on NHWC input, tiled over rows."""
    N, H, W, C = x.shape
    neg = jnp.finfo(x.dtype).min
    xp = jnp.pad(x, ((0, 0), (1, 1), (1, 1), (0, 0)), constant_values=neg)
    oh = (H + 2 - 3) // 2 + 1
    ow = (W + 2 - 3) // 2 + 1
    M = N * oh * ow
    views = [xp[:, i:i + 2 * oh:2, j:j + 2 * ow:2, :].reshape(M, C)
             for i in range(3) for j in range(3)]
    TM = 256 if M % 256 == 0 else (128 if M % 128 == 0 else M)
    out = pl.pallas_call(
        _maxpool_kernel,
        out_shape=jax.ShapeDtypeStruct((M, C), x.dtype),
        grid=(M // TM,),
        in_specs=[pl.BlockSpec((TM, C), lambda i: (i, 0))] * 9,
        out_specs=pl.BlockSpec((TM, C), lambda i: (i, 0)),
        compiler_params=pltpu.CompilerParams(
            dimension_semantics=("parallel",),
            vmem_limit_bytes=_VMEM_LIMIT,
        ),
    )(*views)
    return out.reshape(N, oh, ow, C)


@jax.jit
def head_pool_embed(x_flat, w_emb, b_emb):
    """(GAP + GMP) over spatial followed by the embedding Linear (tiny)."""
    N, HW, C = x_flat.shape
    E = w_emb.shape[1]
    return pl.pallas_call(
        _head_kernel,
        out_shape=jax.ShapeDtypeStruct((N, E), jnp.float32),
        grid=(1,),
        in_specs=[pl.BlockSpec((N, HW, C), lambda i: (0, 0, 0)),
                  pl.BlockSpec((C, E), lambda i: (0, 0)),
                  pl.BlockSpec((1, E), lambda i: (0, 0))],
        out_specs=pl.BlockSpec((N, E), lambda i: (0, 0)),
    )(x_flat, w_emb, b_emb)


# ----------------------------- parameter setup ------------------------------

def _conv_bn_params(key, kh, kw, cin, cout, eps=1e-5):
    k1, k2, k3 = jax.random.split(key, 3)
    fan_in = kh * kw * cin
    w = jax.random.normal(k1, (kh, kw, cin, cout), jnp.float32) * jnp.sqrt(2.0 / fan_in)
    gamma = 1.0 + 0.05 * jax.random.normal(k2, (cout,), jnp.float32)
    beta = 0.05 * jax.random.normal(k3, (cout,), jnp.float32)
    running_mean = jnp.zeros((cout,), jnp.float32)
    running_var = jnp.ones((cout,), jnp.float32)
    scale = gamma / jnp.sqrt(running_var + eps)      # eval-mode (bn_freeze) fold
    bias = beta - running_mean * scale
    # Pre-flatten + pre-cast once at init (no per-forward weight copies).
    w_flat = w.reshape(kh * kw * cin, cout).astype(jnp.bfloat16)
    return w_flat, scale.reshape(1, cout), bias.reshape(1, cout)


def init_resnet34_params(key, embedding_size=64, attention_heads=4):
    keys = jax.random.split(key, 64)
    ki = iter(keys)
    params = {"conv1": _conv_bn_params(next(ki), 7, 7, 3, 64)}
    layers = []
    in_c = 64
    for out_c, nblocks, stride in _LAYER_CFG:
        blocks = []
        for b in range(nblocks):
            s = stride if b == 0 else 1
            blk = {
                "conv1": _conv_bn_params(next(ki), 3, 3, in_c, out_c),
                "conv2": _conv_bn_params(next(ki), 3, 3, out_c, out_c),
            }
            if s != 1 or in_c != out_c:
                blk["down"] = _conv_bn_params(next(ki), 1, 1, in_c, out_c)
            blocks.append(blk)
            in_c = out_c
        layers.append(blocks)
    params["layers"] = layers
    E = embedding_size * attention_heads
    ke = next(ki)
    # kaiming_normal_(mode='fan_out') on a (E, 512) weight -> std = sqrt(2/E)
    params["emb_w"] = (jax.random.normal(ke, (512, E), jnp.float32)
                       * jnp.sqrt(2.0 / E)).astype(jnp.bfloat16)
    params["emb_b"] = jnp.zeros((1, E), jnp.float32)  # init.constant_(bias, 0)
    return params


# --------------- wide-conv feature check (fallback to im2col) ---------------

_WIDE_OK = None


def _wide_path_supported():
    """Validate the wide shift-trick block path once; fall back if it fails."""
    global _WIDE_OK
    if _WIDE_OK is None:
        try:
            kx, k1, k2 = jax.random.split(jax.random.PRNGKey(42), 3)
            x = jax.random.normal(kx, (1, 6, 6, 64), jnp.float32).astype(jnp.bfloat16)
            blocks = [{"conv1": _conv_bn_params(k1, 3, 3, 64, 64),
                       "conv2": _conv_bn_params(k2, 3, 3, 64, 64)}]
            y_wide = jax.block_until_ready(_stride1_blocks_wide(x, blocks))
            y_ref = jax.block_until_ready(_stride1_blocks_im2col(x, blocks))
            err = float(jnp.max(jnp.abs(y_wide.astype(jnp.float32)
                                        - y_ref.astype(jnp.float32))))
            ref = float(jnp.max(jnp.abs(y_ref.astype(jnp.float32))))
            _WIDE_OK = bool(err <= 0.1 * ref + 0.1)
        except Exception:
            _WIDE_OK = False
    return _WIDE_OK


# ------------------------------- forward pass -------------------------------

@functools.partial(jax.jit, static_argnames=("use_wide",))
def _forward_impl(params, x_nchw, *, use_wide):
    # NCHW (PyTorch) -> NHWC, bf16 activations end-to-end.
    x = jnp.transpose(x_nchw, (0, 2, 3, 1)).astype(jnp.bfloat16)

    w, s, b = params["conv1"]
    x = conv2d_im2col(x, w, s, b, kh=7, kw=7, stride=2, pad=3, relu=True)
    x = maxpool2d_3x3_s2_p1(x)

    run_s1 = _stride1_blocks_wide if use_wide else _stride1_blocks_im2col
    for li, (_, nblocks, stride) in enumerate(_LAYER_CFG):
        blocks = params["layers"][li]
        start = 0
        if stride != 1:
            # First block of the stage: strided conv1 + 1x1 downsample +
            # conv2 with the residual fused into its matmul epilogue.
            blk = blocks[0]
            w1, s1, b1 = blk["conv1"]
            w2, s2, b2 = blk["conv2"]
            wd, sd, bd = blk["down"]
            out = conv2d_im2col(x, w1, s1, b1, kh=3, kw=3, stride=stride,
                                pad=1, relu=True)
            idn = conv2d_im2col(x, wd, sd, bd, kh=1, kw=1, stride=stride,
                                pad=0, relu=False)
            x = conv2d_im2col(out, w2, s2, b2, residual=idn, kh=3, kw=3,
                              stride=1, pad=1, relu=True)
            start = 1
        if nblocks - start > 0:
            x = run_s1(x, blocks[start:])

    N, H, W, C = x.shape
    # gap + gmp, flatten, embedding Linear; attention / classifier are Identity.
    return head_pool_embed(x.reshape(N, H * W, C), params["emb_w"],
                           params["emb_b"])


def resnet34_forward(params, x_nchw):
    return _forward_impl(params, x_nchw, use_wide=_wide_path_supported())


if __name__ == "__main__":
    embedding_size, attention_heads = 64, 4
    key = jax.random.PRNGKey(0)
    pkey, xkey = jax.random.split(key)
    params = init_resnet34_params(pkey, embedding_size, attention_heads)
    x = jax.random.normal(xkey, (2, 3, 32, 32), jnp.float32)   # NCHW like PyTorch
    out = resnet34_forward(params, x)
    out = jax.block_until_ready(out)
    assert out.shape == (2, embedding_size * attention_heads), out.shape
    assert bool(jnp.all(jnp.isfinite(out)))
    print("KERNEL_OK")
</pallas_src>

<mosaic_0001>
module attributes {stable_mosaic.version = 11 : i64} {
  func.func @_tap_wide_kernel(%arg0: i32, %arg1: i32, %arg2: memref<256x64xbf16, #tpu.memory_space<vmem>>, %arg3: memref<256x64xbf16, #tpu.memory_space<vmem>>, %arg4: memref<256x64xbf16, #tpu.memory_space<vmem>>, %arg5: memref<576x64xbf16, #tpu.memory_space<vmem>>, %arg6: memref<1x64xf32, #tpu.memory_space<vmem>>, %arg7: memref<1x64xf32, #tpu.memory_space<vmem>>, %arg8: memref<256x1xf32, #tpu.memory_space<vmem>>, %arg9: memref<256x64xbf16, #tpu.memory_space<vmem>>) attributes {dimension_semantics = [#tpu.dimension_semantics<parallel>, #tpu.dimension_semantics<parallel>], iteration_bounds = array<i64: 1, 1>, scalar_prefetch = 0 : i64, scratch_operands = 0 : i64, tpu.core_type = #tpu.core_type<tc>, window_params = [{transform_indices = @transform_0, window_bounds = array<i64: 256, 64>}, {transform_indices = @transform_1, window_bounds = array<i64: 256, 64>}, {transform_indices = @transform_2, window_bounds = array<i64: 256, 64>}, {transform_indices = @transform_3, window_bounds = array<i64: 576, 64>}, {transform_indices = @transform_4, window_bounds = array<i64: 1, 64>}, {transform_indices = @transform_5, window_bounds = array<i64: 1, 64>}, {transform_indices = @transform_6, window_bounds = array<i64: 256, 1>}, {transform_indices = @transform_7, window_bounds = array<i64: 256, 64>}]} {
    %c0 = arith.constant 0 : index
    %c0_0 = arith.constant 0 : index
    %0 = vector.load %arg2[%c0, %c0_0] : memref<256x64xbf16, #tpu.memory_space<vmem>>, vector<256x64xbf16>
    %c0_1 = arith.constant 0 : index
    %c0_2 = arith.constant 0 : index
    %1 = vector.load %arg3[%c0_1, %c0_2] : memref<256x64xbf16, #tpu.memory_space<vmem>>, vector<256x64xbf16>
    %c0_3 = arith.constant 0 : index
    %c0_4 = arith.constant 0 : index
    %2 = vector.load %arg4[%c0_3, %c0_4] : memref<256x64xbf16, #tpu.memory_space<vmem>>, vector<256x64xbf16>
    %3 = tpu.concatenate %0, %1, %2 in 0 : vector<256x64xbf16>, vector<256x64xbf16>, vector<256x64xbf16> -> vector<768x64xbf16>
    %cst = arith.constant 0.000000e+00 : f32
    %4 = vector.broadcast %cst : f32 to vector<256x64xf32>
    %5 = vector.extract_strided_slice %3 {offsets = [247, 0], sizes = [256, 64], strides = [1, 1]} : vector<768x64xbf16> to vector<256x64xbf16>
    %c0_5 = arith.constant 0 : index
    %c0_6 = arith.constant 0 : index
    %6 = vector.load %arg5[%c0_5, %c0_6] : memref<576x64xbf16, #tpu.memory_space<vmem>>, vector<64x64xbf16>
    %cst_7 = arith.constant dense<0.000000e+00> : vector<256x64xf32>
    %7 = tpu.matmul %5, %6, %cst_7 {dimension_numbers = #tpu.dot_dimension_numbers<[1], [0], [0], [1], [0, 0, 1, 1], [], []>} : vector<256x64xbf16>, vector<64x64xbf16>, vector<256x64xf32> -> vector<256x64xf32>
    %8 = arith.addf %4, %7 : vector<256x64xf32>
    %9 = vector.extract_strided_slice %3 {offsets = [248, 0], sizes = [256, 64], strides = [1, 1]} : vector<768x64xbf16> to vector<256x64xbf16>
    %c64 = arith.constant 64 : index
    %c0_8 = arith.constant 0 : index
    %10 = vector.load %arg5[%c64, %c0_8] : memref<576x64xbf16, #tpu.memory_space<vmem>>, vector<64x64xbf16>
    %cst_9 = arith.constant dense<0.000000e+00> : vector<256x64xf32>
    %11 = tpu.matmul %9, %10, %cst_9 {dimension_numbers = #tpu.dot_dimension_numbers<[1], [0], [0], [1], [0, 0, 1, 1], [], []>} : vector<256x64xbf16>, vector<64x64xbf16>, vector<256x64xf32> -> vector<256x64xf32>
    %12 = arith.addf %8, %11 : vector<256x64xf32>
    %13 = vector.extract_strided_slice %3 {offsets = [249, 0], sizes = [256, 64], strides = [1, 1]} : vector<768x64xbf16> to vector<256x64xbf16>
    %c128 = arith.constant 128 : index
    %c0_10 = arith.constant 0 : index
    %14 = vector.load %arg5[%c128, %c0_10] : memref<576x64xbf16, #tpu.memory_space<vmem>>, vector<64x64xbf16>
    %cst_11 = arith.constant dense<0.000000e+00> : vector<256x64xf32>
    %15 = tpu.matmul %13, %14, %cst_11 {dimension_numbers = #tpu.dot_dimension_numbers<[1], [0], [0], [1], [0, 0, 1, 1], [], []>} : vector<256x64xbf16>, vector<64x64xbf16>, vector<256x64xf32> -> vector<256x64xf32>
    %16 = arith.addf %12, %15 : vector<256x64xf32>
    %17 = vector.extract_strided_slice %3 {offsets = [255, 0], sizes = [256, 64], strides = [1, 1]} : vector<768x64xbf16> to vector<256x64xbf16>
    %c192 = arith.constant 192 : index
    %c0_12 = arith.constant 0 : index
    %18 = vector.load %arg5[%c192, %c0_12] : memref<576x64xbf16, #tpu.memory_space<vmem>>, vector<64x64xbf16>
    %cst_13 = arith.constant dense<0.000000e+00> : vector<256x64xf32>
    %19 = tpu.matmul %17, %18, %cst_13 {dimension_numbers = #tpu.dot_dimension_numbers<[1], [0], [0], [1], [0, 0, 1, 1], [], []>} : vector<256x64xbf16>, vector<64x64xbf16>, vector<256x64xf32> -> vector<256x64xf32>
    %20 = arith.addf %16, %19 : vector<256x64xf32>
    %21 = vector.extract_strided_slice %3 {offsets = [256, 0], sizes = [256, 64], strides = [1, 1]} : vector<768x64xbf16> to vector<256x64xbf16>
    %c256 = arith.constant 256 : index
    %c0_14 = arith.constant 0 : index
    %22 = vector.load %arg5[%c256, %c0_14] : memref<576x64xbf16, #tpu.memory_space<vmem>>, vector<64x64xbf16>
    %cst_15 = arith.constant dense<0.000000e+00> : vector<256x64xf32>
    %23 = tpu.matmul %21, %22, %cst_15 {dimension_numbers = #tpu.dot_dimension_numbers<[1], [0], [0], [1], [0, 0, 1, 1], [], []>} : vector<256x64xbf16>, vector<64x64xbf16>, vector<256x64xf32> -> vector<256x64xf32>
    %24 = arith.addf %20, %23 : vector<256x64xf32>
    %25 = vector.extract_strided_slice %3 {offsets = [257, 0], sizes = [256, 64], strides = [1, 1]} : vector<768x64xbf16> to vector<256x64xbf16>
    %c320 = arith.constant 320 : index
    %c0_16 = arith.constant 0 : index
    %26 = vector.load %arg5[%c320, %c0_16] : memref<576x64xbf16, #tpu.memory_space<vmem>>, vector<64x64xbf16>
    %cst_17 = arith.constant dense<0.000000e+00> : vector<256x64xf32>
    %27 = tpu.matmul %25, %26, %cst_17 {dimension_numbers = #tpu.dot_dimension_numbers<[1], [0], [0], [1], [0, 0, 1, 1], [], []>} : vector<256x64xbf16>, vector<64x64xbf16>, vector<256x64xf32> -> vector<256x64xf32>
    %28 = arith.addf %24, %27 : vector<256x64xf32>
    %29 = vector.extract_strided_slice %3 {offsets = [263, 0], sizes = [256, 64], strides = [1, 1]} : vector<768x64xbf16> to vector<256x64xbf16>
    %c384 = arith.constant 384 : index
    %c0_18 = arith.constant 0 : index
    %30 = vector.load %arg5[%c384, %c0_18] : memref<576x64xbf16, #tpu.memory_space<vmem>>, vector<64x64xbf16>
    %cst_19 = arith.constant dense<0.000000e+00> : vector<256x64xf32>
    %31 = tpu.matmul %29, %30, %cst_19 {dimension_numbers = #tpu.dot_dimension_numbers<[1], [0], [0], [1], [0, 0, 1, 1], [], []>} : vector<256x64xbf16>, vector<64x64xbf16>, vector<256x64xf32> -> vector<256x64xf32>
    %32 = arith.addf %28, %31 : vector<256x64xf32>
    %33 = vector.extract_strided_slice %3 {offsets = [264, 0], sizes = [256, 64], strides = [1, 1]} : vector<768x64xbf16> to vector<256x64xbf16>
    %c448 = arith.constant 448 : index
    %c0_20 = arith.constant 0 : index
    %34 = vector.load %arg5[%c448, %c0_20] : memref<576x64xbf16, #tpu.memory_space<vmem>>, vector<64x64xbf16>
    %cst_21 = arith.constant dense<0.000000e+00> : vector<256x64xf32>
    %35 = tpu.matmul %33, %34, %cst_21 {dimension_numbers = #tpu.dot_dimension_numbers<[1], [0], [0], [1], [0, 0, 1, 1], [], []>} : vector<256x64xbf16>, vector<64x64xbf16>, vector<256x64xf32> -> vector<256x64xf32>
    %36 = arith.addf %32, %35 : vector<256x64xf32>
    %37 = vector.extract_strided_slice %3 {offsets = [265, 0], sizes = [256, 64], strides = [1, 1]} : vector<768x64xbf16> to vector<256x64xbf16>
    %c512 = arith.constant 512 : index
    %c0_22 = arith.constant 0 : index
    %38 = vector.load %arg5[%c512, %c0_22] : memref<576x64xbf16, #tpu.memory_space<vmem>>, vector<64x64xbf16>
    %cst_23 = arith.constant dense<0.000000e+00> : vector<256x64xf32>
    %39 = tpu.matmul %37, %38, %cst_23 {dimension_numbers = #tpu.dot_dimension_numbers<[1], [0], [0], [1], [0, 0, 1, 1], [], []>} : vector<256x64xbf16>, vector<64x64xbf16>, vector<256x64xf32> -> vector<256x64xf32>
    %40 = arith.addf %36, %39 : vector<256x64xf32>
    %c0_24 = arith.constant 0 : index
    %c0_25 = arith.constant 0 : index
    %41 = vector.load %arg6[%c0_24, %c0_25] : memref<1x64xf32, #tpu.memory_space<vmem>>, vector<1x64xf32>
    %42 = vector.broadcast %41 : vector<1x64xf32> to vector<256x64xf32>
    %43 = arith.mulf %40, %42 : vector<256x64xf32>
    %c0_26 = arith.constant 0 : index
    %c0_27 = arith.constant 0 : index
    %44 = vector.load %arg7[%c0_26, %c0_27] : memref<1x64xf32, #tpu.memory_space<vmem>>, vector<1x64xf32>
    %45 = vector.broadcast %44 : vector<1x64xf32> to vector<256x64xf32>
    %46 = arith.addf %43, %45 : vector<256x64xf32>
    %cst_28 = arith.constant 0.000000e+00 : f32
    %47 = vector.broadcast %cst_28 : f32 to vector<256x64xf32>
    %48 = arith.maximumf %46, %47 : vector<256x64xf32>
    %c0_29 = arith.constant 0 : index
    %c0_30 = arith.constant 0 : index
    %49 = vector.load %arg8[%c0_29, %c0_30] : memref<256x1xf32, #tpu.memory_space<vmem>>, vector<256x1xf32>
    %cst_31 = arith.constant 0.000000e+00 : f32
    %50 = vector.broadcast %cst_31 : f32 to vector<256x1xf32>
    %51 = arith.cmpf ogt, %49, %50 : vector<256x1xf32>
    %cst_32 = arith.constant 0.000000e+00 : f32
    %52 = vector.shape_cast %51 : vector<256x1xi1> to vector<256x1xi1>
    %53 = vector.broadcast %52 : vector<256x1xi1> to vector<256x64xi1>
    %54 = vector.broadcast %cst_32 : f32 to vector<256x64xf32>
    %55 = arith.select %53, %48, %54 : vector<256x64xi1>, vector<256x64xf32>
    %56 = arith.truncf %55 : vector<256x64xf32> to vector<256x64xbf16>
    %c0_33 = arith.constant 0 : index
    %c0_34 = arith.constant 0 : index
    %57 = vector.load %arg9[%c0_33, %c0_34] : memref<256x64xbf16, #tpu.memory_space<vmem>>, vector<256x64xbf16>
    tpu.vector_store %arg9[%c0_33, %c0_34], %56 {strides = array<i32>} : memref<256x64xbf16, #tpu.memory_space<vmem>>, vector<256x64xbf16>,
    return
  }
  func.func @transform_0(%arg0: i32, %arg1: i32) -> (i32, i32) {
    %c0_i32 = arith.constant 0 : i32
    %c0_i32_0 = arith.constant 0 : i32
    return %arg1, %c0_i32 : i32, i32
  }
  func.func @transform_1(%arg0: i32, %arg1: i32) -> (i32, i32) {
    %c1_i32 = arith.constant 1 : i32
    %0 = arith.addi %arg1, %c1_i32 : i32
    %c0_i32 = arith.constant 0 : i32
    %c0_i32_0 = arith.constant 0 : i32
    return %0, %c0_i32 : i32, i32
  }
  func.func @transform_2(%arg0: i32, %arg1: i32) -> (i32, i32) {
    %c2_i32 = arith.constant 2 : i32
    %0 = arith.addi %arg1, %c2_i32 : i32
    %c0_i32 = arith.constant 0 : i32
    %c0_i32_0 = arith.constant 0 : i32
    return %0, %c0_i32 : i32, i32
  }
  func.func @transform_3(%arg0: i32, %arg1: i32) -> (i32, i32) {
    %c0_i32 = arith.constant 0 : i32
    %c0_i32_0 = arith.constant 0 : i32
    return %c0_i32, %arg0 : i32, i32
  }
  func.func @transform_4(%arg0: i32, %arg1: i32) -> (i32, i32) {
    %c0_i32 = arith.constant 0 : i32
    %c0_i32_0 = arith.constant 0 : i32
    return %c0_i32, %arg0 : i32, i32
  }
  func.func @transform_5(%arg0: i32, %arg1: i32) -> (i32, i32) {
    %c0_i32 = arith.constant 0 : i32
    %c0_i32_0 = arith.constant 0 : i32
    return %c0_i32, %arg0 : i32, i32
  }
  func.func @transform_6(%arg0: i32, %arg1: i32) -> (i32, i32) {
    %c1_i32 = arith.constant 1 : i32
    %0 = arith.addi %arg1, %c1_i32 : i32
    %c0_i32 = arith.constant 0 : i32
    %c0_i32_0 = arith.constant 0 : i32
    return %0, %c0_i32 : i32, i32
  }
  func.func @transform_7(%arg0: i32, %arg1: i32) -> (i32, i32) {
    %c1_i32 = arith.constant 1 : i32
    %0 = arith.addi %arg1, %c1_i32 : i32
    %c0_i32 = arith.constant 0 : i32
    return %0, %arg0 : i32, i32
  }
}

module attributes {stable_mosaic.version = 11 : i64} {
  func.func @_matmul_bn_kernel(%arg0: i32, %arg1: i32, %arg2: memref<256x147xbf16, #tpu.memory_space<vmem>>, %arg3: memref<147x64xbf16, #tpu.memory_space<vmem>>, %arg4: memref<1x64xf32, #tpu.memory_space<vmem>>, %arg5: memref<1x64xf32, #tpu.memory_space<vmem>>, %arg6: memref<256x64xbf16, #tpu.memory_space<vmem>>) attributes {dimension_semantics = [#tpu.dimension_semantics<parallel>, #tpu.dimension_semantics<parallel>], iteration_bounds = array<i64: 1, 2>, scalar_prefetch = 0 : i64, scratch_operands = 0 : i64, tpu.core_type = #tpu.core_type<tc>, window_params = [{transform_indices = @transform_0, window_bounds = array<i64: 256, 147>}, {transform_indices = @transform_1, window_bounds = array<i64: 147, 64>}, {transform_indices = @transform_2, window_bounds = array<i64: 1, 64>}, {transform_indices = @transform_3, window_bounds = array<i64: 1, 64>}, {transform_indices = @transform_4, window_bounds = array<i64: 256, 64>}]} {
    %c0 = arith.constant 0 : index
    %c0_0 = arith.constant 0 : index
    %0 = vector.load %arg2[%c0, %c0_0] : memref<256x147xbf16, #tpu.memory_space<vmem>>, vector<256x147xbf16>
    %c0_1 = arith.constant 0 : index
    %c0_2 = arith.constant 0 : index
    %1 = vector.load %arg3[%c0_1, %c0_2] : memref<147x64xbf16, #tpu.memory_space<vmem>>, vector<147x64xbf16>
    %cst = arith.constant dense<0.000000e+00> : vector<256x64xf32>
    %2 = tpu.matmul %0, %1, %cst {dimension_numbers = #tpu.dot_dimension_numbers<[1], [0], [0], [1], [0, 0, 1, 1], [], []>} : vector<256x147xbf16>, vector<147x64xbf16>, vector<256x64xf32> -> vector<256x64xf32>
    %c0_3 = arith.constant 0 : index
    %c0_4 = arith.constant 0 : index
    %3 = vector.load %arg4[%c0_3, %c0_4] : memref<1x64xf32, #tpu.memory_space<vmem>>, vector<1x64xf32>
    %4 = vector.broadcast %3 : vector<1x64xf32> to vector<256x64xf32>
    %5 = arith.mulf %2, %4 : vector<256x64xf32>
    %c0_5 = arith.constant 0 : index
    %c0_6 = arith.constant 0 : index
    %6 = vector.load %arg5[%c0_5, %c0_6] : memref<1x64xf32, #tpu.memory_space<vmem>>, vector<1x64xf32>
    %7 = vector.broadcast %6 : vector<1x64xf32> to vector<256x64xf32>
    %8 = arith.addf %5, %7 : vector<256x64xf32>
    %cst_7 = arith.constant 0.000000e+00 : f32
    %9 = vector.broadcast %cst_7 : f32 to vector<256x64xf32>
    %10 = arith.maximumf %8, %9 : vector<256x64xf32>
    %11 = arith.truncf %10 : vector<256x64xf32> to vector<256x64xbf16>
    %c0_8 = arith.constant 0 : index
    %c0_9 = arith.constant 0 : index
    %12 = vector.load %arg6[%c0_8, %c0_9] : memref<256x64xbf16, #tpu.memory_space<vmem>>, vector<256x64xbf16>
    tpu.vector_store %arg6[%c0_8, %c0_9], %11 {strides = array<i32>} : memref<256x64xbf16, #tpu.memory_space<vmem>>, vector<256x64xbf16>,
    return
  }
  func.func @transform_0(%arg0: i32, %arg1: i32) -> (i32, i32) {
    %c0_i32 = arith.constant 0 : i32
    %c0_i32_0 = arith.constant 0 : i32
    return %arg1, %c0_i32 : i32, i32
  }
  func.func @transform_1(%arg0: i32, %arg1: i32) -> (i32, i32) {
    %c0_i32 = arith.constant 0 : i32
    %c0_i32_0 = arith.constant 0 : i32
    return %c0_i32, %arg0 : i32, i32
  }
  func.func @transform_2(%arg0: i32, %arg1: i32) -> (i32, i32) {
    %c0_i32 = arith.constant 0 : i32
    %c0_i32_0 = arith.constant 0 : i32
    return %c0_i32, %arg0 : i32, i32
  }
  func.func @transform_3(%arg0: i32, %arg1: i32) -> (i32, i32) {
    %c0_i32 = arith.constant 0 : i32
    %c0_i32_0 = arith.constant 0 : i32
    return %c0_i32, %arg0 : i32, i32
  }
  func.func @transform_4(%arg0: i32, %arg1: i32) -> (i32, i32) {
    %c0_i32 = arith.constant 0 : i32
    return %arg1, %arg0 : i32, i32
  }
}

</mosaic_0001>

<bundles_post_ra>
// kernel: tpu_custom_call.1
= control target key start
LH: loop header
LB: loop body
LE: loop exit
PB: predicated region body
PF: predicated region fallthrough
CT: control target
= control target key end

     0   :  { %vm249_vm0 = vcmask 1043456   ;;  %vm307_vm1 = vcmask 523264   ;;  %vm445_vm2 = vsmask.f32 4352  ;;  %vm767_vm3 = vsmask.f32 3328  ;;  %s4661_s3 = inlined_call_operand.vmem [shape: bf16[576,64], index: 3, kind: input, shape index: {}]   ;;  %s4662_s1 = inlined_call_operand.vmem [shape: bf16[768,64], index: 1, kind: input, shape index: {}]   ;;  %s4663_s0 = inlined_call_operand.vmem [shape: bf16[768,64], index: 0, kind: input, shape index: {}]   ;;  %s4664_s6 = inlined_call_operand.vmem [shape: f32[768,1], index: 6, kind: input, shape index: {}]   ;;  %s4665_s4 = inlined_call_operand.vmem [shape: f32[1,64], index: 4, kind: input, shape index: {}]   ;;  %s4666_s5 = inlined_call_operand.vmem [shape: f32[1,64], index: 5, kind: input, shape index: {}]   ;;  %s4667_s7 = inlined_call_operand.vmem [shape: bf16[768,64], index: 7, kind: output, shape index: {}]   ;;  %s4668_s2 = inlined_call_operand.vmem [shape: bf16[768,64], index: 2, kind: input, shape index: {}]  }
   0x1   :  { %v3150_v0 = vld [vmem:[%s4661_s3 + $0x38] sm:$0xff]  ;;  %v3149_v1 = vld [vmem:[%s4661_s3 + $0x30] sm:$0xff]  ;;  %v3148_v2 = vld [vmem:[%s4661_s3 + $0x28] sm:$0xff]  ;;  %vm1036_vm4 = vsmask.f32 256 }
   0x2   :  { %3179 = vmatpush.bf16.msra.mxu1 %v3150_v0  ;;  %3180 = vmatpush.bf16.msra.mxu2 %v3150_v0  ;;  %v3252_v3 = vld [vmem:[%s4662_s1 + $0x98] sm:$0xff]  ;;  %v3257_v4 = vld [vmem:[%s4662_s1 + $0xa0] sm:$0xff]  ;;  %v3153_v28 = vld [vmem:[%s4661_s3 + $0x50] sm:$0xff]  ;;  %vm1472_vm5 = vsmask.f32 7424 }
   0x3   :  { %3181 = vmatpush.bf16.msra.mxu3 %v3150_v0  ;;  %360 = vmatpush.bf16.msra.mxu0 %v3150_v0  ;;  %v3262_v5 = vld [vmem:[%s4662_s1 + $0xb8] sm:$0xff]  ;;  %v3267_v6 = vld [vmem:[%s4662_s1 + $0xc0] sm:$0xff]  ;;  %v257_v12 = vrot.slane %v3252_v3, 4  ;;  %v259_v13 = vrot.slane %v3257_v4, 4  ;;  %v3157_v29 = vld [vmem:[%s4661_s3 + $0x70] sm:$0xff] }
   0x4   :  { %v3272_v7 = vld [vmem:[%s4662_s1 + $0xd8] sm:$0xff]  ;;  %v3277_v8 = vld [vmem:[%s4662_s1 + $0xe0] sm:$0xff]  ;;  %v265_v14 = vrot.slane %v3262_v5, 4  ;;  %v267_v15 = vrot.slane %v3267_v6, 4  ;;  %v3145_v30 = vld [vmem:[%s4661_s3 + $0x10] sm:$0xff] }
   0x5   :  { %v3282_v9 = vld [vmem:[%s4663_s0 + $0x78] sm:$0xff]  ;;  %v3287_v10 = vld [vmem:[%s4662_s1 + $0x80] sm:$0xff]  ;;  %v273_v16 = vrot.slane %v3272_v7, 4  ;;  %v275_v17 = vrot.slane %v3277_v8, 4  ;;  %v3309_v22 = vsel %vm249_vm0, %v257_v12, %v259_v13  ;;  %v3161_v31 = vld [vmem:[%s4661_s3 + $0x90] sm:$0xff] }
   0x6   :  { %3182 = vmatpush.bf16.msra.mxu1 %v3149_v1  ;;  %3183 = vmatpush.bf16.msra.mxu2 %v3149_v1  ;;  %v3147_v11 = vld [vmem:[%s4661_s3 + $0x20] sm:$0xff]  ;;  %v250_v18 = vrot.slane %v3282_v9, 4  ;;  %v251_v19 = vrot.slane %v3287_v10, 4  ;;  %v3154_v20 = vld [vmem:[%s4661_s3 + $0x58] sm:$0xff]  ;;  %4713 = vst [vmem:[#allocation2_spill] sm:$0xff] %v3309_v22  ;;  %v3314_v23 = vsel %vm249_vm0, %v265_v14, %v267_v15  ;;  %v3152_v32 = vld [vmem:[%s4661_s3 + $0x48] sm:$0xff] }
   0x7   :  { %3184 = vmatpush.bf16.msra.mxu3 %v3149_v1  ;;  %361 = vmatpush.bf16.msra.mxu0 %v3149_v1  ;;  %v3158_v21 = vld [vmem:[%s4661_s3 + $0x78] sm:$0xff]  ;;  %4714 = vst [vmem:[#allocation3_spill] sm:$0xff] %v3314_v23  ;;  %v3319_v24 = vsel %vm249_vm0, %v273_v16, %v275_v17  ;;  %v3156_v33 = vld [vmem:[%s4661_s3 + $0x68] sm:$0xff]  ;;  %v3151_v48 = vld [vmem:[%s4661_s3 + $0x40] sm:$0xff] }
   0x8   :  { %4715 = vst [vmem:[#allocation4_spill] sm:$0xff] %v3319_v24  ;;  %v252_v25 = vsel %vm249_vm0, %v250_v18, %v251_v19  ;;  %v3146_v26 = vld [vmem:[%s4661_s3 + $0x18] sm:$0xff]  ;;  %v3356_v34 = vld [vmem:[%s4662_s1 + $0xa8] sm:$0xff]  ;;  %v3155_v49 = vld [vmem:[%s4661_s3 + $0x60] sm:$0xff] }
   0x9   :  { %v3162_v27 = vld [vmem:[%s4661_s3 + $0x98] sm:$0xff]  ;;  %v3361_v35 = vld [vmem:[%s4662_s1 + $0xc8] sm:$0xff]  ;;  %v261_v40 = vrot.slane %v3356_v34, 4  ;;  %v3143_v50 = vld [vmem:[%s4661_s3] sm:$0xff] }
   0xa   :  { %3185 = vmatpush.bf16.msra.mxu1 %v3148_v2  ;;  %3186 = vmatpush.bf16.msra.mxu2 %v3148_v2  ;;  %v3366_v36 = vld [vmem:[%s4662_s1 + $0xe8] sm:$0xff]  ;;  %v269_v41 = vrot.slane %v3361_v35, 4  ;;  %v3159_v51 = vld [vmem:[%s4661_s3 + $0x80] sm:$0xff]  ;;  %v3418_v52 = vld [vmem:[%s4662_s1 + $0xb0] sm:$0xff] }
   0xb   :  { %3187 = vmatpush.bf16.msra.mxu3 %v3148_v2  ;;  %362 = vmatpush.bf16.msra.mxu0 %v3148_v2  ;;  %v3371_v37 = vld [vmem:[%s4662_s1 + $0x88] sm:$0xff]  ;;  %v277_v42 = vrot.slane %v3366_v36, 4  ;;  %v3384_v44 = vsel %vm249_vm0, %v259_v13, %v261_v40  ;;  %v3423_v53 = vld [vmem:[%s4662_s1 + $0xd0] sm:$0xff]  ;;  %v263_v56 = vrot.slane %v3418_v52, 4  ;;  %v3170_v0 = vld [vmem:[%s4661_s3 + $0xd8] sm:$0xff] }
   0xc   :  { %v3144_v38 = vld [vmem:[%s4661_s3 + $0x8] sm:$0xff]  ;;  %v253_v43 = vrot.slane %v3371_v37, 4  ;;  %4716 = vst [vmem:[#allocation5_spill] sm:$0xff] %v3384_v44  ;;  %v3387_v45 = vsel %vm249_vm0, %v267_v15, %v269_v41  ;;  %v3428_v54 = vld [vmem:[%s4662_s1 + $0xf0] sm:$0xff]  ;;  %v271_v57 = vrot.slane %v3423_v53, 4  ;;  %v3174_v1 = vld [vmem:[%s4661_s3 + $0xf8] sm:$0xff] }
   0xd   :  { %v3160_v39 = vld [vmem:[%s4661_s3 + $0x88] sm:$0xff]  ;;  %4717 = vst [vmem:[#allocation6_spill] sm:$0xff] %v3387_v45  ;;  %v3390_v46 = vsel %vm249_vm0, %v275_v17, %v277_v42  ;;  %v3433_v55 = vld [vmem:[%s4662_s1 + $0x90] sm:$0xff]  ;;  %v279_v58 = vrot.slane %v3428_v54, 4  ;;  %v3440_v60 = vsel %vm249_vm0, %v261_v40, %v263_v56  ;;  %v3166_v2 = vld [vmem:[%s4661_s3 + $0xb8] sm:$0xff]  ;;  %v3480_v17 = vsel %vm249_vm0, %v263_v56, %v265_v14 }
   0xe   :  { %3188 = vmatpush.bf16.msra.mxu1 %v3147_v11  ;;  %3189 = vmatpush.bf16.msra.mxu2 %v3147_v11  ;;  %4718 = vst [vmem:[#allocation7_spill] sm:$0xff] %v3390_v46  ;;  %v3393_v47 = vsel %vm249_vm0, %v251_v19, %v253_v43  ;;  %v255_v59 = vrot.slane %v3433_v55, 4  ;;  %v3443_v61 = vsel %vm249_vm0, %v269_v41, %v271_v57  ;;  %v3474_v13 = vld [vmem:[%s4662_s1 + $0xf8] sm:$0xff]  ;;  %v447_v14 = vshrl.u32 %v3282_v9, 16 }
   0xf   :  { %3190 = vmatpush.bf16.msra.mxu3 %v3147_v11  ;;  %363 = vmatpush.bf16.msra.mxu0 %v3147_v11  ;;  %4719 = vst [vmem:[#allocation8_spill] sm:$0xff] %v3440_v60  ;;  %v3446_v62 = vsel %vm249_vm0, %v277_v42, %v279_v58  ;;  %v3178_v11 = vld [vmem:[%s4661_s3 + $0x118] sm:$0xff]  ;;  %v4669_v15 = vrot.slane %v3474_v13, 4  ;;  %v3485_v18 = vsel %vm249_vm0, %v271_v57, %v273_v16  ;;  %v450_v16 = vshll.u32 %v3282_v9, 16 }
  0x10   :  { %4720 = vst [vmem:[#allocation9_spill] sm:$0xff] %v3443_v61  ;;  %v3449_v63 = vsel %vm249_vm0, %v253_v43, %v255_v59  ;;  %v1037_v41 = vrot.slane %v447_v14, 7 }
  0x11   :  { %2793 = vmatmul.msk.bf16.vlgmr.msra.gmra.mxu1 %vm307_vm1, %v3309_v22  ;;  %2797 = vmatmul.msk.bf16.vlgmr.msra.gmra.mxu2 %vm307_vm1, %v3314_v23  ;;  %4721 = vst [vmem:[#allocation10_spill] sm:$0xff] %v3446_v62  ;;  %v3490_v19 = vsel %vm249_vm0, %v279_v58, %v4669_v15  ;;  %v769_v9 = vrot.slane %v450_v16, 5 }
  0x12   :  { %911 = vmatpush.bf16.msrb.mxu2 %v3154_v20  ;;  %2801 = vmatmul.msk.bf16.vlgmr.msra.gmra.mxu3 %vm307_vm1, %v3319_v24  ;;  %4722 = vst [vmem:[#allocation11_spill] sm:$0xff] %v3480_v17  ;;  %v3495_v20 = vsel %vm249_vm0, %v255_v59, %v257_v12  ;;  %v449_v12 = vrot.slane %v447_v14, 3 }
  0x13   :  { %1162 = vmatpush.bf16.msrb.mxu3 %v3158_v21  ;;  %2789 = vmatmul.msk.bf16.vlgmr.msra.gmra.mxu0 %vm307_vm1, %v252_v25  ;;  %4723 = vst [vmem:[#allocation12_spill] sm:$0xff] %v3485_v18  ;;  %v3504_v21 = vshrl.u32 %v3287_v10, 16  ;;  %v3507_v25 = vshll.u32 %v3287_v10, 16 }
  0x14   :  { %674 = vmatpush.bf16.msrb.mxu1 %v3146_v26  ;;  %1347 = vmatpush.bf16.msrb.mxu0 %v3162_v27  ;;  %4724 = vst [vmem:[#allocation13_spill] sm:$0xff] %v3490_v19  ;;  %v452_v26 = vrot.slane %v450_v16, 4 }
  0x15   :  { %4725 = vst [vmem:[#allocation14_spill] sm:$0xff] %v3495_v20  ;;  %v457_v27 = vrot.slane %v3504_v21, 3 }
  0x16   :  { %912 = vmatpush.bf16.msrb.mxu2 %v3153_v28  ;;  %v460_v28 = vrot.slane %v3507_v25, 4 }
  0x17   :  { %1163 = vmatpush.bf16.msrb.mxu3 %v3157_v29  ;;  %v768_v29 = vrot.slane %v447_v14, 4 }
  0x18   :  { %675 = vmatpush.bf16.msrb.mxu1 %v3145_v30  ;;  %1348 = vmatpush.bf16.msrb.mxu0 %v3161_v31  ;;  %v771_v30 = vrot.slane %v3504_v21, 4  ;;  %v772_v31 = vrot.slane %v3507_v25, 5 }
  0x1a   :  { %913 = vmatpush.bf16.msrb.mxu2 %v3152_v32  ;;  %v1038_v32 = vrot.slane %v3504_v21, 7  ;;  %v773_v40 = vor.u32 %v772_v31, %v771_v30 }
  0x1b   :  { %1164 = vmatpush.bf16.msrb.mxu3 %v3156_v33  ;;  %v453_v33 = vor.u32 %v452_v26, %v449_v12  ;;  %v3554_v12 = vshrl.u32 %v3433_v55, 16  ;;  %v3557_v26 = vshll.u32 %v3433_v55, 16 }
  0x1c   :  { %676 = vmatpush.bf16.msrb.mxu1 %v3144_v38  ;;  %1349 = vmatpush.bf16.msrb.mxu0 %v3160_v39  ;;  %v461_v38 = vor.u32 %v460_v28, %v457_v27  ;;  %v770_v39 = vor.u32 %v769_v9, %v768_v29  ;;  %v1039_v42 = vor.u32 %v1038_v32, %v3507_v25 }
  0x1d   :  { %v475_v27 = vrot.slane %v3554_v12, 3  ;;  %v478_v28 = vrot.slane %v3557_v26, 4  ;;  %v779_v29 = vrot.slane %v3554_v12, 4  ;;  %v780_v9 = vrot.slane %v3557_v26, 5 }
  0x1e   :  { %914 = vmatpush.bf16.msrb.mxu2 %v3151_v48  ;;  %v462_v43 = vsel %vm445_vm2, %v453_v33, %v461_v38  ;;  %v774_v48 = vsel %vm767_vm3, %v770_v39, %v773_v40  ;;  %v1044_v30 = vrot.slane %v3554_v12, 7 }
  0x1f   :  { %1165 = vmatpush.bf16.msrb.mxu3 %v3155_v49  ;;  %v1040_v49 = vsel %vm1036_vm4, %v1037_v41, %v1039_v42  ;;  %v479_v31 = vor.u32 %v478_v28, %v475_v27  ;;  %v3583_v41 = vshll.u32 %v3252_v3, 16  ;;  %v3169_v42 = vld [vmem:[%s4661_s3 + $0xd0] sm:$0xff]  ;;  %v3618_v28 = vshrl.u32 %v3257_v4, 16 }
  0x20   :  { %677 = vmatpush.bf16.msrb.mxu1 %v3143_v50  ;;  %1350 = vmatpush.bf16.msrb.mxu0 %v3159_v51  ;;  %v3528_v50 = vshrl.u32 %v3371_v37, 16  ;;  %v3531_v51 = vshll.u32 %v3371_v37, 16 }
  0x21   :  { %2794 = vmatmul.msk.bf16.gmra.mxu1 %vm307_vm1, %v3384_v44  ;;  %2798 = vmatmul.msk.bf16.gmra.mxu2 %vm307_vm1, %v3387_v45  ;;  %4729 = vst [vmem:[#allocation18_spill] sm:$0xff] %v3618_v28 }
  0x22   :  { %2802 = vmatmul.msk.bf16.gmra.mxu3 %vm307_vm1, %v3390_v46  ;;  %1763 = vmatpush.bf16.msra.mxu2 %v3170_v0  ;;  %v466_v56 = vrot.slane %v3528_v50, 3  ;;  %v469_v57 = vrot.slane %v3531_v51, 4  ;;  %v775_v58 = vrot.slane %v3528_v50, 4  ;;  %v776_v59 = vrot.slane %v3531_v51, 5 }
  0x23   :  { %2790 = vmatmul.msk.bf16.gmra.mxu0 %vm307_vm1, %v3393_v47  ;;  %1921 = vmatpush.bf16.msra.mxu3 %v3174_v1  ;;  %v1041_v0 = vrot.slane %v3528_v50, 7 }
  0x24   :  { %1601 = vmatpush.bf16.msra.mxu1 %v3166_v2  ;;  %2081 = vmatpush.bf16.msra.mxu0 %v3178_v11  ;;  %v470_v1 = vor.u32 %v469_v57, %v466_v56  ;;  %v777_v2 = vor.u32 %v776_v59, %v775_v58  ;;  %v784_v57 = vrot.slane %v3583_v41, 5  ;;  %v3177_v59 = vld [vmem:[%s4661_s3 + $0x110] sm:$0xff] }
  0x26   :  { %v3540_v11 = vsel %vm445_vm2, %v461_v38, %v470_v1  ;;  %v3543_v14 = vsel %vm767_vm3, %v773_v40, %v777_v2  ;;  %v3566_v33 = vsel %vm445_vm2, %v470_v1, %v479_v31  ;;  %v3580_v40 = vshrl.u32 %v3252_v3, 16  ;;  %1764 = vmatpush.bf16.msra.mxu2 %v3169_v42 }
  0x28   :  { %4726 = vst [vmem:[#allocation15_spill] sm:$0xff] %v3580_v40  ;;  %v783_v56 = vrot.slane %v3580_v40, 4  ;;  %v1047_v58 = vrot.slane %v3580_v40, 7  ;;  %2082 = vmatpush.bf16.msra.mxu0 %v3177_v59  ;;  %v3651_v59 = vshll.u32 %v3356_v34, 16 }
  0x2a   :  { %v785_v1 = vor.u32 %v784_v57, %v783_v56  ;;  %v3648_v57 = vshrl.u32 %v3356_v34, 16  ;;  %4734 = vst [vmem:[#allocation23_spill] sm:$0xff] %v3651_v59 }
  0x2c   :  { %4733 = vst [vmem:[#allocation22_spill] sm:$0xff] %v3648_v57 }
  0x31   :  { %2795 = vmatmul.msk.bf16.gmra.mxu1 %vm307_vm1, %v3440_v60  ;;  %2799 = vmatmul.msk.bf16.gmra.mxu2 %vm307_vm1, %v3443_v61 }
  0x32   :  { %2803 = vmatmul.msk.bf16.gmra.mxu3 %vm307_vm1, %v3446_v62 }
  0x33   :  { %2791 = vmatmul.msk.bf16.gmra.mxu0 %vm307_vm1, %v3449_v63 }
  0x41   :  { %2796 = vmatmul.msk.bf16.gmra.mxu1 %vm307_vm1, %v3480_v17  ;;  %2800 = vmatmul.msk.bf16.gmra.mxu2 %vm307_vm1, %v3485_v18 }
  0x42   :  { %2804 = vmatmul.msk.bf16.gmra.mxu3 %vm307_vm1, %v3490_v19 }
  0x43   :  { %2792 = vmatmul.msk.bf16.gmra.mxu0 %vm307_vm1, %v3495_v20 }
  0x51   :  { %2821 = vmatmul.msk.bf16.vlgmr.msrb.gmra.mxu1 %vm307_vm1, %v462_v43  ;;  %2853 = vmatmul.msk.bf16.vlgmr.msrb.gmra.mxu2 %vm307_vm1, %v774_v48  ;;  %v3173_v43 = vld [vmem:[%s4661_s3 + $0xf0] sm:$0xff]  ;;  %v484_v48 = vrot.slane %v3580_v40, 3 }
  0x52   :  { %2885 = vmatmul.msk.bf16.vlgmr.msrb.gmra.mxu3 %vm307_vm1, %v1040_v49  ;;  %v487_v49 = vrot.slane %v3583_v41, 4 }
  0x53   :  { %2917 = vmatmul.msk.bf16.vlgmr.msrb.gmra.mxu0 %vm307_vm1, %v3287_v10  ;;  %v1042_v10 = vor.u32 %v1041_v0, %v3531_v51  ;;  %1922 = vmatpush.bf16.msra.mxu3 %v3173_v43 }
  0x55   :  { %v1043_v16 = vsel %vm1036_vm4, %v1038_v32, %v1042_v10  ;;  %v781_v32 = vor.u32 %v780_v9, %v779_v29  ;;  %v3621_v29 = vshll.u32 %v3257_v4, 16  ;;  %v493_v9 = vrot.slane %v3618_v28, 3 }
  0x57   :  { %v3569_v38 = vsel %vm767_vm3, %v777_v2, %v781_v32  ;;  %v1048_v2 = vor.u32 %v1047_v58, %v3583_v41  ;;  %4730 = vst [vmem:[#allocation19_spill] sm:$0xff] %v3621_v29 }
  0x59   :  { %v1049_v27 = vsel %vm1036_vm4, %v1044_v30, %v1048_v2  ;;  %v502_v2 = vrot.slane %v3648_v57, 3 }
  0x61   :  { %2822 = vmatmul.msk.bf16.gmra.mxu1 %vm307_vm1, %v3540_v11  ;;  %2854 = vmatmul.msk.bf16.gmra.mxu2 %vm307_vm1, %v3543_v14 }
  0x62   :  { %2886 = vmatmul.msk.bf16.gmra.mxu3 %vm307_vm1, %v1043_v16  ;;  %v3607_v16 = vsel %vm767_vm3, %v781_v32, %v785_v1  ;;  %v788_v32 = vrot.slane %v3621_v29, 5 }
  0x63   :  { %2918 = vmatmul.msk.bf16.gmra.mxu0 %vm307_vm1, %v3371_v37  ;;  %v1045_v37 = vor.u32 %v1044_v30, %v3557_v26  ;;  %4728 = vst [vmem:[#allocation17_spill] sm:$0xff] %v3607_v16  ;;  %v496_v30 = vrot.slane %v3621_v29, 4 }
  0x65   :  { %v1046_v39 = vsel %vm1036_vm4, %v1041_v0, %v1045_v37  ;;  %v488_v0 = vor.u32 %v487_v49, %v484_v48  ;;  %v1050_v37 = vrot.slane %v3618_v28, 7 }
  0x67   :  { %v3604_v10 = vsel %vm445_vm2, %v479_v31, %v488_v0  ;;  %v787_v31 = vrot.slane %v3618_v28, 4 }
  0x68   :  { %4727 = vst [vmem:[#allocation16_spill] sm:$0xff] %v3604_v10 }
  0x69   :  { %v789_v42 = vor.u32 %v788_v32, %v787_v31  ;;  %v1053_v31 = vrot.slane %v3648_v57, 7 }
  0x6b   :  { %v3635_v48 = vsel %vm767_vm3, %v785_v1, %v789_v42 }
  0x6c   :  { %4732 = vst [vmem:[#allocation21_spill] sm:$0xff] %v3635_v48 }
  0x71   :  { %2823 = vmatmul.msk.bf16.gmra.mxu1 %vm307_vm1, %v3566_v33  ;;  %2855 = vmatmul.msk.bf16.gmra.mxu2 %vm307_vm1, %v3569_v38 }
  0x72   :  { %2887 = vmatmul.msk.bf16.gmra.mxu3 %vm307_vm1, %v1046_v39  ;;  %v497_v39 = vor.u32 %v496_v30, %v493_v9  ;;  %v791_v9 = vrot.slane %v3648_v57, 4 }
  0x73   :  { %2919 = vmatmul.msk.bf16.gmra.mxu0 %vm307_vm1, %v3433_v55  ;;  %v3165_v55 = vld [vmem:[%s4661_s3 + $0xb0] sm:$0xff] }
  0x74   :  { %1602 = vmatpush.bf16.msra.mxu1 %v3165_v55  ;;  %v3632_v55 = vsel %vm445_vm2, %v488_v0, %v497_v39 }
  0x75   :  { %4731 = vst [vmem:[#allocation20_spill] sm:$0xff] %v3632_v55 }
  0x81   :  { %2824 = vmatmul.msk.bf16.gmra.mxu1 %vm307_vm1, %v3604_v10  ;;  %2856 = vmatmul.msk.bf16.gmra.mxu2 %vm307_vm1, %v3607_v16 }
  0x82   :  { %2888 = vmatmul.msk.bf16.gmra.mxu3 %vm307_vm1, %v1049_v27  ;;  %v505_v27 = vrot.slane %v3651_v59, 4 }
  0x83   :  { %2920 = vmatmul.msk.bf16.gmra.mxu0 %vm307_vm1, %v3252_v3  ;;  %v1051_v3 = vor.u32 %v1050_v37, %v3621_v29 }
  0x84   :  { %v506_v32 = vor.u32 %v505_v27, %v502_v2 }
  0x85   :  { %v1052_v56 = vsel %vm1036_vm4, %v1047_v58, %v1051_v3 }
  0x86   :  { %v3674_v46 = vsel %vm445_vm2, %v497_v39, %v506_v32  ;;  %v3690_v39 = vshrl.u32 %v3418_v52, 16 }
  0x87   :  { %4737 = vst [vmem:[#allocation26_spill] sm:$0xff] %v3674_v46 }
  0x88   :  { %4739 = vst [vmem:[#allocation28_spill] sm:$0xff] %v3690_v39  ;;  %v1056_v45 = vrot.slane %v3690_v39, 7 }
  0x8e   :  { %v3629_v43 = vpop.f32.mrf.mxu1 }
  0x90   :  { %v3637_v49 = vpop.f32.mrf.mxu0 }
  0x91   :  { %2825 = vmatmul.msk.bf16.gmra.mxu1 %vm307_vm1, %v3632_v55  ;;  %2857 = vmatmul.msk.bf16.gmra.mxu2 %vm307_vm1, %v3635_v48 }
  0x92   :  { %2889 = vmatmul.msk.bf16.gmra.mxu3 %vm307_vm1, %v1052_v56  ;;  %v1054_v56 = vor.u32 %v1053_v31, %v3651_v59 }
  0x93   :  { %2921 = vmatmul.msk.bf16.gmra.mxu0 %vm307_vm1, %v3257_v4  ;;  %v792_v4 = vrot.slane %v3651_v59, 5 }
  0x94   :  { %v3653_v0 = vpop.f32.mrf.mxu2  ;;  %v1055_v61 = vsel %vm1036_vm4, %v1050_v37, %v1054_v56 }
  0x95   :  { %v3655_v58 = vpop.f32.mrf.mxu3  ;;  %v793_v3 = vor.u32 %v792_v4, %v791_v9  ;;  %v511_v9 = vrot.slane %v3690_v39, 3 }
  0x96   :  { %4735 = vst [vmem:[#allocation24_spill] sm:$0xff] %v3655_v58  ;;  %v3657_v1 = vpop.f32.mrf.mxu1 }
  0x97   :  { %v3677_v24 = vsel %vm767_vm3, %v789_v42, %v793_v3  ;;  %v3693_v42 = vshll.u32 %v3418_v52, 16 }
  0x98   :  { %v3663_v30 = vpop.f32.mrf.mxu0  ;;  %4738 = vst [vmem:[#allocation27_spill] sm:$0xff] %v3677_v24 }
  0x99   :  { %4740 = vst [vmem:[#allocation29_spill] sm:$0xff] %v3693_v42  ;;  %v514_v4 = vrot.slane %v3693_v42, 4  ;;  %v1057_v60 = vor.u32 %v1056_v45, %v3693_v42 }
  0x9b   :  { %v515_v23 = vor.u32 %v514_v4, %v511_v9 }
  0x9c   :  { %v3667_v15 = vpop.f32.mrf.mxu2 }
  0x9d   :  { %v3669_v19 = vpop.f32.mrf.mxu3  ;;  %v3716_v58 = vsel %vm445_vm2, %v506_v32, %v515_v23  ;;  %v3732_v32 = vshrl.u32 %v3262_v5, 16 }
  0x9e   :  { %4736 = vst [vmem:[#allocation25_spill] sm:$0xff] %v3669_v19  ;;  %v3671_v62 = vpop.f32.mrf.mxu1 }
  0x9f   :  { %4744 = vst [vmem:[#allocation33_spill] sm:$0xff] %v3716_v58  ;;  %v520_v4 = vrot.slane %v3732_v32, 3 }
  0xa0   :  { %v3679_v18 = vpop.f32.mrf.mxu0  ;;  %4746 = vst [vmem:[#allocation35_spill] sm:$0xff] %v3732_v32 }
  0xa1   :  { %2826 = vmatmul.msk.bf16.gmra.mxu1 %vm307_vm1, %v3674_v46  ;;  %2858 = vmatmul.msk.bf16.gmra.mxu2 %vm307_vm1, %v3677_v24 }
  0xa2   :  { %2890 = vmatmul.msk.bf16.gmra.mxu3 %vm307_vm1, %v1055_v61  ;;  %v795_v61 = vrot.slane %v3690_v39, 4  ;;  %v1058_v39 = vsel %vm1036_vm4, %v1053_v31, %v1057_v60  ;;  %v3168_v60 = vld [vmem:[%s4661_s3 + $0xc8] sm:$0xff] }
  0xa3   :  { %2922 = vmatmul.msk.bf16.gmra.mxu0 %vm307_vm1, %v3356_v34  ;;  %v796_v34 = vrot.slane %v3693_v42, 5  ;;  %v3172_v31 = vld [vmem:[%s4661_s3 + $0xe8] sm:$0xff]  ;;  %1765 = vmatpush.bf16.msra.mxu2 %v3168_v60 }
  0xa4   :  { %v3695_v2 = vpop.f32.mrf.mxu2  ;;  %1923 = vmatpush.bf16.msra.mxu3 %v3172_v31  ;;  %v3164_v60 = vld [vmem:[%s4661_s3 + $0xa8] sm:$0xff] }
  0xa5   :  { %v3697_v37 = vpop.f32.mrf.mxu3  ;;  %v797_v17 = vor.u32 %v796_v34, %v795_v61  ;;  %v799_v34 = vrot.slane %v3732_v32, 4  ;;  %v3176_v31 = vld [vmem:[%s4661_s3 + $0x108] sm:$0xff]  ;;  %1603 = vmatpush.bf16.msra.mxu1 %v3164_v60 }
  0xa6   :  { %4741 = vst [vmem:[#allocation30_spill] sm:$0xff] %v3697_v37  ;;  %v3699_v27 = vpop.f32.mrf.mxu1  ;;  %2083 = vmatpush.bf16.msra.mxu0 %v3176_v31 }
  0xa7   :  { %v3719_v24 = vsel %vm767_vm3, %v793_v3, %v797_v17  ;;  %v3735_v3 = vshll.u32 %v3262_v5, 16 }
  0xa8   :  { %v3705_v56 = vpop.f32.mrf.mxu0  ;;  %4745 = vst [vmem:[#allocation34_spill] sm:$0xff] %v3719_v24 }
  0xa9   :  { %4747 = vst [vmem:[#allocation36_spill] sm:$0xff] %v3735_v3  ;;  %v523_v61 = vrot.slane %v3735_v3, 4 }
  0xac   :  { %v3709_v19 = vpop.f32.mrf.mxu2 }
  0xad   :  { %4742 = vst [vmem:[#allocation31_spill] sm:$0xff] %v3709_v19  ;;  %v3711_v37 = vpop.f32.mrf.mxu3 }
  0xae   :  { %4743 = vst [vmem:[#allocation32_spill] sm:$0xff] %v3711_v37  ;;  %v3713_v57 = vpop.f32.mrf.mxu1  ;;  %v800_v37 = vrot.slane %v3735_v3, 5 }
  0xb0   :  { %v3721_v44 = vpop.f32.mrf.mxu0  ;;  %v801_v42 = vor.u32 %v800_v37, %v799_v34 }
  0xb1   :  { %2827 = vmatmul.msk.bf16.gmra.mxu1 %vm307_vm1, %v3716_v58  ;;  %2859 = vmatmul.msk.bf16.gmra.mxu2 %vm307_vm1, %v3719_v24  ;;  %v1059_v58 = vrot.slane %v3732_v32, 7 }
  0xb2   :  { %2891 = vmatmul.msk.bf16.gmra.mxu3 %vm307_vm1, %v1058_v39  ;;  %v3773_v22 = vsel %vm767_vm3, %v797_v17, %v801_v42  ;;  %v3789_v17 = vshll.u32 %v3267_v6, 16 }
  0xb3   :  { %2923 = vmatmul.msk.bf16.gmra.mxu0 %vm307_vm1, %v3418_v52  ;;  %v1060_v46 = vor.u32 %v1059_v58, %v3735_v3  ;;  %4753 = vst [vmem:[#allocation42_spill] sm:$0xff] %v3773_v22 }
  0xb4   :  { %v3743_v9 = vpop.f32.mrf.mxu2  ;;  %4755 = vst [vmem:[#allocation44_spill] sm:$0xff] %v3789_v17 }
  0xb5   :  { %4748 = vst [vmem:[#allocation37_spill] sm:$0xff] %v3743_v9  ;;  %v3745_v39 = vpop.f32.mrf.mxu3  ;;  %v1061_v60 = vsel %vm1036_vm4, %v1056_v45, %v1060_v46 }
  0xb6   :  { %4749 = vst [vmem:[#allocation38_spill] sm:$0xff] %v3745_v39  ;;  %v3747_v52 = vpop.f32.mrf.mxu1  ;;  %v524_v39 = vor.u32 %v523_v61, %v520_v4  ;;  %v532_v61 = vrot.slane %v3789_v17, 4 }
  0xb8   :  { %v3753_v24 = vpop.f32.mrf.mxu0  ;;  %v3770_v32 = vsel %vm445_vm2, %v515_v23, %v524_v39  ;;  %v3786_v23 = vshrl.u32 %v3267_v6, 16 }
  0xb9   :  { %4752 = vst [vmem:[#allocation41_spill] sm:$0xff] %v3770_v32 }
  0xba   :  { %4754 = vst [vmem:[#allocation43_spill] sm:$0xff] %v3786_v23  ;;  %v529_v4 = vrot.slane %v3786_v23, 3  ;;  %v803_v34 = vrot.slane %v3786_v23, 4 }
  0xbc   :  { %v3763_v59 = vpop.f32.mrf.mxu2 }
  0xbd   :  { %4750 = vst [vmem:[#allocation39_spill] sm:$0xff] %v3763_v59  ;;  %v3765_v28 = vpop.f32.mrf.mxu3 }
  0xbe   :  { %4751 = vst [vmem:[#allocation40_spill] sm:$0xff] %v3765_v28  ;;  %v3767_v48 = vpop.f32.mrf.mxu1  ;;  %v533_v28 = vor.u32 %v532_v61, %v529_v4 }
  0xc0   :  { %v3775_v55 = vpop.f32.mrf.mxu0  ;;  %v3810_v59 = vsel %vm445_vm2, %v524_v39, %v533_v28  ;;  %v3825_v39 = vshrl.u32 %v3361_v35, 16 }
  0xc1   :  { %2828 = vmatmul.msk.bf16.gmra.mxu1 %vm307_vm1, %v3770_v32  ;;  %2860 = vmatmul.msk.bf16.gmra.mxu2 %vm307_vm1, %v3773_v22  ;;  %4760 = vst [vmem:[#allocation49_spill] sm:$0xff] %v3810_v59 }
  0xc2   :  { %2892 = vmatmul.msk.bf16.gmra.mxu3 %vm307_vm1, %v1061_v60  ;;  %v1062_v60 = vrot.slane %v3786_v23, 7  ;;  %4762 = vst [vmem:[#allocation51_spill] sm:$0xff] %v3825_v39  ;;  %v538_v4 = vrot.slane %v3825_v39, 3 }
  0xc3   :  { %2924 = vmatmul.msk.bf16.gmra.mxu0 %vm307_vm1, %v3262_v5  ;;  %v804_v5 = vrot.slane %v3789_v17, 5 }
  0xc4   :  { %v3791_v37 = vpop.f32.mrf.mxu2  ;;  %v1063_v32 = vor.u32 %v1062_v60, %v3789_v17 }
  0xc5   :  { %4756 = vst [vmem:[#allocation45_spill] sm:$0xff] %v3791_v37  ;;  %v3793_v45 = vpop.f32.mrf.mxu3  ;;  %v805_v22 = vor.u32 %v804_v5, %v803_v34  ;;  %v807_v34 = vrot.slane %v3825_v39, 4 }
  0xc6   :  { %4757 = vst [vmem:[#allocation46_spill] sm:$0xff] %v3793_v45  ;;  %v3795_v46 = vpop.f32.mrf.mxu1  ;;  %v1064_v23 = vsel %vm1036_vm4, %v1059_v58, %v1063_v32 }
  0xc7   :  { %v3813_v29 = vsel %vm767_vm3, %v801_v42, %v805_v22  ;;  %v3828_v42 = vshll.u32 %v3361_v35, 16 }
  0xc8   :  { %v3801_v31 = vpop.f32.mrf.mxu0  ;;  %4761 = vst [vmem:[#allocation50_spill] sm:$0xff] %v3813_v29 }
  0xc9   :  { %v541_v61 = vrot.slane %v3828_v42, 4 }
  0xcb   :  { %v542_v17 = vor.u32 %v541_v61, %v538_v4 }
  0xcc   :  { %v3805_v3 = vpop.f32.mrf.mxu2 }
  0xcd   :  { %4758 = vst [vmem:[#allocation47_spill] sm:$0xff] %v3805_v3  ;;  %v3807_v45 = vpop.f32.mrf.mxu3  ;;  %v3840_v19 = vsel %vm445_vm2, %v533_v28, %v542_v17 }
  0xce   :  { %4759 = vst [vmem:[#allocation48_spill] sm:$0xff] %v3807_v45  ;;  %v679_v37 = vpop.f32.mrf.mxu1 }
  0xcf   :  { %v680_v40 = vadd.f32 %v679_v37, %v3637_v49 }
  0xd0   :  { %v1352_v9 = vpop.f32.mrf.mxu0 }
  0xd1   :  { %2829 = vmatmul.msk.bf16.gmra.mxu1 %vm307_vm1, %v3810_v59  ;;  %2861 = vmatmul.msk.bf16.gmra.mxu2 %vm307_vm1, %v3813_v29  ;;  %v1065_v29 = vrot.slane %v3825_v39, 7 }
  0xd2   :  { %2893 = vmatmul.msk.bf16.gmra.mxu3 %vm307_vm1, %v1064_v23  ;;  %v808_v23 = vrot.slane %v3828_v42, 5 }
  0xd3   :  { %2925 = vmatmul.msk.bf16.gmra.mxu0 %vm307_vm1, %v3267_v6 }
  0xd4   :  { %v916_v49 = vpop.f32.mrf.mxu2 }
  0xd5   :  { %v996_v37 = vadd.f32 %v916_v49, %v680_v40  ;;  %v1167_v58 = vpop.f32.mrf.mxu3  ;;  %v809_v40 = vor.u32 %v808_v23, %v807_v34  ;;  %v1066_v49 = vor.u32 %v1065_v29, %v3828_v42 }
  0xd6   :  { %v681_v32 = vpop.f32.mrf.mxu1 }
  0xd7   :  { %v1247_v5 = vadd.f32 %v1167_v58, %v996_v37  ;;  %v682_v6 = vadd.f32 %v681_v32, %v3663_v30  ;;  %v3843_v37 = vsel %vm767_vm3, %v805_v22, %v809_v40  ;;  %v3857_v22 = vshrl.u32 %v3423_v53, 16 }
  0xd8   :  { %v1354_v45 = vpop.f32.mrf.mxu0 }
  0xd9   :  { %v3836_v59 = vadd.f32 %v1352_v9, %v1247_v5  ;;  %v1067_v9 = vsel %vm1036_vm4, %v1062_v60, %v1066_v49  ;;  %4765 = vst [vmem:[#allocation54_spill] sm:$0xff] %v3857_v22  ;;  %v547_v60 = vrot.slane %v3857_v22, 3  ;;  %v811_v4 = vrot.slane %v3857_v22, 4 }
  0xda   :  { %v1068_v5 = vrot.slane %v3857_v22, 7 }
  0xdb   :  { %4763 = vst [vmem:[#allocation52_spill] sm:$0xff] %v3836_v59 }
  0xdc   :  { %v918_v3 = vpop.f32.mrf.mxu2 }
  0xdd   :  { %v997_v16 = vadd.f32 %v918_v3, %v682_v6  ;;  %v1169_v20 = vpop.f32.mrf.mxu3 }
  0xde   :  { %v684_v10 = vpop.f32.mrf.mxu1 }
  0xdf   :  { %v1248_v30 = vadd.f32 %v1169_v20, %v997_v16  ;;  %v685_v58 = vadd.f32 %v684_v10, %v3679_v18  ;;  %v3860_v18 = vshll.u32 %v3423_v53, 16 }
  0xe0   :  { %v1357_v32 = vpop.f32.mrf.mxu0 }
  0xe1   :  { %2830 = vmatmul.msk.bf16.gmra.mxu1 %vm307_vm1, %v3840_v19  ;;  %2862 = vmatmul.msk.bf16.gmra.mxu2 %vm307_vm1, %v3843_v37  ;;  %v3851_v3 = vadd.f32 %v1354_v45, %v1248_v30  ;;  %v550_v45 = vrot.slane %v3860_v18, 4  ;;  %v812_v61 = vrot.slane %v3860_v18, 5 }
  0xe2   :  { %2894 = vmatmul.msk.bf16.gmra.mxu3 %vm307_vm1, %v1067_v9 }
  0xe3   :  { %4764 = vst [vmem:[#allocation53_spill] sm:$0xff] %v3851_v3  ;;  %2926 = vmatmul.msk.bf16.gmra.mxu0 %vm307_vm1, %v3361_v35  ;;  %v551_v49 = vor.u32 %v550_v45, %v547_v60  ;;  %v813_v30 = vor.u32 %v812_v61, %v811_v4 }
  0xe4   :  { %v921_v20 = vpop.f32.mrf.mxu2 }
  0xe5   :  { %v998_v10 = vadd.f32 %v921_v20, %v685_v58  ;;  %v1172_v16 = vpop.f32.mrf.mxu3  ;;  %v1069_v58 = vor.u32 %v1068_v5, %v3860_v18  ;;  %v3872_v59 = vsel %vm445_vm2, %v542_v17, %v551_v49  ;;  %v3889_v17 = vshrl.u32 %v3272_v7, 16 }
  0xe6   :  { %v686_v28 = vpop.f32.mrf.mxu1 }
  0xe7   :  { %v1249_v34 = vadd.f32 %v1172_v16, %v998_v10  ;;  %v687_v35 = vadd.f32 %v686_v28, %v3705_v56  ;;  %v3875_v10 = vsel %vm767_vm3, %v809_v40, %v813_v30  ;;  %4767 = vst [vmem:[#allocation56_spill] sm:$0xff] %v3889_v17  ;;  %v556_v4 = vrot.slane %v3889_v17, 3 }
  0xe8   :  { %v1359_v23 = vpop.f32.mrf.mxu0 }
  0xe9   :  { %v3868_v6 = vadd.f32 %v1357_v32, %v1249_v34  ;;  %v1070_v32 = vsel %vm1036_vm4, %v1065_v29, %v1069_v58  ;;  %v3167_v29 = vld [vmem:[%s4661_s3 + $0xc0] sm:$0xff]  ;;  %v815_v34 = vrot.slane %v3889_v17, 4 }
  0xea   :  { %1766 = vmatpush.bf16.msra.mxu2 %v3167_v29 }
  0xec   :  { %v923_v9 = vpop.f32.mrf.mxu2 }
  0xed   :  { %v999_v20 = vadd.f32 %v923_v9, %v687_v35  ;;  %v1174_v3 = vpop.f32.mrf.mxu3 }
  0xee   :  { %v689_v39 = vpop.f32.mrf.mxu1 }
  0xef   :  { %v1250_v56 = vadd.f32 %v1174_v3, %v999_v20  ;;  %v690_v16 = vadd.f32 %v689_v39, %v3721_v44  ;;  %v3892_v44 = vshll.u32 %v3272_v7, 16  ;;  %v3171_v39 = vld [vmem:[%s4661_s3 + $0xe0] sm:$0xff]  ;;  %v1071_v20 = vrot.slane %v3889_v17, 7 }
  0xf0   :  { %v1362_v28 = vpop.f32.mrf.mxu0  ;;  %1924 = vmatpush.bf16.msra.mxu3 %v3171_v39 }
  0xf1   :  { %2831 = vmatmul.msk.bf16.gmra.mxu1 %vm307_vm1, %v3872_v59  ;;  %2863 = vmatmul.msk.bf16.gmra.mxu2 %vm307_vm1, %v3875_v10  ;;  %v3883_v60 = vadd.f32 %v1359_v23, %v1250_v56  ;;  %v559_v61 = vrot.slane %v3892_v44, 4  ;;  %v816_v35 = vrot.slane %v3892_v44, 5  ;;  %v3163_v56 = vld [vmem:[%s4661_s3 + $0xa0] sm:$0xff] }
  0xf2   :  { %2895 = vmatmul.msk.bf16.gmra.mxu3 %vm307_vm1, %v1070_v32  ;;  %1604 = vmatpush.bf16.msra.mxu1 %v3163_v56 }
  0xf3   :  { %4766 = vst [vmem:[#allocation55_spill] sm:$0xff] %v3883_v60  ;;  %2927 = vmatmul.msk.bf16.gmra.mxu0 %vm307_vm1, %v3423_v53  ;;  %v560_v29 = vor.u32 %v559_v61, %v556_v4  ;;  %v817_v39 = vor.u32 %v816_v35, %v815_v34 }
  0xf4   :  { %v926_v40 = vpop.f32.mrf.mxu2 }
  0xf5   :  { %v1000_v3 = vadd.f32 %v926_v40, %v690_v16  ;;  %v1177_v45 = vpop.f32.mrf.mxu3  ;;  %v3175_v16 = vld [vmem:[%s4661_s3 + $0x100] sm:$0xff]  ;;  %v1072_v40 = vor.u32 %v1071_v20, %v3892_v44  ;;  %v3916_v17 = vsel %vm445_vm2, %v551_v49, %v560_v29  ;;  %v3919_v60 = vsel %vm767_vm3, %v813_v30, %v817_v39 }
  0xf6   :  { %v691_v53 = vpop.f32.mrf.mxu1  ;;  %2084 = vmatpush.bf16.msra.mxu0 %v3175_v16  ;;  %4769 = vst [vmem:[#allocation58_spill] sm:$0xff] %v3919_v60  ;;  %v3933_v49 = vshrl.u32 %v3277_v8, 16 }
  0xf7   :  { %v1251_v23 = vadd.f32 %v1177_v45, %v1000_v3  ;;  %v692_v58 = vadd.f32 %v691_v53, %v3753_v24 }
  0xf8   :  { %v1364_v9 = vpop.f32.mrf.mxu0  ;;  %4771 = vst [vmem:[#allocation60_spill] sm:$0xff] %v3933_v49  ;;  %v565_v35 = vrot.slane %v3933_v49, 3 }
  0xf9   :  { %v3912_v32 = vadd.f32 %v1362_v28, %v1251_v23  ;;  %v1073_v28 = vsel %vm1036_vm4, %v1068_v5, %v1072_v40  ;;  %v819_v23 = vrot.slane %v3933_v49, 4 }
  0xfb   :  { %4768 = vst [vmem:[#allocation57_spill] sm:$0xff] %v3912_v32 }
  0xfc   :  { %v928_v24 = vpop.f32.mrf.mxu2 }
  0xfd   :  { %v1001_v3 = vadd.f32 %v928_v24, %v692_v58  ;;  %v1179_v45 = vpop.f32.mrf.mxu3  ;;  %v1074_v24 = vrot.slane %v3933_v49, 7 }
  0xfe   :  { %v694_v53 = vpop.f32.mrf.mxu1 }
  0xff   :  { %v1252_v22 = vadd.f32 %v1179_v45, %v1001_v3  ;;  %v695_v56 = vadd.f32 %v694_v53, %v3775_v55  ;;  %v3936_v55 = vshll.u32 %v3277_v8, 16 }
 0x100   :  { %v1367_v16 = vpop.f32.mrf.mxu0 }
 0x101   :  { %2832 = vmatmul.msk.bf16.gmra.mxu1 %vm307_vm1, %v3916_v17  ;;  %2864 = vmatmul.msk.bf16.gmra.mxu2 %vm307_vm1, %v3919_v60  ;;  %v3927_v4 = vadd.f32 %v1364_v9, %v1252_v22  ;;  %v568_v22 = vrot.slane %v3936_v55, 4  ;;  %v820_v58 = vrot.slane %v3936_v55, 5 }
 0x102   :  { %2896 = vmatmul.msk.bf16.gmra.mxu3 %vm307_vm1, %v1073_v28 }
 0x103   :  { %4770 = vst [vmem:[#allocation59_spill] sm:$0xff] %v3927_v4  ;;  %2928 = vmatmul.msk.bf16.gmra.mxu0 %vm307_vm1, %v3272_v7  ;;  %v569_v45 = vor.u32 %v568_v22, %v565_v35  ;;  %v821_v53 = vor.u32 %v820_v58, %v819_v23 }
 0x104   :  { %v931_v5 = vpop.f32.mrf.mxu2 }
 0x105   :  { %v1002_v30 = vadd.f32 %v931_v5, %v695_v56  ;;  %v1182_v61 = vpop.f32.mrf.mxu3  ;;  %v1075_v56 = vor.u32 %v1074_v24, %v3936_v55  ;;  %v3948_v60 = vsel %vm445_vm2, %v560_v29, %v569_v45  ;;  %v3964_v29 = vshrl.u32 %v3366_v36, 16 }
 0x106   :  { %v696_v34 = vpop.f32.mrf.mxu1 }
 0x107   :  { %v1253_v9 = vadd.f32 %v1182_v61, %v1002_v30  ;;  %v697_v7 = vadd.f32 %v696_v34, %v3801_v31  ;;  %v3951_v30 = vsel %vm767_vm3, %v817_v39, %v821_v53  ;;  %v1076_v34 = vsel %vm1036_vm4, %v1071_v20, %v1075_v56  ;;  %4774 = vst [vmem:[#allocation63_spill] sm:$0xff] %v3964_v29 }
 0x108   :  { %v1369_v40 = vpop.f32.mrf.mxu0  ;;  %v3967_v39 = vshll.u32 %v3366_v36, 16  ;;  %v574_v58 = vrot.slane %v3964_v29, 3 }
 0x109   :  { %v3944_v3 = vadd.f32 %v1367_v16, %v1253_v9 }
 0x10a   :  { %v577_v9 = vrot.slane %v3967_v39, 4 }
 0x10b   :  { %4772 = vst [vmem:[#allocation61_spill] sm:$0xff] %v3944_v3 }
 0x10c   :  { %v933_v28 = vpop.f32.mrf.mxu2 }
 0x10d   :  { %v1003_v5 = vadd.f32 %v933_v28, %v697_v7  ;;  %v1184_v4 = vpop.f32.mrf.mxu3  ;;  %v823_v7 = vrot.slane %v3964_v29, 4  ;;  %v1077_v28 = vrot.slane %v3964_v29, 7 }
 0x10e   :  { %v699_v32 = vpop.f32.mrf.mxu1 }
 0x10f   :  { %v1254_v31 = vadd.f32 %v1184_v4, %v1003_v5  ;;  %v700_v20 = vadd.f32 %v699_v32, %v3629_v43 }
 0x110   :  { %v1372_v61 = vpop.f32.mrf.mxu0 }
 0x111   :  { %2833 = vmatmul.msk.bf16.gmra.mxu1 %vm307_vm1, %v3948_v60  ;;  %2865 = vmatmul.msk.bf16.gmra.mxu2 %vm307_vm1, %v3951_v30  ;;  %v3958_v16 = vadd.f32 %v1369_v40, %v1254_v31  ;;  %v578_v31 = vor.u32 %v577_v9, %v574_v58 }
 0x112   :  { %2897 = vmatmul.msk.bf16.gmra.mxu3 %vm307_vm1, %v1076_v34  ;;  %v1078_v34 = vor.u32 %v1077_v28, %v3967_v39 }
 0x113   :  { %4773 = vst [vmem:[#allocation62_spill] sm:$0xff] %v3958_v16  ;;  %2929 = vmatmul.msk.bf16.gmra.mxu0 %vm307_vm1, %v3277_v8  ;;  %v824_v8 = vrot.slane %v3967_v39, 5  ;;  %v3980_v3 = vsel %vm445_vm2, %v569_v45, %v578_v31  ;;  %v3996_v45 = vshrl.u32 %v3428_v54, 16 }
 0x114   :  { %v936_v4 = vpop.f32.mrf.mxu2 }
 0x115   :  { %v1004_v35 = vadd.f32 %v936_v4, %v700_v20  ;;  %v1187_v22 = vpop.f32.mrf.mxu3  ;;  %v825_v43 = vor.u32 %v824_v8, %v823_v7  ;;  %4777 = vst [vmem:[#allocation66_spill] sm:$0xff] %v3996_v45  ;;  %v583_v7 = vrot.slane %v3996_v45, 3 }
 0x116   :  { %v701_v23 = vpop.f32.mrf.mxu1 }
 0x117   :  { %v1255_v40 = vadd.f32 %v1187_v22, %v1004_v35  ;;  %v702_v32 = vadd.f32 %v701_v23, %v3657_v1  ;;  %v3983_v35 = vsel %vm767_vm3, %v821_v53, %v825_v43  ;;  %v3999_v53 = vshll.u32 %v3428_v54, 16 }
 0x118   :  { %v1374_v56 = vpop.f32.mrf.mxu0 }
 0x119   :  { %v3975_v5 = vadd.f32 %v1372_v61, %v1255_v40  ;;  %v1079_v61 = vsel %vm1036_vm4, %v1074_v24, %v1078_v34  ;;  %v586_v8 = vrot.slane %v3999_v53, 4  ;;  %v827_v40 = vrot.slane %v3996_v45, 4 }
 0x11a   :  { %v1080_v34 = vrot.slane %v3996_v45, 7 }
 0x11b   :  { %4775 = vst [vmem:[#allocation64_spill] sm:$0xff] %v3975_v5 }
 0x11c   :  { %v938_v20 = vpop.f32.mrf.mxu2 }
 0x11d   :  { %v1005_v4 = vadd.f32 %v938_v20, %v702_v32  ;;  %v1189_v16 = vpop.f32.mrf.mxu3 }
 0x11e   :  { %v704_v49 = vpop.f32.mrf.mxu1 }
 0x11f   :  { %v1256_v22 = vadd.f32 %v1189_v16, %v1005_v4  ;;  %v705_v24 = vadd.f32 %v704_v49, %v3671_v62  ;;  %v587_v4 = vor.u32 %v586_v8, %v583_v7 }
 0x120   :  { %v1377_v29 = vpop.f32.mrf.mxu0 }
 0x121   :  { %2834 = vmatmul.msk.bf16.gmra.mxu1 %vm307_vm1, %v3980_v3  ;;  %2866 = vmatmul.msk.bf16.gmra.mxu2 %vm307_vm1, %v3983_v35  ;;  %v3990_v1 = vadd.f32 %v1374_v56, %v1256_v22  ;;  %v1081_v22 = vor.u32 %v1080_v34, %v3999_v53  ;;  %v4012_v5 = vsel %vm445_vm2, %v578_v31, %v587_v4  ;;  %v4028_v31 = vshrl.u32 %v3474_v13, 16 }
 0x122   :  { %2898 = vmatmul.msk.bf16.gmra.mxu3 %vm307_vm1, %v1079_v61 }
 0x123   :  { %4776 = vst [vmem:[#allocation65_spill] sm:$0xff] %v3990_v1  ;;  %2930 = vmatmul.msk.bf16.gmra.mxu0 %vm307_vm1, %v3366_v36  ;;  %v828_v36 = vrot.slane %v3999_v53, 5 }
 0x124   :  { %v941_v16 = vpop.f32.mrf.mxu2 }
 0x125   :  { %v1006_v23 = vadd.f32 %v941_v16, %v705_v24  ;;  %v1192_v58 = vpop.f32.mrf.mxu3  ;;  %v829_v62 = vor.u32 %v828_v36, %v827_v40  ;;  %v592_v36 = vrot.slane %v4028_v31, 3 }
 0x126   :  { %v706_v9 = vpop.f32.mrf.mxu1 }
 0x127   :  { %v1257_v56 = vadd.f32 %v1192_v58, %v1006_v23  ;;  %v707_v49 = vadd.f32 %v706_v9, %v3699_v27  ;;  %v4015_v23 = vsel %vm767_vm3, %v825_v43, %v829_v62  ;;  %v4031_v43 = vshll.u32 %v3474_v13, 16 }
 0x128   :  { %v1379_v32 = vpop.f32.mrf.mxu0 }
 0x129   :  { %v4007_v20 = vadd.f32 %v1377_v29, %v1257_v56  ;;  %v1082_v29 = vsel %vm1036_vm4, %v1077_v28, %v1081_v22  ;;  %v595_v56 = vrot.slane %v4031_v43, 4 }
 0x12c   :  { %v943_v61 = vpop.f32.mrf.mxu2 }
 0x12d   :  { %v1007_v24 = vadd.f32 %v943_v61, %v707_v49  ;;  %v1194_v16 = vpop.f32.mrf.mxu3  ;;  %v1083_v61 = vrot.slane %v4028_v31, 7 }
 0x12e   :  { %v709_v1 = vpop.f32.mrf.mxu1 }
 0x12f   :  { %v1258_v58 = vadd.f32 %v1194_v16, %v1007_v24  ;;  %v710_v28 = vadd.f32 %v709_v1, %v3713_v57  ;;  %v4041_v16 = vor.u32 %v595_v56, %v592_v36 }
 0x130   :  { %v1382_v45 = vpop.f32.mrf.mxu0 }
 0x131   :  { %2835 = vmatmul.msk.bf16.gmra.mxu1 %vm307_vm1, %v4012_v5  ;;  %2867 = vmatmul.msk.bf16.gmra.mxu2 %vm307_vm1, %v4015_v23  ;;  %v4022_v27 = vadd.f32 %v1379_v32, %v1258_v58  ;;  %v831_v32 = vrot.slane %v4028_v31, 4  ;;  %v1084_v58 = vor.u32 %v1083_v61, %v4031_v43 }
 0x132   :  { %2899 = vmatmul.msk.bf16.gmra.mxu3 %vm307_vm1, %v1082_v29 }
 0x133   :  { %4778 = vst [vmem:[#allocation67_spill] sm:$0xff] %v4022_v27  ;;  %2931 = vmatmul.msk.bf16.gmra.mxu0 %vm307_vm1, %v3428_v54  ;;  %v832_v54 = vrot.slane %v4031_v43, 5  ;;  %v1085_v56 = vsel %vm1036_vm4, %v1080_v34, %v1084_v58  ;;  %v1473_v34 = vrot.slane %v3507_v25, 1  ;;  %v3061_v25 = vld [vmem:[%s4664_s6 + $0x100] sm:$0xff] }
 0x134   :  { %v946_v9 = vpop.f32.mrf.mxu2  ;;  %vm2334_vm6 = vcmp.gt.f32.partialorder %v3061_v25, 0.0 }
 0x135   :  { %v1008_v7 = vadd.f32 %v946_v9, %v710_v28  ;;  %v1197_v8 = vpop.f32.mrf.mxu3  ;;  %v4043_v57 = vor.u32 %v832_v54, %v831_v32  ;;  %v1474_v58 = vor.u32 %v1473_v34, %v3504_v21 }
 0x136   :  { %v711_v40 = vpop.f32.mrf.mxu1 }
 0x137   :  { %v1259_v49 = vadd.f32 %v1197_v8, %v1008_v7  ;;  %v712_v1 = vadd.f32 %v711_v40, %v3747_v52  ;;  %v4049_v7 = vsel %vm445_vm2, %v587_v4, %v4041_v16 }
 0x138   :  { %v1384_v22 = vpop.f32.mrf.mxu0 }
 0x139   :  { %v4039_v24 = vadd.f32 %v1382_v45, %v1259_v49  ;;  %v4053_v45 = vsel %vm767_vm3, %v829_v62, %v4043_v57 }
 0x13c   :  { %v948_v29 = vpop.f32.mrf.mxu2 }
 0x13d   :  { %v1009_v28 = vadd.f32 %v948_v29, %v712_v1  ;;  %v1199_v9 = vpop.f32.mrf.mxu3  ;;  %v3199_v1 = vmov 0  }
 0x13e   :  { %v714_v27 = vpop.f32.mrf.mxu1  ;;  %3192 = vset.pattern.permute.xlu0 %v3199_v1  ;;  %3193 = vset.pattern.permute.xlu1 %v3199_v1 }
 0x13f   :  { %v1260_v8 = vadd.f32 %v1199_v9, %v1009_v28  ;;  %v715_v4 = vadd.f32 %v714_v27, %v3767_v48  ;;  %3194 = vset.pattern.permute.xlu2 %v3199_v1  ;;  %v1475_v48 = vrot.slane %v3531_v51, 1 }
 0x140   :  { %v1387_v36 = vpop.f32.mrf.mxu0 }
 0x141   :  { %2836 = vmatmul.msk.bf16.gmra.mxu1 %vm307_vm1, %v4049_v7  ;;  %2868 = vmatmul.msk.bf16.gmra.mxu2 %vm307_vm1, %v4053_v45  ;;  %v4060_v52 = vadd.f32 %v1384_v22, %v1260_v8  ;;  %v2366_v8 = vsel %vm2334_vm6, 1, %v3199_v1 }
 0x142   :  { %2900 = vmatmul.msk.bf16.gmra.mxu3 %vm307_vm1, %v1085_v56  ;;  %2399 = vperm.xlu0 %3192, %v2366_v8  }
 0x143   :  { %2932 = vmatmul.msk.bf16.gmra.mxu0 %vm307_vm1, %v3474_v13 }
 0x144   :  { %v951_v62 = vpop.f32.mrf.mxu2 }
 0x145   :  { %v1010_v40 = vadd.f32 %v951_v62, %v715_v4  ;;  %v1202_v32 = vpop.f32.mrf.mxu3  ;;  %v3062_v62 = vld [vmem:[%s4664_s6 + $0x108] sm:$0xff] }
 0x146   :  { %v716_v54 = vpop.f32.mrf.mxu1  ;;  %vm2335_vm7 = vcmp.gt.f32.partialorder %v3062_v62, 0.0 }
 0x147   :  { %v1261_v49 = vadd.f32 %v1202_v32, %v1010_v40  ;;  %v717_v27 = vadd.f32 %v716_v54, %v3795_v46 }
 0x148   :  { %v1389_v61 = vpop.f32.mrf.mxu0 }
 0x149   :  { %v4070_v22 = vadd.f32 %v1387_v36, %v1261_v49  ;;  %v1476_v36 = vsel %vm1472_vm5, %v1474_v58, %v1475_v48 }
 0x14c   :  { %v953_v29 = vpop.f32.mrf.mxu2 }
 0x14d   :  { %v1011_v28 = vadd.f32 %v953_v29, %v717_v27  ;;  %v1204_v9 = vpop.f32.mrf.mxu3  ;;  %v3063_v27 = vld [vmem:[%s4664_s6 + $0x110] sm:$0xff] }
 0x14e   :  { %v719_v56 = vpop.f32.mrf.mxu1  ;;  %vm2336_vm8 = vcmp.gt.f32.partialorder %v3063_v27, 0.0 }
 0x14f   :  { %v1262_v21 = vadd.f32 %v1204_v9, %v1011_v28  ;;  %v720_v46 = vadd.f32 %v719_v56, %v3653_v0  ;;  %v1478_v0 = vrot.slane %v3557_v26, 1  ;;  %v2368_v9 = vsel %vm2336_vm8, 1, %v3199_v1 }
 0x150   :  { %v1392_v4 = vpop.f32.mrf.mxu0  ;;  %2405 = vperm.xlu1 %3193, %v2368_v9  }
 0x151   :  { %2949 = vmatmul.msk.bf16.vlgmr.msra.gmra.mxu1 %vm307_vm1, %v1476_v36  ;;  %2981 = vmatmul.msk.bf16.vlgmr.msra.gmra.mxu2 %vm307_vm1, %v3540_v11  ;;  %v4083_v51 = vadd.f32 %v1389_v61, %v1262_v21  ;;  %v2367_v11 = vsel %vm2335_vm7, 1, %v3199_v1 }
 0x152   :  { %3013 = vmatmul.msk.bf16.vlgmr.msra.gmra.mxu3 %vm307_vm1, %v3393_v47  ;;  %2402 = vperm.xlu0 %3192, %v2367_v11  }
 0x153   :  { %3045 = vmatmul.msk.bf16.vlgmr.msra.gmra.mxu0 %vm307_vm1, %v3543_v14  ;;  %v1477_v14 = vor.u32 %v1475_v48, %v3528_v50  ;;  %v3064_v48 = vld [vmem:[%s4664_s6 + $0x118] sm:$0xff] }
 0x154   :  { %v956_v40 = vpop.f32.mrf.mxu2  ;;  %vm2337_vm9 = vcmp.gt.f32.partialorder %v3064_v48, 0.0 }
 0x155   :  { %v1012_v32 = vadd.f32 %v956_v40, %v720_v46  ;;  %v1207_v54 = vpop.f32.mrf.mxu3  ;;  %v1479_v56 = vsel %vm1472_vm5, %v1477_v14, %v1478_v0 }
 0x156   :  { %v721_v34 = vpop.f32.mrf.mxu1 }
 0x157   :  { %v1263_v49 = vadd.f32 %v1207_v54, %v1012_v32  ;;  %v722_v58 = vadd.f32 %v721_v34, %v3667_v15  ;;  %v4779_v54 = vld [vmem:[#allocation31_spill] sm:$0xff] }
 0x158   :  { %v1394_v61 = vpop.f32.mrf.mxu0 }
 0x159   :  { %v4094_v47 = vadd.f32 %v1392_v4, %v1263_v49 }
 0x15c   :  { %v958_v25 = vpop.f32.mrf.mxu2 }
 0x15d   :  { %v1013_v29 = vadd.f32 %v958_v25, %v722_v58  ;;  %v1209_v28 = vpop.f32.mrf.mxu3 }
 0x15e   :  { %v724_v8 = vpop.f32.mrf.mxu1 }
 0x15f   :  { %v1264_v36 = vadd.f32 %v1209_v28, %v1013_v29  ;;  %v725_v26 = vadd.f32 %v724_v8, %v3695_v2  ;;  %v1481_v2 = vrot.slane %v3583_v41, 1  ;;  %v4780_v29 = vld [vmem:[#allocation16_spill] sm:$0xff]  ;;  %v4782_v41 = vld [vmem:[#allocation17_spill] sm:$0xff] }
 0x160   :  { %v1397_v50 = vpop.f32.mrf.mxu0 }
 0x161   :  { %2950 = vmatmul.msk.bf16.gmra.mxu1 %vm307_vm1, %v1479_v56  ;;  %2982 = vmatmul.msk.bf16.gmra.mxu2 %vm307_vm1, %v3566_v33  ;;  %v4107_v15 = vadd.f32 %v1394_v61, %v1264_v36  ;;  %v2369_v33 = vsel %vm2337_vm9, 1, %v3199_v1 }
 0x162   :  { %3014 = vmatmul.msk.bf16.gmra.mxu3 %vm307_vm1, %v3449_v63  ;;  %2408 = vperm.xlu1 %3193, %v2369_v33   ;;  %v4785_v33 = vld [vmem:[#allocation19_spill] sm:$0xff] }
 0x163   :  { %3046 = vmatmul.msk.bf16.gmra.mxu0 %vm307_vm1, %v3569_v38  ;;  %v1480_v38 = vor.u32 %v1478_v0, %v3554_v12  ;;  %v4781_v12 = vld [vmem:[#allocation14_spill] sm:$0xff]  ;;  %v4783_v0 = vld [vmem:[#allocation37_spill] sm:$0xff] }
 0x164   :  { %v961_v21 = vpop.f32.mrf.mxu2 }
 0x165   :  { %v1014_v4 = vadd.f32 %v961_v21, %v725_v26  ;;  %v1212_v46 = vpop.f32.mrf.mxu3  ;;  %v1482_v58 = vsel %vm1472_vm5, %v1480_v38, %v1481_v2  ;;  %v3067_v38 = vld [vmem:[%s4664_s6 + $0x130] sm:$0xff] }
 0x166   :  { %v726_v62 = vpop.f32.mrf.mxu1  ;;  %vm2340_vm10 = vcmp.gt.f32.partialorder %v3067_v38, 0.0 }
 0x167   :  { %v1265_v40 = vadd.f32 %v1212_v46, %v1014_v4  ;;  %v727_v11 = vadd.f32 %v726_v62, %v4779_v54  ;;  %v4784_v4 = vld [vmem:[#allocation15_spill] sm:$0xff]  ;;  %v1484_v62 = vrot.slane %v4785_v33, 1 }
 0x168   :  { %v1399_v32 = vpop.f32.mrf.mxu0  ;;  %v1483_v46 = vor.u32 %v1481_v2, %v4784_v4 }
 0x169   :  { %v4118_v63 = vadd.f32 %v1397_v50, %v1265_v40  ;;  %v4786_v40 = vld [vmem:[#allocation39_spill] sm:$0xff] }
 0x16c   :  { %v963_v34 = vpop.f32.mrf.mxu2 }
 0x16d   :  { %v1015_v49 = vadd.f32 %v963_v34, %v727_v11  ;;  %v1214_v61 = vpop.f32.mrf.mxu3 }
 0x16e   :  { %v729_v14 = vpop.f32.mrf.mxu1 }
 0x16f   :  { %v1266_v27 = vadd.f32 %v1214_v61, %v1015_v49  ;;  %v730_v9 = vadd.f32 %v729_v14, %v4783_v0  ;;  %v2372_v49 = vsel %vm2340_vm10, 1, %v3199_v1  ;;  %v1485_v14 = vsel %vm1472_vm5, %v1483_v46, %v1484_v62 }
 0x170   :  { %v1402_v25 = vpop.f32.mrf.mxu0  ;;  %2417 = vperm.xlu0 %3192, %v2372_v49  }
 0x171   :  { %2951 = vmatmul.msk.bf16.gmra.mxu1 %vm307_vm1, %v1482_v58  ;;  %2983 = vmatmul.msk.bf16.gmra.mxu2 %vm307_vm1, %v4780_v29  ;;  %v4127_v28 = vadd.f32 %v1399_v32, %v1266_v27  ;;  %v4787_v27 = vld [vmem:[#allocation20_spill] sm:$0xff]  ;;  %v4788_v29 = vld [vmem:[#allocation2_spill] sm:$0xff] }
 0x172   :  { %3015 = vmatmul.msk.bf16.gmra.mxu3 %vm307_vm1, %v4781_v12  ;;  %v4789_v12 = vld [vmem:[#allocation21_spill] sm:$0xff] }
 0x173   :  { %3047 = vmatmul.msk.bf16.gmra.mxu0 %vm307_vm1, %v4782_v41  ;;  %v4790_v41 = vld [vmem:[#allocation45_spill] sm:$0xff] }
 0x174   :  { %v966_v8 = vpop.f32.mrf.mxu2 }
 0x175   :  { %v1016_v56 = vadd.f32 %v966_v8, %v730_v9  ;;  %v1217_v36 = vpop.f32.mrf.mxu3  ;;  %v3065_v9 = vld [vmem:[%s4664_s6 + $0x120] sm:$0xff]  ;;  %v3068_v8 = vld [vmem:[%s4664_s6 + $0x138] sm:$0xff] }
 0x176   :  { %v731_v50 = vpop.f32.mrf.mxu1  ;;  %vm2338_vm11 = vcmp.gt.f32.partialorder %v3065_v9, 0.0  ;;  %vm2341_vm12 = vcmp.gt.f32.partialorder %v3068_v8, 0.0  ;;  %v4795_v8 = vld [vmem:[#allocation5_spill] sm:$0xff] }
 0x177   :  { %v1267_v26 = vadd.f32 %v1217_v36, %v1016_v56  ;;  %v732_v32 = vadd.f32 %v731_v50, %v4786_v40 }
 0x178   :  { %v1404_v48 = vpop.f32.mrf.mxu0 }
 0x179   :  { %v4134_v21 = vadd.f32 %v1402_v25, %v1267_v26  ;;  %v2370_v26 = vsel %vm2338_vm11, 1, %v3199_v1 }
 0x17a   :  { %2411 = vperm.xlu2 %3194, %v2370_v26   ;;  %v3070_v26 = vld [vmem:[%s4664_s6 + $0x148] sm:$0xff] }
 0x17b   :  { %vm2343_vm14 = vcmp.gt.f32.partialorder %v3070_v26, 0.0 }
 0x17c   :  { %v968_v54 = vpop.f32.mrf.mxu2 }
 0x17d   :  { %v1017_v11 = vadd.f32 %v968_v54, %v732_v32  ;;  %v1219_v34 = vpop.f32.mrf.mxu3  ;;  %v4791_v32 = vld [vmem:[#allocation18_spill] sm:$0xff]  ;;  %v4792_v54 = vld [vmem:[#allocation23_spill] sm:$0xff] }
 0x17e   :  { %v734_v61 = vpop.f32.mrf.mxu1  ;;  %v1486_v38 = vor.u32 %v1484_v62, %v4791_v32  ;;  %v2375_v32 = vsel %vm2343_vm14, 1, %v3199_v1 }
 0x17f   :  { %v1268_v58 = vadd.f32 %v1219_v34, %v1017_v11  ;;  %v735_v0 = vadd.f32 %v734_v61, %v4790_v41  ;;  %v1487_v11 = vrot.slane %v4792_v54, 1  ;;  %v4793_v34 = vld [vmem:[#allocation47_spill] sm:$0xff]  ;;  %2426 = vperm.xlu0 %3192, %v2375_v32  }
 0x180   :  { %v1407_v2 = vpop.f32.mrf.mxu0  ;;  %v3066_v61 = vld [vmem:[%s4664_s6 + $0x128] sm:$0xff] }
 0x181   :  { %2952 = vmatmul.msk.bf16.gmra.mxu1 %vm307_vm1, %v1485_v14  ;;  %2984 = vmatmul.msk.bf16.gmra.mxu2 %vm307_vm1, %v4787_v27  ;;  %v4147_v25 = vadd.f32 %v1404_v48, %v1268_v58  ;;  %v2373_v48 = vsel %vm2341_vm12, 1, %v3199_v1  ;;  %vm2339_vm13 = vcmp.gt.f32.partialorder %v3066_v61, 0.0 }
 0x182   :  { %3016 = vmatmul.msk.bf16.gmra.mxu3 %vm307_vm1, %v4788_v29  ;;  %2420 = vperm.xlu1 %3193, %v2373_v48   ;;  %v2371_v29 = vsel %vm2339_vm13, 1, %v3199_v1 }
 0x183   :  { %3048 = vmatmul.msk.bf16.gmra.mxu0 %vm307_vm1, %v4789_v12  ;;  %2414 = vperm.xlu2 %3194, %v2371_v29  }
 0x184   :  { %v971_v56 = vpop.f32.mrf.mxu2 }
 0x185   :  { %v1018_v36 = vadd.f32 %v971_v56, %v735_v0  ;;  %v1222_v50 = vpop.f32.mrf.mxu3  ;;  %v4794_v0 = vld [vmem:[#allocation26_spill] sm:$0xff]  ;;  %v4796_v56 = vld [vmem:[#allocation27_spill] sm:$0xff] }
 0x186   :  { %v736_v4 = vpop.f32.mrf.mxu1 }
 0x187   :  { %v1269_v46 = vadd.f32 %v1222_v50, %v1018_v36  ;;  %v737_v49 = vadd.f32 %v736_v4, %v4793_v34  ;;  %v4797_v36 = vld [vmem:[#allocation24_spill] sm:$0xff] }
 0x188   :  { %v1409_v33 = vpop.f32.mrf.mxu0 }
 0x189   :  { %v4162_v40 = vadd.f32 %v1407_v2, %v1269_v46  ;;  %v1488_v2 = vsel %vm1472_vm5, %v1486_v38, %v1487_v11 }
 0x18c   :  { %v973_v14 = vpop.f32.mrf.mxu2 }
 0x18d   :  { %v1019_v58 = vadd.f32 %v973_v14, %v737_v49  ;;  %v1224_v27 = vpop.f32.mrf.mxu3  ;;  %v4798_v49 = vld [vmem:[#allocation22_spill] sm:$0xff]  ;;  %v4799_v14 = vld [vmem:[#allocation29_spill] sm:$0xff] }
 0x18e   :  { %v739_v12 = vpop.f32.mrf.mxu1  ;;  %v1489_v61 = vor.u32 %v1487_v11, %v4798_v49 }
 0x18f   :  { %v1270_v41 = vadd.f32 %v1224_v27, %v1019_v58  ;;  %v740_v50 = vadd.f32 %v739_v12, %v4797_v36  ;;  %v1490_v58 = vrot.slane %v4799_v14, 1  ;;  %v4800_v27 = vld [vmem:[#allocation25_spill] sm:$0xff]  ;;  %v3071_v12 = vld [vmem:[%s4664_s6 + $0x150] sm:$0xff] }
 0x190   :  { %v1412_v62 = vpop.f32.mrf.mxu0  ;;  %vm2344_vm15 = vcmp.gt.f32.partialorder %v3071_v12, 0.0 }
 0x191   :  { %2953 = vmatmul.msk.bf16.gmra.mxu1 %vm307_vm1, %v1488_v2  ;;  %2985 = vmatmul.msk.bf16.gmra.mxu2 %vm307_vm1, %v4794_v0  ;;  %v4175_v9 = vadd.f32 %v1409_v33, %v1270_v41 }
 0x192   :  { %3017 = vmatmul.msk.bf16.gmra.mxu3 %vm307_vm1, %v4795_v8  ;;  %v2376_v8 = vsel %vm2344_vm15, 1, %v3199_v1 }
 0x193   :  { %3049 = vmatmul.msk.bf16.gmra.mxu0 %vm307_vm1, %v4796_v56  ;;  %2429 = vperm.xlu1 %3193, %v2376_v8  }
 0x194   :  { %v976_v48 = vpop.f32.mrf.mxu2 }
 0x195   :  { %v1020_v4 = vadd.f32 %v976_v48, %v740_v50  ;;  %v1227_v46 = vpop.f32.mrf.mxu3  ;;  %v4801_v50 = vld [vmem:[#allocation33_spill] sm:$0xff]  ;;  %v4802_v48 = vld [vmem:[#allocation8_spill] sm:$0xff] }
 0x196   :  { %v741_v33 = vpop.f32.mrf.mxu1 }
 0x197   :  { %v1271_v38 = vadd.f32 %v1227_v46, %v1020_v4  ;;  %v742_v29 = vadd.f32 %v741_v33, %v4800_v27  ;;  %v4803_v4 = vld [vmem:[#allocation34_spill] sm:$0xff] }
 0x198   :  { %v1414_v54 = vpop.f32.mrf.mxu0  ;;  %v4804_v46 = vld [vmem:[#allocation30_spill] sm:$0xff] }
 0x199   :  { %v4186_v34 = vadd.f32 %v1412_v62, %v1271_v38  ;;  %v1491_v62 = vsel %vm1472_vm5, %v1489_v61, %v1490_v58  ;;  %v3069_v33 = vld [vmem:[%s4664_s6 + $0x140] sm:$0xff] }
 0x19a   :  { %vm2342_vm4 = vcmp.gt.f32.partialorder %v3069_v33, 0.0 }
 0x19b   :  { %v2374_v14 = vsel %vm2342_vm4, 1, %v3199_v1 }
 0x19c   :  { %v978_v2 = vpop.f32.mrf.mxu2  ;;  %2423 = vperm.xlu2 %3194, %v2374_v14   ;;  %v4810_v14 = vld [vmem:[#allocation42_spill] sm:$0xff] }
 0x19d   :  { %v1021_v41 = vadd.f32 %v978_v2, %v742_v29  ;;  %v1229_v0 = vpop.f32.mrf.mxu3  ;;  %v4805_v2 = vld [vmem:[#allocation28_spill] sm:$0xff] }
 0x19e   :  { %v744_v56 = vpop.f32.mrf.mxu1 }
 0x19f   :  { %v1272_v36 = vadd.f32 %v1229_v0, %v1021_v41  ;;  %v745_v32 = vadd.f32 %v744_v56, %v4804_v46  ;;  %v1492_v41 = vor.u32 %v1490_v58, %v4805_v2  ;;  %v4806_v0 = vld [vmem:[#allocation36_spill] sm:$0xff]  ;;  %v3074_v2 = vld [vmem:[%s4664_s6 + $0x168] sm:$0xff] }
 0x1a0   :  { %v1417_v11 = vpop.f32.mrf.mxu0  ;;  %v1493_v8 = vrot.slane %v4806_v0, 1  ;;  %v4807_v56 = vld [vmem:[#allocation32_spill] sm:$0xff]  ;;  %vm2347_vm7 = vcmp.gt.f32.partialorder %v3074_v2, 0.0 }
 0x1a1   :  { %2954 = vmatmul.msk.bf16.gmra.mxu1 %vm307_vm1, %v1491_v62  ;;  %2986 = vmatmul.msk.bf16.gmra.mxu2 %vm307_vm1, %v4801_v50  ;;  %v4199_v26 = vadd.f32 %v1414_v54, %v1272_v36  ;;  %v3073_v36 = vld [vmem:[%s4664_s6 + $0x160] sm:$0xff] }
 0x1a2   :  { %3018 = vmatmul.msk.bf16.gmra.mxu3 %vm307_vm1, %v4802_v48  ;;  %vm2346_vm6 = vcmp.gt.f32.partialorder %v3073_v36, 0.0 }
 0x1a3   :  { %3050 = vmatmul.msk.bf16.gmra.mxu0 %vm307_vm1, %v4803_v4  ;;  %v2378_v46 = vsel %vm2346_vm6, 1, %v3199_v1  ;;  %vm2590_vm6 = vcmask 519168  }
 0x1a4   :  { %v981_v38 = vpop.f32.mrf.mxu2  ;;  %2435 = vperm.xlu0 %3192, %v2378_v46  }
 0x1a5   :  { %v1022_v49 = vadd.f32 %v981_v38, %v745_v32  ;;  %v1232_v61 = vpop.f32.mrf.mxu3  ;;  %v4808_v38 = vld [vmem:[#allocation41_spill] sm:$0xff] }
 0x1a6   :  { %v746_v54 = vpop.f32.mrf.mxu1 }
 0x1a7   :  { %v1273_v27 = vadd.f32 %v1232_v61, %v1022_v49  ;;  %v747_v62 = vadd.f32 %v746_v54, %v4807_v56  ;;  %v4809_v61 = vld [vmem:[#allocation11_spill] sm:$0xff]  ;;  %v4811_v54 = vld [vmem:[#allocation38_spill] sm:$0xff] }
 0x1a8   :  { %v1419_v29 = vpop.f32.mrf.mxu0 }
 0x1a9   :  { %v4210_v12 = vadd.f32 %v1417_v11, %v1273_v27  ;;  %v1494_v11 = vsel %vm1472_vm5, %v1492_v41, %v1493_v8 }
 0x1ac   :  { %v983_v50 = vpop.f32.mrf.mxu2 }
 0x1ad   :  { %v1023_v48 = vadd.f32 %v983_v50, %v747_v62  ;;  %v1234_v4 = vpop.f32.mrf.mxu3  ;;  %v2379_v62 = vsel %vm2347_vm7, 1, %v3199_v1 }
 0x1ae   :  { %v749_v32 = vpop.f32.mrf.mxu1  ;;  %2438 = vperm.xlu1 %3193, %v2379_v62  }
 0x1af   :  { %v1274_v33 = vadd.f32 %v1234_v4, %v1023_v48  ;;  %v750_v27 = vadd.f32 %v749_v32, %v4811_v54  ;;  %v4812_v4 = vld [vmem:[#allocation35_spill] sm:$0xff] }
 0x1b0   :  { %v1422_v58 = vpop.f32.mrf.mxu0  ;;  %v1495_v46 = vor.u32 %v1493_v8, %v4812_v4  ;;  %v4818_v4 = vld [vmem:[#allocation46_spill] sm:$0xff] }
 0x1b1   :  { %2955 = vmatmul.msk.bf16.gmra.mxu1 %vm307_vm1, %v1494_v11  ;;  %2987 = vmatmul.msk.bf16.gmra.mxu2 %vm307_vm1, %v4808_v38  ;;  %v4223_v49 = vadd.f32 %v1419_v29, %v1274_v33  ;;  %v4813_v11 = vld [vmem:[#allocation44_spill] sm:$0xff] }
 0x1b2   :  { %3019 = vmatmul.msk.bf16.gmra.mxu3 %vm307_vm1, %v4809_v61  ;;  %v1496_v32 = vrot.slane %v4813_v11, 1  ;;  %v4814_v33 = vld [vmem:[#allocation40_spill] sm:$0xff]  ;;  %v3072_v61 = vld [vmem:[%s4664_s6 + $0x158] sm:$0xff] }
 0x1b3   :  { %3051 = vmatmul.msk.bf16.gmra.mxu0 %vm307_vm1, %v4810_v14  ;;  %vm2345_vm8 = vcmp.gt.f32.partialorder %v3072_v61, 0.0 }
 0x1b4   :  { %v986_v41 = vpop.f32.mrf.mxu2  ;;  %v2377_v2 = vsel %vm2345_vm8, 1, %v3199_v1 }
 0x1b5   :  { %v1024_v0 = vadd.f32 %v986_v41, %v750_v27  ;;  %v1237_v56 = vpop.f32.mrf.mxu3  ;;  %2432 = vperm.xlu2 %3194, %v2377_v2  }
 0x1b6   :  { %v751_v29 = vpop.f32.mrf.mxu1 }
 0x1b7   :  { %v1275_v36 = vadd.f32 %v1237_v56, %v1024_v0  ;;  %v752_v38 = vadd.f32 %v751_v29, %v4814_v33  ;;  %v4815_v56 = vld [vmem:[#allocation49_spill] sm:$0xff]  ;;  %v4816_v29 = vld [vmem:[#allocation3_spill] sm:$0xff] }
 0x1b8   :  { %v1424_v50 = vpop.f32.mrf.mxu0 }
 0x1b9   :  { %v4234_v48 = vadd.f32 %v1422_v58, %v1275_v36  ;;  %v1497_v58 = vsel %vm1472_vm5, %v1495_v46, %v1496_v32  ;;  %v4817_v36 = vld [vmem:[#allocation50_spill] sm:$0xff]  ;;  %v3076_v46 = vld [vmem:[%s4664_s6 + $0x178] sm:$0xff] }
 0x1ba   :  { %vm2349_vm9 = vcmp.gt.f32.partialorder %v3076_v46, 0.0 }
 0x1bc   :  { %v988_v14 = vpop.f32.mrf.mxu2 }
 0x1bd   :  { %v1025_v54 = vadd.f32 %v988_v14, %v752_v38  ;;  %v1239_v27 = vpop.f32.mrf.mxu3  ;;  %v2381_v14 = vsel %vm2349_vm9, 1, %v3199_v1 }
 0x1be   :  { %v754_v41 = vpop.f32.mrf.mxu1  ;;  %2444 = vperm.xlu0 %3192, %v2381_v14   ;;  %v4822_v14 = vld [vmem:[#allocation6_spill] sm:$0xff] }
 0x1bf   :  { %v1276_v0 = vadd.f32 %v1239_v27, %v1025_v54  ;;  %v755_v11 = vadd.f32 %v754_v41, %v4818_v4  ;;  %v1499_v41 = vrot.slane %v3828_v42, 1 }
 0x1c0   :  { %v1427_v8 = vpop.f32.mrf.mxu0 }
 0x1c1   :  { %2956 = vmatmul.msk.bf16.gmra.mxu1 %vm307_vm1, %v1497_v58  ;;  %2988 = vmatmul.msk.bf16.gmra.mxu2 %vm307_vm1, %v4815_v56  ;;  %v4247_v62 = vadd.f32 %v1424_v50, %v1276_v0  ;;  %v4819_v58 = vld [vmem:[#allocation43_spill] sm:$0xff]  ;;  %v4820_v56 = vld [vmem:[#allocation48_spill] sm:$0xff] }
 0x1c2   :  { %3020 = vmatmul.msk.bf16.gmra.mxu3 %vm307_vm1, %v4816_v29  ;;  %v1498_v0 = vor.u32 %v1496_v32, %v4819_v58  ;;  %v3075_v58 = vld [vmem:[%s4664_s6 + $0x170] sm:$0xff] }
 0x1c3   :  { %3052 = vmatmul.msk.bf16.gmra.mxu0 %vm307_vm1, %v4817_v36  ;;  %v3077_v36 = vld [vmem:[%s4664_s6 + $0x180] sm:$0xff]  ;;  %vm2348_vm11 = vcmp.gt.f32.partialorder %v3075_v58, 0.0  ;;  %v1502_v58 = vrot.slane %v3860_v18, 1 }
 0x1c4   :  { %v991_v33 = vpop.f32.mrf.mxu2  ;;  %vm2350_vm10 = vcmp.gt.f32.partialorder %v3077_v36, 0.0 }
 0x1c5   :  { %v1026_v38 = vadd.f32 %v991_v33, %v755_v11  ;;  %v1242_v61 = vpop.f32.mrf.mxu3  ;;  %v2382_v33 = vsel %vm2350_vm10, 1, %v3199_v1 }
 0x1c6   :  { %v756_v50 = vpop.f32.mrf.mxu1  ;;  %2447 = vperm.xlu1 %3193, %v2382_v33   ;;  %v4293_v33 = vld [vmem:[%s4665_s4] ss:$0 sm:$0xff] }
 0x1c7   :  { %v1277_v54 = vadd.f32 %v1242_v61, %v1026_v38  ;;  %v757_v29 = vadd.f32 %v756_v50, %v4820_v56  ;;  %v4823_v50 = vld [vmem:[#allocation52_spill] sm:$0xff] }
 0x1c8   :  { %v1429_v27 = vpop.f32.mrf.mxu0 }
 0x1c9   :  { %v4258_v2 = vadd.f32 %v1427_v8, %v1277_v54  ;;  %v1500_v8 = vsel %vm1472_vm5, %v1498_v0, %v1499_v41  ;;  %v3080_v0 = vld [vmem:[%s4664_s6 + $0x198] sm:$0xff] }
 0x1ca   :  { %vm2353_vm12 = vcmp.gt.f32.partialorder %v3080_v0, 0.0 }
 0x1cb   :  { %v2385_v36 = vsel %vm2353_vm12, 1, %v3199_v1 }
 0x1cc   :  { %v993_v4 = vpop.f32.mrf.mxu2 }
 0x1cd   :  { %v1027_v11 = vadd.f32 %v993_v4, %v757_v29  ;;  %v1244_v46 = vpop.f32.mrf.mxu3  ;;  %v2380_v29 = vsel %vm2348_vm11, 1, %v3199_v1 }
 0x1ce   :  { %v1606_v38 = vpop.f32.mrf.mxu1  ;;  %2441 = vperm.xlu2 %3194, %v2380_v29   ;;  %2456 = vperm.xlu1 %3193, %v2385_v36  }
 0x1cf   :  { %v1278_v61 = vadd.f32 %v1244_v46, %v1027_v11  ;;  %v1686_v54 = vadd.f32 %v1606_v38, %v4823_v50  ;;  %v4824_v50 = vld [vmem:[#allocation51_spill] sm:$0xff] }
 0x1d0   :  { %v2086_v32 = vpop.f32.mrf.mxu0 }
 0x1d1   :  { %2957 = vmatmul.msk.bf16.gmra.mxu1 %vm307_vm1, %v1500_v8  ;;  %2989 = vmatmul.msk.bf16.gmra.mxu2 %vm307_vm1, %v3840_v19  ;;  %v4271_v42 = vadd.f32 %v1429_v27, %v1278_v61  ;;  %v3079_v19 = vld [vmem:[%s4664_s6 + $0x190] sm:$0xff]  ;;  %v2400_v61 = vpop.permute.xlu0 %2399 }
 0x1d2   :  { %3021 = vmatmul.msk.bf16.gmra.mxu3 %vm307_vm1, %v4822_v14  ;;  %vm2352_vm13 = vcmp.gt.f32.partialorder %v3079_v19, 0.0  ;;  %v4298_v14 = vld [vmem:[%s4666_s5] ss:$0 sm:$0xff]  ;;  %v4825_v19 = vld [vmem:[#allocation53_spill] sm:$0xff]  ;;  %vm2494_vm4 = vcmp.eq.s32.totalorder %v2400_v61, 1 }
 0x1d3   :  { %4821 = vst [vmem:[#allocation31_spill] sm:$0xff] %v4271_v42  ;;  %3053 = vmatmul.msk.bf16.gmra.mxu0 %vm307_vm1, %v3843_v37  ;;  %v2384_v4 = vsel %vm2352_vm13, 1, %v3199_v1 }
 0x1d4   :  { %v1768_v27 = vpop.f32.mrf.mxu2  ;;  %2453 = vperm.xlu0 %3192, %v2384_v4  }
 0x1d5   :  { %v1848_v56 = vadd.f32 %v1768_v27, %v1686_v54  ;;  %v1926_v37 = vpop.f32.mrf.mxu3  ;;  %v1501_v54 = vor.u32 %v1499_v41, %v4824_v50 }
 0x1d6   :  { %v1608_v11 = vpop.f32.mrf.mxu1 }
 0x1d7   :  { %v2006_v46 = vadd.f32 %v1926_v37, %v1848_v56  ;;  %v1687_v27 = vadd.f32 %v1608_v11, %v4825_v19  ;;  %v3083_v56 = vld [vmem:[%s4664_s6 + $0x1b0] sm:$0xff] }
 0x1d8   :  { %v2088_v38 = vpop.f32.mrf.mxu0  ;;  %vm2356_vm14 = vcmp.gt.f32.partialorder %v3083_v56, 0.0 }
 0x1d9   :  { %v2166_v8 = vadd.f32 %v2086_v32, %v2006_v46  ;;  %v3082_v32 = vld [vmem:[%s4664_s6 + $0x1a8] sm:$0xff]  ;;  %v2388_v18 = vsel %vm2356_vm14, 1, %v3199_v1  ;;  %v1503_v46 = vsel %vm1472_vm5, %v1501_v54, %v1502_v58 }
 0x1da   :  { %vm2355_vm15 = vcmp.gt.f32.partialorder %v3082_v32, 0.0  ;;  %2465 = vperm.xlu1 %3193, %v2388_v18   ;;  %v2403_v32 = vpop.permute.xlu0 %2402 }
 0x1db   :  { %v2202_v0 = vmul.f32 %v4293_v33, %v2166_v8  ;;  %v2387_v4 = vsel %vm2355_vm15, 1, %v3199_v1  ;;  %vm2495_vm9 = vcmp.eq.s32.totalorder %v2403_v32, 1  ;;  %v3078_v32 = vld [vmem:[%s4664_s6 + $0x188] sm:$0xff] }
 0x1dc   :  { %v1770_v37 = vpop.f32.mrf.mxu2  ;;  %2462 = vperm.xlu0 %3192, %v2387_v4   ;;  %vm2351_vm10 = vcmp.gt.f32.partialorder %v3078_v32, 0.0 }
 0x1dd   :  { %v1849_v29 = vadd.f32 %v1770_v37, %v1687_v27  ;;  %v1928_v36 = vpop.f32.mrf.mxu3  ;;  %v2238_v41 = vadd.f32 %v4298_v14, %v2202_v0  ;;  %v4826_v27 = vld [vmem:[#allocation9_spill] sm:$0xff] }
 0x1de   :  { %v1611_v11 = vpop.f32.mrf.mxu1 }
 0x1df   :  { %v2007_v8 = vadd.f32 %v1928_v36, %v1849_v29  ;;  %v2270_v50 = vmax.f32 %v2238_v41, 0.0  ;;  %v1688_v54 = vadd.f32 %v1611_v11, %v3868_v6 }
 0x1e0   :  { %v2091_v19 = vpop.f32.mrf.mxu0 }
 0x1e1   :  { %v2167_v42 = vadd.f32 %v2088_v38, %v2007_v8  ;;  %v2526_v56 = vsel %vm2494_vm4, %v2270_v50, 0.0  ;;  %2958 = vmatmul.msk.bf16.gmra.mxu1 %vm307_vm1, %v1503_v46  ;;  %2990 = vmatmul.msk.bf16.gmra.mxu2 %vm307_vm1, %v3872_v59  ;;  %v3086_v38 = vld [vmem:[%s4664_s6 + $0x1c8] sm:$0xff]  ;;  %v3085_v59 = vld [vmem:[%s4664_s6 + $0x1c0] sm:$0xff]  ;;  %v2406_v50 = vpop.permute.xlu1 %2405 }
 0x1e2   :  { %v2558_v0 = vpack.c.bf16 %v2526_v56, %v2526_v56  ;;  %3022 = vmatmul.msk.bf16.gmra.mxu3 %vm307_vm1, %v4826_v27  ;;  %vm2359_vm7 = vcmp.gt.f32.partialorder %v3086_v38, 0.0  ;;  %vm2358_vm8 = vcmp.gt.f32.partialorder %v3085_v59, 0.0  ;;  %v4828_v38 = vld [vmem:[#allocation55_spill] sm:$0xff]  ;;  %vm2496_vm13 = vcmp.eq.s32.totalorder %v2406_v50, 1  ;;  %v4830_v50 = vld [vmem:[#allocation58_spill] sm:$0xff] }
 0x1e3   :  { %3054 = vmatmul.msk.bf16.gmra.mxu0 %vm307_vm1, %v3875_v10  ;;  %v2203_v61 = vmul.f32 %v4293_v33, %v2167_v42  ;;  %v2391_v29 = vsel %vm2359_vm7, 1, %v3199_v1  ;;  %v2390_v36 = vsel %vm2358_vm8, 1, %v3199_v1 }
 0x1e4   :  { %3093 = vst.msk [vmem:[%s4667_s7 + $0x80] sm:$0xf] %vm2590_vm6, %v2558_v0  ;;  %v1773_v37 = vpop.f32.mrf.mxu2  ;;  %2474 = vperm.xlu1 %3193, %v2391_v29   ;;  %2471 = vperm.xlu0 %3192, %v2390_v36   ;;  %v4827_v0 = vld [vmem:[#allocation54_spill] sm:$0xff] }
 0x1e5   :  { %v1850_v10 = vadd.f32 %v1773_v37, %v1688_v54  ;;  %v1931_v42 = vpop.f32.mrf.mxu3  ;;  %v2239_v6 = vadd.f32 %v4298_v14, %v2203_v61  ;;  %v1504_v27 = vor.u32 %v1502_v58, %v4827_v0  ;;  %v1505_v54 = vrot.slane %v3892_v44, 1  ;;  %v3089_v37 = vld [vmem:[%s4664_s6 + $0x1e0] sm:$0xff] }
 0x1e6   :  { %v1613_v41 = vpop.f32.mrf.mxu1  ;;  %vm2362_vm11 = vcmp.gt.f32.partialorder %v3089_v37, 0.0 }
 0x1e7   :  { %v2008_v18 = vadd.f32 %v1931_v42, %v1850_v10  ;;  %v2271_v4 = vmax.f32 %v2239_v6, 0.0  ;;  %v1689_v59 = vadd.f32 %v1613_v41, %v4828_v38  ;;  %v2383_v6 = vsel %vm2351_vm10, 1, %v3199_v1  ;;  %v4829_v38 = vld [vmem:[#allocation12_spill] sm:$0xff] }
 0x1e8   :  { %v2093_v11 = vpop.f32.mrf.mxu0  ;;  %v2394_v29 = vsel %vm2362_vm11, 1, %v3199_v1  ;;  %v1506_v41 = vsel %vm1472_vm5, %v1504_v27, %v1505_v54  ;;  %2450 = vperm.xlu2 %3194, %v2383_v6  }
 0x1e9   :  { %v2168_v46 = vadd.f32 %v2091_v19, %v2008_v18  ;;  %v2527_v8 = vsel %vm2495_vm9, %v2271_v4, 0.0  ;;  %v3088_v19 = vld [vmem:[%s4664_s6 + $0x1d8] sm:$0xff]  ;;  %v2409_v37 = vpop.permute.xlu1 %2408 }
 0x1ea   :  { %v2559_v56 = vpack.c.bf16 %v2527_v8, %v2527_v8  ;;  %vm2361_vm12 = vcmp.gt.f32.partialorder %v3088_v19, 0.0  ;;  %vm2497_vm4 = vcmp.eq.s32.totalorder %v2409_v37, 1  ;;  %v3081_v37 = vld [vmem:[%s4664_s6 + $0x1a0] sm:$0xff] }
 0x1eb   :  { %v2204_v61 = vmul.f32 %v4293_v33, %v2168_v46  ;;  %v2393_v18 = vsel %vm2361_vm12, 1, %v3199_v1  ;;  %vm2354_vm7 = vcmp.gt.f32.partialorder %v3081_v37, 0.0 }
 0x1ec   :  { %3094 = vst.msk [vmem:[%s4667_s7 + $0x84] sm:$0xf] %vm2590_vm6, %v2559_v56  ;;  %v1775_v44 = vpop.f32.mrf.mxu2  ;;  %2483 = vperm.xlu1 %3193, %v2394_v29   ;;  %2480 = vperm.xlu0 %3192, %v2393_v18  }
 0x1ed   :  { %v1851_v58 = vadd.f32 %v1775_v44, %v1689_v59  ;;  %v1933_v10 = vpop.f32.mrf.mxu3  ;;  %v2240_v42 = vadd.f32 %v4298_v14, %v2204_v61  ;;  %v4831_v59 = vld [vmem:[#allocation57_spill] sm:$0xff] }
 0x1ee   :  { %v1616_v36 = vpop.f32.mrf.mxu1 }
 0x1ef   :  { %v2009_v4 = vadd.f32 %v1933_v10, %v1851_v58  ;;  %v2272_v46 = vmax.f32 %v2240_v42, 0.0  ;;  %v1690_v32 = vadd.f32 %v1616_v36, %v4831_v59  ;;  %v4833_v59 = vld [vmem:[#allocation59_spill] sm:$0xff] }
 0x1f0   :  { %v2096_v8 = vpop.f32.mrf.mxu0 }
 0x1f1   :  { %v2169_v56 = vadd.f32 %v2093_v11, %v2009_v4  ;;  %v2528_v0 = vsel %vm2496_vm13, %v2272_v46, 0.0  ;;  %2959 = vmatmul.msk.bf16.gmra.mxu1 %vm307_vm1, %v1506_v41  ;;  %2991 = vmatmul.msk.bf16.gmra.mxu2 %vm307_vm1, %v3916_v17  ;;  %v3092_v11 = vld [vmem:[%s4664_s6 + $0x1f8] sm:$0xff]  ;;  %v3091_v17 = vld [vmem:[%s4664_s6 + $0x1f0] sm:$0xff] }
 0x1f2   :  { %v2560_v61 = vpack.c.bf16 %v2528_v0, %v2528_v0  ;;  %3023 = vmatmul.msk.bf16.gmra.mxu3 %vm307_vm1, %v4829_v38  ;;  %vm2365_vm14 = vcmp.gt.f32.partialorder %v3092_v11, 0.0  ;;  %vm2364_vm15 = vcmp.gt.f32.partialorder %v3091_v17, 0.0 }
 0x1f3   :  { %3055 = vmatmul.msk.bf16.gmra.mxu0 %vm307_vm1, %v4830_v50  ;;  %v2205_v27 = vmul.f32 %v4293_v33, %v2169_v56  ;;  %v2397_v42 = vsel %vm2365_vm14, 1, %v3199_v1  ;;  %v2396_v6 = vsel %vm2364_vm15, 1, %v3199_v1  ;;  %v2412_v56 = vpop.permute.xlu2 %2411  ;;  %v1508_v50 = vrot.slane %v3936_v55, 1 }
 0x1f4   :  { %3095 = vst.msk [vmem:[%s4667_s7 + $0x88] sm:$0xf] %vm2590_vm6, %v2560_v61  ;;  %v1778_v19 = vpop.f32.mrf.mxu2  ;;  %2492 = vperm.xlu1 %3193, %v2397_v42   ;;  %2489 = vperm.xlu0 %3192, %v2396_v6   ;;  %v4832_v61 = vld [vmem:[#allocation56_spill] sm:$0xff]  ;;  %v2386_v55 = vsel %vm2354_vm7, 1, %v3199_v1  ;;  %vm2498_vm8 = vcmp.eq.s32.totalorder %v2412_v56, 1 }
 0x1f5   :  { %v1852_v44 = vadd.f32 %v1778_v19, %v1690_v32  ;;  %v1936_v58 = vpop.f32.mrf.mxu3  ;;  %v2241_v10 = vadd.f32 %v4298_v14, %v2205_v27  ;;  %v1507_v38 = vor.u32 %v1505_v54, %v4832_v61  ;;  %2459 = vperm.xlu2 %3194, %v2386_v55   ;;  %v4836_v55 = vld [vmem:[#allocation60_spill] sm:$0xff] }
 0x1f6   :  { %v1618_v29 = vpop.f32.mrf.mxu1 }
 0x1f7   :  { %v2010_v36 = vadd.f32 %v1936_v58, %v1852_v44  ;;  %v2273_v41 = vmax.f32 %v2241_v10, 0.0  ;;  %v1691_v32 = vadd.f32 %v1618_v29, %v4833_v59  ;;  %v1509_v44 = vsel %vm1472_vm5, %v1507_v38, %v1508_v50 }
 0x1f8   :  { %v2098_v18 = vpop.f32.mrf.mxu0 }
 0x1f9   :  { %v2170_v4 = vadd.f32 %v2096_v8, %v2010_v36  ;;  %v2529_v46 = vsel %vm2497_vm4, %v2273_v41, 0.0  ;;  %v4834_v41 = vld [vmem:[#allocation4_spill] sm:$0xff] }
 0x1fa   :  { %v2561_v0 = vpack.c.bf16 %v2529_v46, %v2529_v46  ;;  %v4835_v46 = vld [vmem:[#allocation61_spill] sm:$0xff] }
 0x1fb   :  { %v2206_v27 = vmul.f32 %v4293_v33, %v2170_v4 }
 0x1fc   :  { %3096 = vst.msk [vmem:[%s4667_s7 + $0x8c] sm:$0xf] %vm2590_vm6, %v2561_v0  ;;  %v1780_v8 = vpop.f32.mrf.mxu2  ;;  %v2415_v0 = vpop.permute.xlu2 %2414 }
 0x1fd   :  { %v1853_v11 = vadd.f32 %v1780_v8, %v1691_v32  ;;  %v1938_v17 = vpop.f32.mrf.mxu3  ;;  %v2242_v54 = vadd.f32 %v4298_v14, %v2206_v27  ;;  %vm2499_vm10 = vcmp.eq.s32.totalorder %v2415_v0, 1 }
 0x1fe   :  { %v1621_v19 = vpop.f32.mrf.mxu1 }
 0x1ff   :  { %v2011_v58 = vadd.f32 %v1938_v17, %v1853_v11  ;;  %v2274_v10 = vmax.f32 %v2242_v54, 0.0  ;;  %v1692_v56 = vadd.f32 %v1621_v19, %v4835_v46  ;;  %v1510_v19 = vor.u32 %v1508_v50, %v4836_v55 }
 0x200   :  { %v2101_v42 = vpop.f32.mrf.mxu0 }
 0x201   :  { %v2171_v6 = vadd.f32 %v2098_v18, %v2011_v58  ;;  %v2530_v29 = vsel %vm2498_vm8, %v2274_v10, 0.0  ;;  %2960 = vmatmul.msk.bf16.gmra.mxu1 %vm307_vm1, %v1509_v44  ;;  %2992 = vmatmul.msk.bf16.gmra.mxu2 %vm307_vm1, %v3948_v60  ;;  %v3084_v18 = vld [vmem:[%s4664_s6 + $0x1b8] sm:$0xff]  ;;  %v1511_v44 = vrot.slane %v3967_v39, 1  ;;  %v4837_v10 = vld [vmem:[#allocation62_spill] sm:$0xff] }
 0x202   :  { %v2562_v36 = vpack.c.bf16 %v2530_v29, %v2530_v29  ;;  %3024 = vmatmul.msk.bf16.gmra.mxu3 %vm307_vm1, %v4834_v41  ;;  %vm2357_vm9 = vcmp.gt.f32.partialorder %v3084_v18, 0.0  ;;  %v2418_v29 = vpop.permute.xlu0 %2417 }
 0x203   :  { %3056 = vmatmul.msk.bf16.gmra.mxu0 %vm307_vm1, %v3951_v30  ;;  %v2207_v4 = vmul.f32 %v4293_v33, %v2171_v6  ;;  %v2389_v27 = vsel %vm2357_vm9, 1, %v3199_v1  ;;  %vm2500_vm12 = vcmp.eq.s32.totalorder %v2418_v29, 1 }
 0x204   :  { %3097 = vst.msk [vmem:[%s4667_s7 + $0x90] sm:$0xf] %vm2590_vm6, %v2562_v36  ;;  %v1783_v60 = vpop.f32.mrf.mxu2  ;;  %2468 = vperm.xlu2 %3194, %v2389_v27   ;;  %v3087_v36 = vld [vmem:[%s4664_s6 + $0x1d0] sm:$0xff]  ;;  %v4838_v27 = vld [vmem:[#allocation7_spill] sm:$0xff] }
 0x205   :  { %v1854_v61 = vadd.f32 %v1783_v60, %v1692_v56  ;;  %v1941_v38 = vpop.f32.mrf.mxu3  ;;  %v2243_v30 = vadd.f32 %v4298_v14, %v2207_v4  ;;  %vm2360_vm11 = vcmp.gt.f32.partialorder %v3087_v36, 0.0  ;;  %v1512_v56 = vsel %vm1472_vm5, %v1510_v19, %v1511_v44 }
 0x206   :  { %v1623_v59 = vpop.f32.mrf.mxu1  ;;  %v2392_v4 = vsel %vm2360_vm11, 1, %v3199_v1 }
 0x207   :  { %v2012_v32 = vadd.f32 %v1941_v38, %v1854_v61  ;;  %v2275_v37 = vmax.f32 %v2243_v30, 0.0  ;;  %v1693_v6 = vadd.f32 %v1623_v59, %v4837_v10 }
 0x208   :  { %v2103_v8 = vpop.f32.mrf.mxu0 }
 0x209   :  { %v2172_v11 = vadd.f32 %v2101_v42, %v2012_v32  ;;  %v2531_v17 = vsel %vm2499_vm10, %v2275_v37, 0.0  ;;  %v4839_v32 = vld [vmem:[#allocation64_spill] sm:$0xff] }
 0x20a   :  { %v2563_v54 = vpack.c.bf16 %v2531_v17, %v2531_v17 }
 0x20b   :  { %v2208_v58 = vmul.f32 %v4293_v33, %v2172_v11  ;;  %v2421_v11 = vpop.permute.xlu1 %2420 }
 0x20c   :  { %3098 = vst.msk [vmem:[%s4667_s7 + $0x94] sm:$0xf] %vm2590_vm6, %v2563_v54  ;;  %v1785_v42 = vpop.f32.mrf.mxu2  ;;  %2477 = vperm.xlu2 %3194, %v2392_v4   ;;  %vm2501_vm14 = vcmp.eq.s32.totalorder %v2421_v11, 1  ;;  %v4842_v11 = vld [vmem:[#allocation10_spill] sm:$0xff] }
 0x20d   :  { %v1855_v41 = vadd.f32 %v1785_v42, %v1693_v6  ;;  %v1943_v50 = vpop.f32.mrf.mxu3  ;;  %v2244_v39 = vadd.f32 %v4298_v14, %v2208_v58 }
 0x20e   :  { %v1626_v46 = vpop.f32.mrf.mxu1 }
 0x20f   :  { %v2013_v0 = vadd.f32 %v1943_v50, %v1855_v41  ;;  %v2276_v18 = vmax.f32 %v2244_v39, 0.0  ;;  %v1694_v37 = vadd.f32 %v1626_v46, %v4839_v32  ;;  %v4840_v41 = vld [vmem:[#allocation63_spill] sm:$0xff]  ;;  %v1514_v39 = vrot.slane %v3999_v53, 1  ;;  %v4841_v46 = vld [vmem:[#allocation65_spill] sm:$0xff] }
 0x210   :  { %v2106_v60 = vpop.f32.mrf.mxu0  ;;  %v1513_v50 = vor.u32 %v1511_v44, %v4840_v41  ;;  %v1517_v41 = vrot.slane %v4031_v43, 1  ;;  %v3142_v43 = vld [vmem:[%s4668_s2 + $0x100] sm:$0xff] }
 0x211   :  { %v2173_v61 = vadd.f32 %v2103_v8, %v2013_v0  ;;  %v2532_v38 = vsel %vm2500_vm12, %v2276_v18, 0.0  ;;  %2961 = vmatmul.msk.bf16.gmra.mxu1 %vm307_vm1, %v1512_v56  ;;  %2993 = vmatmul.msk.bf16.gmra.mxu2 %vm307_vm1, %v3980_v3  ;;  %v3090_v8 = vld [vmem:[%s4664_s6 + $0x1e8] sm:$0xff]  ;;  %v2424_v0 = vpop.permute.xlu2 %2423 }
 0x212   :  { %v2564_v30 = vpack.c.bf16 %v2532_v38, %v2532_v38  ;;  %3025 = vmatmul.msk.bf16.gmra.mxu3 %vm307_vm1, %v4838_v27  ;;  %vm2363_vm13 = vcmp.gt.f32.partialorder %v3090_v8, 0.0  ;;  %vm2502_vm15 = vcmp.eq.s32.totalorder %v2424_v0, 1  ;;  %v1515_v44 = vsel %vm1472_vm5, %v1513_v50, %v1514_v39 }
 0x213   :  { %3057 = vmatmul.msk.bf16.gmra.mxu0 %vm307_vm1, %v3983_v35  ;;  %v2209_v59 = vmul.f32 %v4293_v33, %v2173_v61  ;;  %v2395_v55 = vsel %vm2363_vm13, 1, %v3199_v1 }
 0x214   :  { %3099 = vst.msk [vmem:[%s4667_s7 + $0x98] sm:$0xf] %vm2590_vm6, %v2564_v30  ;;  %v1788_v3 = vpop.f32.mrf.mxu2  ;;  %2486 = vperm.xlu2 %3194, %v2395_v55  }
 0x215   :  { %v1856_v17 = vadd.f32 %v1788_v3, %v1694_v37  ;;  %v1946_v54 = vpop.f32.mrf.mxu3  ;;  %v2245_v35 = vadd.f32 %v4298_v14, %v2209_v59 }
 0x216   :  { %v1628_v19 = vpop.f32.mrf.mxu1 }
 0x217   :  { %v2014_v58 = vadd.f32 %v1946_v54, %v1856_v17  ;;  %v2277_v10 = vmax.f32 %v2245_v35, 0.0  ;;  %v1695_v56 = vadd.f32 %v1628_v19, %v4841_v46  ;;  %v2427_v17 = vpop.permute.xlu0 %2426 }
 0x218   :  { %v2108_v6 = vpop.f32.mrf.mxu0  ;;  %vm2503_vm4 = vcmp.eq.s32.totalorder %v2427_v17, 1 }
 0x219   :  { %v2174_v29 = vadd.f32 %v2106_v60, %v2014_v58  ;;  %v2533_v36 = vsel %vm2501_vm14, %v2277_v10, 0.0  ;;  %v2433_v17 = vpop.permute.xlu2 %2432 }
 0x21a   :  { %v2565_v42 = vpack.c.bf16 %v2533_v36, %v2533_v36  ;;  %vm2505_vm8 = vcmp.eq.s32.totalorder %v2433_v17, 1 }
 0x21b   :  { %v2210_v4 = vmul.f32 %v4293_v33, %v2174_v29 }
 0x21c   :  { %3100 = vst.msk [vmem:[%s4667_s7 + $0x9c] sm:$0xf] %vm2590_vm6, %v2565_v42  ;;  %v1790_v1 = vpop.f32.mrf.mxu2 }
 0x21d   :  { %v1857_v18 = vadd.f32 %v1790_v1, %v1695_v56  ;;  %v1948_v61 = vpop.f32.mrf.mxu3  ;;  %v2246_v60 = vadd.f32 %v4298_v14, %v2210_v4  ;;  %v4844_v4 = vld [vmem:[#allocation67_spill] sm:$0xff]  ;;  %v2430_v56 = vpop.permute.xlu1 %2429 }
 0x21e   :  { %v1631_v38 = vpop.f32.mrf.mxu1  ;;  %vm2504_vm7 = vcmp.eq.s32.totalorder %v2430_v56, 1 }
 0x21f   :  { %v2015_v53 = vadd.f32 %v1948_v61, %v1857_v18  ;;  %v2278_v30 = vmax.f32 %v2246_v60, 0.0  ;;  %v1696_v3 = vadd.f32 %v1631_v38, %v4007_v20  ;;  %v4843_v20 = vld [vmem:[#allocation66_spill] sm:$0xff] }
 0x220   :  { %v2111_v27 = vpop.f32.mrf.mxu0  ;;  %v1516_v42 = vor.u32 %v1514_v39, %v4843_v20 }
 0x221   :  { %v2175_v59 = vadd.f32 %v2108_v6, %v2015_v53  ;;  %v2534_v32 = vsel %vm2502_vm15, %v2278_v30, 0.0  ;;  %2962 = vmatmul.msk.bf16.gmra.mxu1 %vm307_vm1, %v1515_v44  ;;  %2994 = vmatmul.msk.bf16.gmra.mxu2 %vm307_vm1, %v4012_v5 }
 0x222   :  { %v2566_v37 = vpack.c.bf16 %v2534_v32, %v2534_v32  ;;  %3026 = vmatmul.msk.bf16.gmra.mxu3 %vm307_vm1, %v4842_v11  ;;  %v1518_v39 = vsel %vm1472_vm5, %v1516_v42, %v1517_v41  ;;  %v4845_v32 = vld [vmem:[#allocation13_spill] sm:$0xff]  ;;  %v1726_v11 = vshrl.u32 %v3142_v43, 16  ;;  %v1519_v42 = vor.u32 %v1517_v41, %v4028_v31 }
 0x223   :  { %3058 = vmatmul.msk.bf16.gmra.mxu0 %vm307_vm1, %v4015_v23  ;;  %v2211_v8 = vmul.f32 %v4293_v33, %v2175_v59 }
 0x224   :  { %3101 = vst.msk [vmem:[%s4667_s7 + $0xa0] sm:$0xf] %vm2590_vm6, %v2566_v37  ;;  %v1793_v54 = vpop.f32.mrf.mxu2  ;;  %v1521_v37 = vshll.u32 %v3142_v43, 16 }
 0x225   :  { %v1858_v35 = vadd.f32 %v1793_v54, %v1696_v3  ;;  %v1951_v5 = vpop.f32.mrf.mxu3  ;;  %v2247_v55 = vadd.f32 %v4298_v14, %v2211_v8 }
 0x226   :  { %v1633_v19 = vpop.f32.mrf.mxu1 }
 0x227   :  { %v2016_v58 = vadd.f32 %v1951_v5, %v1858_v35  ;;  %v2279_v10 = vmax.f32 %v2247_v55, 0.0  ;;  %v1697_v46 = vadd.f32 %v1633_v19, %v4844_v4  ;;  %v1729_v19 = vrot.slane %v1521_v37, 4 }
 0x228   :  { %v2113_v23 = vpop.f32.mrf.mxu0 }
 0x229   :  { %v2176_v6 = vadd.f32 %v2111_v27, %v2016_v58  ;;  %v2535_v29 = vsel %vm2503_vm4, %v2279_v10, 0.0 }
 0x22a   :  { %v2567_v36 = vpack.c.bf16 %v2535_v29, %v2535_v29 }
 0x22b   :  { %v2212_v50 = vmul.f32 %v4293_v33, %v2176_v6  ;;  %v2046_v6 = vrot.slane %v1726_v11, 4 }
 0x22c   :  { %3102 = vst.msk [vmem:[%s4667_s7 + $0xa4] sm:$0xf] %vm2590_vm6, %v2567_v36  ;;  %v1795_v0 = vpop.f32.mrf.mxu2 }
 0x22d   :  { %v1859_v1 = vadd.f32 %v1795_v0, %v1697_v46  ;;  %v1953_v18 = vpop.f32.mrf.mxu3  ;;  %v2248_v61 = vadd.f32 %v4298_v14, %v2212_v50  ;;  %v1523_v50 = vrot.slane %v1521_v37, 1  ;;  %v2436_v0 = vpop.permute.xlu0 %2435 }
 0x22e   :  { %v1636_v60 = vpop.f32.mrf.mxu1  ;;  %vm2506_vm9 = vcmp.eq.s32.totalorder %v2436_v0, 1 }
 0x22f   :  { %v2017_v38 = vadd.f32 %v1953_v18, %v1859_v1  ;;  %v2280_v44 = vmax.f32 %v2248_v61, 0.0  ;;  %v1698_v3 = vadd.f32 %v1636_v60, %v4039_v24  ;;  %v2047_v24 = vrot.slane %v1521_v37, 5 }
 0x230   :  { %v2116_v53 = vpop.f32.mrf.mxu0  ;;  %v1888_v1 = vrot.slane %v3142_v43, 4  ;;  %v1524_v41 = vsel %vm1472_vm5, %v1519_v42, %v1523_v50 }
 0x231   :  { %v2177_v30 = vadd.f32 %v2113_v23, %v2017_v38  ;;  %v2536_v27 = vsel %vm2504_vm7, %v2280_v44, 0.0  ;;  %2963 = vmatmul.msk.bf16.gmra.mxu1 %vm307_vm1, %v1518_v39  ;;  %2995 = vmatmul.msk.bf16.gmra.mxu2 %vm307_vm1, %v4049_v7  ;;  %v2048_v18 = vor.u32 %v2047_v24, %v2046_v6 }
 0x232   :  { %v2568_v59 = vpack.c.bf16 %v2536_v27, %v2536_v27  ;;  %3027 = vmatmul.msk.bf16.gmra.mxu3 %vm307_vm1, %v4845_v32 }
 0x233   :  { %3059 = vmatmul.msk.bf16.gmra.mxu0 %vm307_vm1, %v4053_v45  ;;  %v2213_v8 = vmul.f32 %v4293_v33, %v2177_v30  ;;  %v1728_v45 = vrot.slane %v1726_v11, 3  ;;  %v4846_v30 = vrot.slane %v3474_v13, 4 }
 0x234   :  { %3103 = vst.msk [vmem:[%s4667_s7 + $0xa8] sm:$0xf] %vm2590_vm6, %v2568_v59  ;;  %v1798_v7 = vpop.f32.mrf.mxu2  ;;  %v2049_v59 = vsel %vm767_vm3, %v4043_v57, %v2048_v18 }
 0x235   :  { %v1860_v54 = vadd.f32 %v1798_v7, %v1698_v3  ;;  %v1956_v35 = vpop.f32.mrf.mxu3  ;;  %v2249_v5 = vadd.f32 %v4298_v14, %v2213_v8  ;;  %v1730_v4 = vor.u32 %v1729_v19, %v1728_v45  ;;  %v1889_v27 = vsel %vm249_vm0, %v4846_v30, %v1888_v1  ;;  %v2439_v8 = vpop.permute.xlu1 %2438 }
 0x236   :  { %v1638_v55 = vpop.f32.mrf.mxu1  ;;  %vm2507_vm0 = vcmp.eq.s32.totalorder %v2439_v8, 1  ;;  %v2445_v18 = vpop.permute.xlu0 %2444 }
 0x237   :  { %v2018_v58 = vadd.f32 %v1956_v35, %v1860_v54  ;;  %v2281_v10 = vmax.f32 %v2249_v5, 0.0  ;;  %v1699_v56 = vadd.f32 %v1638_v55, %v4060_v52  ;;  %v1731_v52 = vsel %vm445_vm2, %v4041_v16, %v1730_v4 }
 0x238   :  { %v2118_v23 = vpop.f32.mrf.mxu0  ;;  %vm2509_vm2 = vcmp.eq.s32.totalorder %v2445_v18, 1 }
 0x239   :  { %v2178_v29 = vadd.f32 %v2116_v53, %v2018_v58  ;;  %v2537_v36 = vsel %vm2505_vm8, %v2281_v10, 0.0 }
 0x23a   :  { %v2569_v20 = vpack.c.bf16 %v2537_v36, %v2537_v36 }
 0x23b   :  { %v2214_v46 = vmul.f32 %v4293_v33, %v2178_v29 }
 0x23c   :  { %3104 = vst.msk [vmem:[%s4667_s7 + $0xac] sm:$0xf] %vm2590_vm6, %v2569_v20  ;;  %v1800_v61 = vpop.f32.mrf.mxu2 }
 0x23d   :  { %v1861_v60 = vadd.f32 %v1800_v61, %v1699_v56  ;;  %v1958_v39 = vpop.f32.mrf.mxu3  ;;  %v2250_v38 = vadd.f32 %v4298_v14, %v2214_v46 }
 0x23e   :  { %v1641_v31 = vpop.f32.mrf.mxu1 }
 0x23f   :  { %v2019_v44 = vadd.f32 %v1958_v39, %v1861_v60  ;;  %v2282_v43 = vmax.f32 %v2250_v38, 0.0  ;;  %v1700_v13 = vadd.f32 %v1641_v31, %v4070_v22 }
 0x240   :  { %v2121_v53 = vpop.f32.mrf.mxu0 }
 0x241   :  { %v2179_v32 = vadd.f32 %v2118_v23, %v2019_v44  ;;  %v2538_v37 = vsel %vm2506_vm9, %v2282_v43, 0.0  ;;  %2964 = vmatmul.msk.bf16.gmra.mxu1 %vm307_vm1, %v1524_v41  ;;  %2996 = vmatmul.msk.bf16.gmra.mxu2 %vm307_vm1, %v1731_v52  ;;  %v2442_v23 = vpop.permute.xlu2 %2441 }
 0x242   :  { %v2570_v11 = vpack.c.bf16 %v2538_v37, %v2538_v37  ;;  %3028 = vmatmul.msk.bf16.gmra.mxu3 %vm307_vm1, %v1889_v27 }
 0x243   :  { %3060 = vmatmul.msk.bf16.gmra.mxu0 %vm307_vm1, %v2049_v59  ;;  %v2215_v16 = vmul.f32 %v4293_v33, %v2179_v32  ;;  %vm2508_vm1 = vcmp.eq.s32.totalorder %v2442_v23, 1  ;;  %v2448_v59 = vpop.permute.xlu1 %2447 }
 0x244   :  { %3105 = vst.msk [vmem:[%s4667_s7 + $0xb0] sm:$0xf] %vm2590_vm6, %v2570_v11  ;;  %v1803_v57 = vpop.f32.mrf.mxu2  ;;  %vm2510_vm3 = vcmp.eq.s32.totalorder %v2448_v59, 1 }
 0x245   :  { %v1862_v3 = vadd.f32 %v1803_v57, %v1700_v13  ;;  %v1961_v17 = vpop.f32.mrf.mxu3  ;;  %v2251_v7 = vadd.f32 %v4298_v14, %v2215_v16 }
 0x246   :  { %v1643_v54 = vpop.f32.mrf.mxu1 }
 0x247   :  { %v2020_v35 = vadd.f32 %v1961_v17, %v1862_v3  ;;  %v2283_v5 = vmax.f32 %v2251_v7, 0.0  ;;  %v1701_v10 = vadd.f32 %v1643_v54, %v4083_v51 }
 0x248   :  { %v2123_v55 = vpop.f32.mrf.mxu0 }
 0x249   :  { %v2180_v45 = vadd.f32 %v2121_v53, %v2020_v35  ;;  %v2539_v19 = vsel %vm2507_vm0, %v2283_v5, 0.0  ;;  %v2451_v5 = vpop.permute.xlu2 %2450 }
 0x24a   :  { %v2571_v58 = vpack.c.bf16 %v2539_v19, %v2539_v19  ;;  %vm2511_vm5 = vcmp.eq.s32.totalorder %v2451_v5, 1 }
 0x24b   :  { %v2216_v22 = vmul.f32 %v4293_v33, %v2180_v45 }
 0x24c   :  { %3106 = vst.msk [vmem:[%s4667_s7 + $0xb4] sm:$0xf] %vm2590_vm6, %v2571_v58  ;;  %v1805_v6 = vpop.f32.mrf.mxu2 }
 0x24d   :  { %v1863_v24 = vadd.f32 %v1805_v6, %v1701_v10  ;;  %v1963_v29 = vpop.f32.mrf.mxu3  ;;  %v2252_v36 = vadd.f32 %v4298_v14, %v2216_v22 }
 0x24e   :  { %v1646_v20 = vpop.f32.mrf.mxu1 }
 0x24f   :  { %v2021_v42 = vadd.f32 %v1963_v29, %v1863_v24  ;;  %v2284_v50 = vmax.f32 %v2252_v36, 0.0  ;;  %v1702_v1 = vadd.f32 %v1646_v20, %v4094_v47 }
 0x250   :  { %v2126_v4 = vpop.f32.mrf.mxu0 }
 0x251   :  { %v2181_v46 = vadd.f32 %v2123_v55, %v2021_v42  ;;  %v2540_v56 = vsel %vm2508_vm1, %v2284_v50, 0.0  ;;  %v2454_v50 = vpop.permute.xlu0 %2453 }
 0x252   :  { %v2572_v0 = vpack.c.bf16 %v2540_v56, %v2540_v56  ;;  %vm2512_vm10 = vcmp.eq.s32.totalorder %v2454_v50, 1 }
 0x253   :  { %v2217_v51 = vmul.f32 %v4293_v33, %v2181_v46 }
 0x254   :  { %3107 = vst.msk [vmem:[%s4667_s7 + $0xb8] sm:$0xf] %vm2590_vm6, %v2572_v0  ;;  %v1808_v61 = vpop.f32.mrf.mxu2 }
 0x255   :  { %v1864_v60 = vadd.f32 %v1808_v61, %v1702_v1  ;;  %v1966_v39 = vpop.f32.mrf.mxu3  ;;  %v2253_v38 = vadd.f32 %v4298_v14, %v2217_v51 }
 0x256   :  { %v1648_v31 = vpop.f32.mrf.mxu1 }
 0x257   :  { %v2022_v41 = vadd.f32 %v1966_v39, %v1864_v60  ;;  %v2285_v52 = vmax.f32 %v2253_v38, 0.0  ;;  %v1703_v27 = vadd.f32 %v1648_v31, %v4107_v15 }
 0x258   :  { %v2128_v44 = vpop.f32.mrf.mxu0 }
 0x259   :  { %v2182_v43 = vadd.f32 %v2126_v4, %v2022_v41  ;;  %v2541_v53 = vsel %vm2509_vm2, %v2285_v52, 0.0  ;;  %v2457_v41 = vpop.permute.xlu1 %2456 }
 0x25a   :  { %v2573_v30 = vpack.c.bf16 %v2541_v53, %v2541_v53  ;;  %vm2513_vm11 = vcmp.eq.s32.totalorder %v2457_v41, 1 }
 0x25b   :  { %v2218_v47 = vmul.f32 %v4293_v33, %v2182_v43 }
 0x25c   :  { %3108 = vst.msk [vmem:[%s4667_s7 + $0xbc] sm:$0xf] %vm2590_vm6, %v2573_v30  ;;  %v1810_v32 = vpop.f32.mrf.mxu2 }
 0x25d   :  { %v1865_v37 = vadd.f32 %v1810_v32, %v1703_v27  ;;  %v1968_v11 = vpop.f32.mrf.mxu3  ;;  %v2254_v16 = vadd.f32 %v4298_v14, %v2218_v47 }
 0x25e   :  { %v1651_v13 = vpop.f32.mrf.mxu1 }
 0x25f   :  { %v2023_v8 = vadd.f32 %v1968_v11, %v1865_v37  ;;  %v2286_v57 = vmax.f32 %v2254_v16, 0.0  ;;  %v1704_v35 = vadd.f32 %v1651_v13, %v4118_v63  ;;  %v2460_v13 = vpop.permute.xlu2 %2459 }
 0x260   :  { %v2131_v3 = vpop.f32.mrf.mxu0  ;;  %vm2514_vm12 = vcmp.eq.s32.totalorder %v2460_v13, 1 }
 0x261   :  { %v2183_v17 = vadd.f32 %v2128_v44, %v2023_v8  ;;  %v2542_v7 = vsel %vm2510_vm3, %v2286_v57, 0.0 }
 0x262   :  { %v2574_v54 = vpack.c.bf16 %v2542_v7, %v2542_v7 }
 0x263   :  { %v2219_v15 = vmul.f32 %v4293_v33, %v2183_v17 }
 0x264   :  { %3109 = vst.msk [vmem:[%s4667_s7 + $0xc0] sm:$0xf] %vm2590_vm6, %v2574_v54  ;;  %v1813_v55 = vpop.f32.mrf.mxu2 }
 0x265   :  { %v1866_v45 = vadd.f32 %v1813_v55, %v1704_v35  ;;  %v1971_v19 = vpop.f32.mrf.mxu3  ;;  %v2255_v58 = vadd.f32 %v4298_v14, %v2219_v15 }
 0x266   :  { %v1653_v22 = vpop.f32.mrf.mxu1 }
 0x267   :  { %v2024_v10 = vadd.f32 %v1971_v19, %v1866_v45  ;;  %v2287_v23 = vmax.f32 %v2255_v58, 0.0  ;;  %v1705_v20 = vadd.f32 %v1653_v22, %v4127_v28  ;;  %v2463_v58 = vpop.permute.xlu0 %2462 }
 0x268   :  { %v2133_v6 = vpop.f32.mrf.mxu0  ;;  %vm2515_vm13 = vcmp.eq.s32.totalorder %v2463_v58, 1 }
 0x269   :  { %v2184_v24 = vadd.f32 %v2131_v3, %v2024_v10  ;;  %v2543_v29 = vsel %vm2511_vm5, %v2287_v23, 0.0 }
 0x26a   :  { %v2575_v36 = vpack.c.bf16 %v2543_v29, %v2543_v29 }
 0x26b   :  { %v2220_v63 = vmul.f32 %v4293_v33, %v2184_v24 }
 0x26c   :  { %3110 = vst.msk [vmem:[%s4667_s7 + $0xc4] sm:$0xf] %vm2590_vm6, %v2575_v36  ;;  %v1815_v42 = vpop.f32.mrf.mxu2 }
 0x26d   :  { %v2256_v4 = vadd.f32 %v4298_v14, %v2220_v63  ;;  %v1867_v46 = vadd.f32 %v1815_v42, %v1705_v20  ;;  %v1973_v56 = vpop.f32.mrf.mxu3 }
 0x26e   :  { %v1656_v0 = vpop.f32.mrf.mxu1 }
 0x26f   :  { %v2288_v51 = vmax.f32 %v2256_v4, 0.0  ;;  %v2025_v1 = vadd.f32 %v1973_v56, %v1867_v46  ;;  %v1706_v38 = vadd.f32 %v1656_v0, %v4134_v21 }
 0x270   :  { %v2136_v18 = vpop.f32.mrf.mxu0 }
 0x271   :  { %v2544_v61 = vsel %vm2512_vm10, %v2288_v51, 0.0  ;;  %v2185_v60 = vadd.f32 %v2133_v6, %v2025_v1  ;;  %v2466_v1 = vpop.permute.xlu1 %2465 }
 0x272   :  { %v2576_v39 = vpack.c.bf16 %v2544_v61, %v2544_v61  ;;  %vm2516_vm14 = vcmp.eq.s32.totalorder %v2466_v1, 1 }
 0x273   :  { %v2221_v28 = vmul.f32 %v4293_v33, %v2185_v60 }
 0x274   :  { %3111 = vst.msk [vmem:[%s4667_s7 + $0xc8] sm:$0xf] %vm2590_vm6, %v2576_v39  ;;  %v1818_v31 = vpop.f32.mrf.mxu2 }
 0x275   :  { %v2257_v52 = vadd.f32 %v4298_v14, %v2221_v28  ;;  %v1868_v44 = vadd.f32 %v1818_v31, %v1706_v38  ;;  %v1976_v43 = vpop.f32.mrf.mxu3 }
 0x276   :  { %v1658_v53 = vpop.f32.mrf.mxu1 }
 0x277   :  { %v2289_v30 = vmax.f32 %v2257_v52, 0.0  ;;  %v2026_v47 = vadd.f32 %v1976_v43, %v1868_v44  ;;  %v1707_v11 = vadd.f32 %v1658_v53, %v4147_v25 }
 0x278   :  { %v2138_v27 = vpop.f32.mrf.mxu0 }
 0x279   :  { %v2545_v59 = vsel %vm2513_vm11, %v2289_v30, 0.0  ;;  %v2186_v32 = vadd.f32 %v2136_v18, %v2026_v47  ;;  %v2469_v30 = vpop.permute.xlu2 %2468 }
 0x27a   :  { %v2577_v37 = vpack.c.bf16 %v2545_v59, %v2545_v59  ;;  %vm2517_vm15 = vcmp.eq.s32.totalorder %v2469_v30, 1 }
 0x27b   :  { %v2222_v21 = vmul.f32 %v4293_v33, %v2186_v32 }
 0x27c   :  { %3112 = vst.msk [vmem:[%s4667_s7 + $0xcc] sm:$0xf] %vm2590_vm6, %v2577_v37  ;;  %v1820_v16 = vpop.f32.mrf.mxu2 }
 0x27d   :  { %v2258_v8 = vadd.f32 %v4298_v14, %v2222_v21  ;;  %v1869_v57 = vadd.f32 %v1820_v16, %v1707_v11  ;;  %v1978_v3 = vpop.f32.mrf.mxu3 }
 0x27e   :  { %v1661_v17 = vpop.f32.mrf.mxu1 }
 0x27f   :  { %v2290_v7 = vmax.f32 %v2258_v8, 0.0  ;;  %v2027_v54 = vadd.f32 %v1978_v3, %v1869_v57  ;;  %v1708_v45 = vadd.f32 %v1661_v17, %v4162_v40  ;;  %v2472_v17 = vpop.permute.xlu0 %2471 }
 0x280   :  { %v2141_v15 = vpop.f32.mrf.mxu0  ;;  %vm2518_vm4 = vcmp.eq.s32.totalorder %v2472_v17, 1 }
 0x281   :  { %v2546_v35 = vsel %vm2514_vm12, %v2290_v7, 0.0  ;;  %v2187_v5 = vadd.f32 %v2138_v27, %v2027_v54 }
 0x282   :  { %v2578_v55 = vpack.c.bf16 %v2546_v35, %v2546_v35 }
 0x283   :  { %v2223_v25 = vmul.f32 %v4293_v33, %v2187_v5 }
 0x284   :  { %3113 = vst.msk [vmem:[%s4667_s7 + $0xd0] sm:$0xf] %vm2590_vm6, %v2578_v55  ;;  %v1823_v19 = vpop.f32.mrf.mxu2 }
 0x285   :  { %v2259_v22 = vadd.f32 %v4298_v14, %v2223_v25  ;;  %v1870_v10 = vadd.f32 %v1823_v19, %v1708_v45  ;;  %v1981_v23 = vpop.f32.mrf.mxu3  ;;  %v4613_v45 = vld [vmem:[%s4666_s5] ss:$0 sm:$0xff] }
 0x286   :  { %v1663_v6 = vpop.f32.mrf.mxu1 }
 0x287   :  { %v2291_v24 = vmax.f32 %v2259_v22, 0.0  ;;  %v2028_v29 = vadd.f32 %v1981_v23, %v1870_v10  ;;  %v1709_v50 = vadd.f32 %v1663_v6, %v4175_v9  ;;  %v2475_v23 = vpop.permute.xlu1 %2474 }
 0x288   :  { %v2143_v36 = vpop.f32.mrf.mxu0  ;;  %vm2519_vm7 = vcmp.eq.s32.totalorder %v2475_v23, 1 }
 0x289   :  { %v2547_v63 = vsel %vm2515_vm13, %v2291_v24, 0.0  ;;  %v2188_v20 = vadd.f32 %v2141_v15, %v2028_v29 }
 0x28a   :  { %v2579_v42 = vpack.c.bf16 %v2547_v63, %v2547_v63 }
 0x28b   :  { %v2224_v40 = vmul.f32 %v4293_v33, %v2188_v20 }
 0x28c   :  { %3114 = vst.msk [vmem:[%s4667_s7 + $0xd4] sm:$0xf] %vm2590_vm6, %v2579_v42  ;;  %v1825_v4 = vpop.f32.mrf.mxu2 }
 0x28d   :  { %v2260_v46 = vadd.f32 %v4298_v14, %v2224_v40  ;;  %v1871_v56 = vadd.f32 %v1825_v4, %v1709_v50  ;;  %v1983_v0 = vpop.f32.mrf.mxu3 }
 0x28e   :  { %v1666_v51 = vpop.f32.mrf.mxu1 }
 0x28f   :  { %v2292_v18 = vmax.f32 %v2260_v46, 0.0  ;;  %v2029_v61 = vadd.f32 %v1983_v0, %v1871_v56  ;;  %v1710_v31 = vadd.f32 %v1666_v51, %v4186_v34  ;;  %v2478_v0 = vpop.permute.xlu2 %2477 }
 0x290   :  { %v2146_v60 = vpop.f32.mrf.mxu0  ;;  %vm2520_vm8 = vcmp.eq.s32.totalorder %v2478_v0, 1 }
 0x291   :  { %v2548_v39 = vsel %vm2516_vm14, %v2292_v18, 0.0  ;;  %v2189_v28 = vadd.f32 %v2143_v36, %v2029_v61 }
 0x292   :  { %v2580_v38 = vpack.c.bf16 %v2548_v39, %v2548_v39 }
 0x293   :  { %v2225_v9 = vmul.f32 %v4293_v33, %v2189_v28 }
 0x294   :  { %3115 = vst.msk [vmem:[%s4667_s7 + $0xd8] sm:$0xf] %vm2590_vm6, %v2580_v38  ;;  %v1828_v41 = vpop.f32.mrf.mxu2 }
 0x295   :  { %v2261_v52 = vadd.f32 %v4298_v14, %v2225_v9  ;;  %v1872_v44 = vadd.f32 %v1828_v41, %v1710_v31  ;;  %v1986_v43 = vpop.f32.mrf.mxu3 }
 0x296   :  { %v1668_v53 = vpop.f32.mrf.mxu1 }
 0x297   :  { %v2293_v47 = vmax.f32 %v2261_v52, 0.0  ;;  %v2030_v27 = vadd.f32 %v1986_v43, %v1872_v44  ;;  %v1711_v11 = vadd.f32 %v1668_v53, %v4199_v26  ;;  %v4602_v26 = vld [vmem:[%s4665_s4] ss:$0 sm:$0xff]  ;;  %v2481_v44 = vpop.permute.xlu0 %2480 }
 0x298   :  { %v2148_v59 = vpop.f32.mrf.mxu0  ;;  %vm2521_vm9 = vcmp.eq.s32.totalorder %v2481_v44, 1 }
 0x299   :  { %v2549_v32 = vsel %vm2517_vm15, %v2293_v47, 0.0  ;;  %v2190_v37 = vadd.f32 %v2146_v60, %v2030_v27 }
 0x29a   :  { %v2581_v21 = vpack.c.bf16 %v2549_v32, %v2549_v32 }
 0x29b   :  { %v2226_v34 = vmul.f32 %v4293_v33, %v2190_v37 }
 0x29c   :  { %3116 = vst.msk [vmem:[%s4667_s7 + $0xdc] sm:$0xf] %vm2590_vm6, %v2581_v21  ;;  %v1830_v16 = vpop.f32.mrf.mxu2 }
 0x29d   :  { %v2262_v13 = vadd.f32 %v4298_v14, %v2226_v34  ;;  %v1873_v8 = vadd.f32 %v1830_v16, %v1711_v11  ;;  %v1988_v57 = vpop.f32.mrf.mxu3 }
 0x29e   :  { %v1671_v3 = vpop.f32.mrf.mxu1 }
 0x29f   :  { %v2294_v7 = vmax.f32 %v2262_v13, 0.0  ;;  %v2031_v54 = vadd.f32 %v1988_v57, %v1873_v8  ;;  %v1712_v14 = vadd.f32 %v1671_v3, %v4210_v12  ;;  %v2484_v13 = vpop.permute.xlu1 %2483 }
 0x2a0   :  { %v2151_v15 = vpop.f32.mrf.mxu0  ;;  %vm2522_vm0 = vcmp.eq.s32.totalorder %v2484_v13, 1 }
 0x2a1   :  { %v2550_v35 = vsel %vm2518_vm4, %v2294_v7, 0.0  ;;  %v2191_v33 = vadd.f32 %v2148_v59, %v2031_v54 }
 0x2a2   :  { %v2582_v5 = vpack.c.bf16 %v2550_v35, %v2550_v35  ;;  %v2487_v35 = vpop.permute.xlu2 %2486 }
 0x2a3   :  { %v2227_v55 = vmul.f32 %v4602_v26, %v2191_v33  ;;  %vm2523_vm1 = vcmp.eq.s32.totalorder %v2487_v35, 1 }
 0x2a4   :  { %3117 = vst.msk [vmem:[%s4667_s7 + $0xe0] sm:$0xf] %vm2590_vm6, %v2582_v5  ;;  %v1833_v25 = vpop.f32.mrf.mxu2 }
 0x2a5   :  { %v2263_v19 = vadd.f32 %v4613_v45, %v2227_v55  ;;  %v1874_v58 = vadd.f32 %v1833_v25, %v1712_v14  ;;  %v1991_v22 = vpop.f32.mrf.mxu3 }
 0x2a6   :  { %v1673_v10 = vpop.f32.mrf.mxu1 }
 0x2a7   :  { %v2295_v6 = vmax.f32 %v2263_v19, 0.0  ;;  %v2032_v24 = vadd.f32 %v1991_v22, %v1874_v58  ;;  %v1713_v42 = vadd.f32 %v1673_v10, %v4223_v49 }
 0x2a8   :  { %v2153_v12 = vpop.f32.mrf.mxu0 }
 0x2a9   :  { %v2551_v29 = vsel %vm2519_vm7, %v2295_v6, 0.0  ;;  %v2192_v36 = vadd.f32 %v2151_v15, %v2032_v24  ;;  %v4847_v6 = vld [vmem:[#allocation31_spill] sm:$0xff] }
 0x2aa   :  { %v2583_v63 = vpack.c.bf16 %v2551_v29, %v2551_v29  ;;  %v2490_v29 = vpop.permute.xlu0 %2489 }
 0x2ab   :  { %v2228_v20 = vmul.f32 %v4602_v26, %v2192_v36  ;;  %vm2524_vm2 = vcmp.eq.s32.totalorder %v2490_v29, 1 }
 0x2ac   :  { %3118 = vst.msk [vmem:[%s4667_s7 + $0xe4] sm:$0xf] %vm2590_vm6, %v2583_v63  ;;  %v1835_v40 = vpop.f32.mrf.mxu2 }
 0x2ad   :  { %v2264_v50 = vadd.f32 %v4613_v45, %v2228_v20  ;;  %v1875_v4 = vadd.f32 %v1835_v40, %v1713_v42  ;;  %v1993_v46 = vpop.f32.mrf.mxu3 }
 0x2ae   :  { %v1676_v56 = vpop.f32.mrf.mxu1 }
 0x2af   :  { %v2296_v51 = vmax.f32 %v2264_v50, 0.0  ;;  %v2033_v1 = vadd.f32 %v1993_v46, %v1875_v4  ;;  %v1714_v28 = vadd.f32 %v1676_v56, %v4234_v48 }
 0x2b0   :  { %v2156_v39 = vpop.f32.mrf.mxu0 }
 0x2b1   :  { %v2552_v18 = vsel %vm2520_vm8, %v2296_v51, 0.0  ;;  %v2193_v61 = vadd.f32 %v2153_v12, %v2033_v1  ;;  %v2493_v51 = vpop.permute.xlu1 %2492 }
 0x2b2   :  { %v2584_v60 = vpack.c.bf16 %v2552_v18, %v2552_v18  ;;  %vm2525_vm3 = vcmp.eq.s32.totalorder %v2493_v51, 1 }
 0x2b3   :  { %v2229_v49 = vmul.f32 %v4602_v26, %v2193_v61 }
 0x2b4   :  { %3119 = vst.msk [vmem:[%s4667_s7 + $0xe8] sm:$0xf] %vm2590_vm6, %v2584_v60  ;;  %v1838_v38 = vpop.f32.mrf.mxu2 }
 0x2b5   :  { %v2265_v9 = vadd.f32 %v4613_v45, %v2229_v49  ;;  %v1876_v31 = vadd.f32 %v1838_v38, %v1714_v28  ;;  %v1996_v41 = vpop.f32.mrf.mxu3 }
 0x2b6   :  { %v1678_v52 = vpop.f32.mrf.mxu1 }
 0x2b7   :  { %v2297_v43 = vmax.f32 %v2265_v9, 0.0  ;;  %v2034_v53 = vadd.f32 %v1996_v41, %v1876_v31  ;;  %v1715_v59 = vadd.f32 %v1678_v52, %v4247_v62 }
 0x2b8   :  { %v2158_v32 = vpop.f32.mrf.mxu0 }
 0x2b9   :  { %v2553_v30 = vsel %vm2521_vm9, %v2297_v43, 0.0  ;;  %v2194_v47 = vadd.f32 %v2156_v39, %v2034_v53 }
 0x2ba   :  { %v2585_v27 = vpack.c.bf16 %v2553_v30, %v2553_v30 }
 0x2bb   :  { %v2230_v48 = vmul.f32 %v4602_v26, %v2194_v47 }
 0x2bc   :  { %3120 = vst.msk [vmem:[%s4667_s7 + $0xec] sm:$0xf] %vm2590_vm6, %v2585_v27  ;;  %v1840_v37 = vpop.f32.mrf.mxu2 }
 0x2bd   :  { %v2266_v21 = vadd.f32 %v4613_v45, %v2230_v48  ;;  %v1877_v34 = vadd.f32 %v1840_v37, %v1715_v59  ;;  %v1998_v11 = vpop.f32.mrf.mxu3 }
 0x2be   :  { %v1681_v16 = vpop.f32.mrf.mxu1 }
 0x2bf   :  { %v2298_v8 = vmax.f32 %v2266_v21, 0.0  ;;  %v2035_v57 = vadd.f32 %v1998_v11, %v1877_v34  ;;  %v1716_v54 = vadd.f32 %v1681_v16, %v4258_v2 }
 0x2c0   :  { %v2161_v14 = vpop.f32.mrf.mxu0 }
 0x2c1   :  { %v2554_v3 = vsel %vm2522_vm0, %v2298_v8, 0.0  ;;  %v2195_v17 = vadd.f32 %v2158_v32, %v2035_v57 }
 0x2c2   :  { %v2586_v7 = vpack.c.bf16 %v2554_v3, %v2554_v3 }
 0x2c3   :  { %v2231_v62 = vmul.f32 %v4602_v26, %v2195_v17 }
 0x2c4   :  { %3121 = vst.msk [vmem:[%s4667_s7 + $0xf0] sm:$0xf] %vm2590_vm6, %v2586_v7  ;;  %v1843_v15 = vpop.f32.mrf.mxu2 }
 0x2c5   :  { %v2267_v33 = vadd.f32 %v4613_v45, %v2231_v62  ;;  %v1878_v5 = vadd.f32 %v1843_v15, %v1716_v54  ;;  %v2001_v55 = vpop.f32.mrf.mxu3 }
 0x2c6   :  { %v1683_v58 = vpop.f32.mrf.mxu1 }
 0x2c7   :  { %v2299_v25 = vmax.f32 %v2267_v33, 0.0  ;;  %v2036_v19 = vadd.f32 %v2001_v55, %v1878_v5  ;;  %v1717_v24 = vadd.f32 %v1683_v58, %v4847_v6 }
 0x2c8   :  { %v2163_v50 = vpop.f32.mrf.mxu0 }
 0x2c9   :  { %v2555_v22 = vsel %vm2523_vm1, %v2299_v25, 0.0  ;;  %v2196_v10 = vadd.f32 %v2161_v14, %v2036_v19 }
 0x2ca   :  { %v2587_v23 = vpack.c.bf16 %v2555_v22, %v2555_v22 }
 0x2cb   :  { %v2232_v2 = vmul.f32 %v4602_v26, %v2196_v10 }
 0x2cc   :  { %3122 = vst.msk [vmem:[%s4667_s7 + $0xf4] sm:$0xf] %vm2590_vm6, %v2587_v23  ;;  %v1845_v12 = vpop.f32.mrf.mxu2 }
 0x2cd   :  { %v2268_v36 = vadd.f32 %v4613_v45, %v2232_v2  ;;  %v1879_v63 = vadd.f32 %v1845_v12, %v1717_v24  ;;  %v2003_v20 = vpop.f32.mrf.mxu3 }
 0x2cf   :  { %v2300_v42 = vmax.f32 %v2268_v36, 0.0  ;;  %v2037_v40 = vadd.f32 %v2003_v20, %v1879_v63 }
 0x2d1   :  { %v2556_v4 = vsel %vm2524_vm2, %v2300_v42, 0.0  ;;  %v2197_v46 = vadd.f32 %v2163_v50, %v2037_v40 }
 0x2d2   :  { %v2588_v56 = vpack.c.bf16 %v2556_v4, %v2556_v4 }
 0x2d3   :  { %v2233_v0 = vmul.f32 %v4602_v26, %v2197_v46 }
 0x2d4   :  { %3123 = vst.msk [vmem:[%s4667_s7 + $0xf8] sm:$0xf] %vm2590_vm6, %v2588_v56 }
 0x2d5   :  { %v2269_v1 = vadd.f32 %v4613_v45, %v2233_v0 }
 0x2d7   :  { %v2301_v18 = vmax.f32 %v2269_v1, 0.0 }
 0x2d9   :  { %v2557_v61 = vsel %vm2525_vm3, %v2301_v18, 0.0 }
 0x2da   :  { %v2589_v60 = vpack.c.bf16 %v2557_v61, %v2557_v61 }
 0x2dc   :  { %3124 = vst.msk [vmem:[%s4667_s7 + $0xfc] sm:$0xf] %vm2590_vm6, %v2589_v60 }

// kernel: conv2d_im2col.1
= control target key start
LH: loop header
LB: loop body
LE: loop exit
PB: predicated region body
PF: predicated region fallthrough
CT: control target
= control target key end

     0   :  { %9 = vsyncpa [#allocation3], 0  ;;  %s1822_s0 = inlined_call_operand.vmem [shape: bf16[512,147], index: 0, kind: input, shape index: {}]   ;;  %s1823_s1 = inlined_call_operand.vmem [shape: bf16[147,64], index: 1, kind: input, shape index: {}]   ;;  %s1824_s2 = inlined_call_operand.vmem [shape: f32[1,64], index: 2, kind: input, shape index: {}]   ;;  %s1825_s3 = inlined_call_operand.vmem [shape: f32[1,64], index: 3, kind: input, shape index: {}]   ;;  %s1826_s4 = inlined_call_operand.hbm [shape: bf16[512,64], index: 4, kind: output, shape index: {}]  }
   0x1   :  { %11 = vsyncpa [#allocation3 + $0x1], 0  ;;  %s1463_s15 = smov 0   ;;  %s1465_s16 = smov 0  }
   0x2   :  { %s1467_s17 = smov 0   ;;  %s1469_s18 = smov 0  }
   0x3   :  { %s1471_s19 = smov 0   ;;  %s1473_s20 = smov 0  }
   0x4 LB: > { %s1045_s21 = sadd.s32 4294967295, %s1433_s20   ;;  %s1046_s22 = sadd.s32 4294967294, %s1433_s20   ;;  %s1433_s20 = sphi %s1473_s20, %s17_s20   ;;  %s1429_s19 = sphi %s1471_s19, %s1833_s19   ;;  %s1425_s18 = sphi %s1469_s18, %s1832_s18   ;;  %s1421_s17 = sphi %s1467_s17, %s1831_s17   ;;  %s1417_s16 = sphi %s1465_s16, %s1830_s16   ;;  %s1413_s15 = sphi %s1463_s15, %s1829_s15  }
   0x5   : > { %s26_s23 = sadd.s32 1, %s1429_s19  ;;  %s142_s24 = sadd.s32 1, %s1421_s17 }
   0x6   : > { %p27_p0 = scmp.ge.s32.totalorder %s26_s23, 2  ;;  %p152_p1 = scmp.ne.s32.totalorder %s1421_s17, %s1417_s16 }
   0x7   : > { %p153_p2 = scmp.eq.s32.totalorder %s1045_s21, 1  ;;  %p158_p3 = scmp.ne.s32.totalorder %s1417_s16, %s1413_s15 }
   0x8   : > { %s1835_s23 = smov (%p27_p0, %s26_s23), 0  ;;  %p159_p5 = scmp.eq.s32.totalorder %s1046_s22, 1 }
   0x9   : > { %p1503_p4 = por %p153_p2, %p152_p1  ;;  %s137_s26 = ssub.s32 %s1429_s19, %s1835_s23 }
   0xa   : > { %p1052_p6 = scmp.ge.s32.totalorder %s1433_s20, 1  ;;  %p140_p7 = scmp.eq.s32.totalorder %s137_s26, 0 }
   0xb   : > { %p1510_p8 = por %p159_p5, %p158_p3  ;;  %p206_p9 = scmp.lt.s32.totalorder %s1433_s20, 3 }
   0xc   : > { %s1516_s28 = scalar_select %p140_p7, %s1421_s17, %s142_s24  }
   0xd   : > { %p207_p10 = pnand %p1052_p6, %p206_p9 }
   0xe   : > { %s1054_s7 = sshll.u32 (!%p207_p10), %s1425_s18, 5  ;;  %s240_s22 = sand.u32 (!%p207_p10), 1, %s1417_s16  }
   0xf   : > { %210 = sbr.rel (%p207_p10) target bundleno = 318 (0x13e), region = 36  ;;  %p244_p11 = scmp.lt.s32.totalorder (!%p207_p10), %s1054_s7, 63 }
  0x10   : > { %s1284_s29 = sshll.u32 (!%p207_p10), %s1425_s18, 7  ;;  %s918_s8 = scalar_lea.sflag (!%p207_p10), [#allocation3], %s240_s22 }
  0x11   : > { %s930_s6 = scalar_lea.hbm (!%p207_p10), %s1826_s4, %s1284_s29  ;;  %s1375_s13 = scalar_lea.hbm (!%p207_p10), %s1826_s4, 256 }
  0x14   : > { %v1282_v0 = vld [vmem:[%s1823_s1 + $0x38] sm:$0xff]  ;;  %v312_v1 = vld [vmem:[%s1823_s1 + $0x48] sm:$0x3]  ;;  %vm563_vm0 = vcmask 1040384   ;;  %vm564_vm1 = vcmask 1041408   ;;  %v1281_v3 = vld [vmem:[%s1823_s1 + $0x30] sm:$0xff] }
  0x15   : > { %v494_v2 = vunpack.c.l.b16 %v312_v1  ;;  %570 = vmatpush.bf16.msra.mxu0 %v1282_v0  ;;  %1285 = vmatpush.bf16.msra.mxu2 %v1282_v0  ;;  %v1435_v4 = vmov 65535   ;;  %s1837_s7 = smov (!%p244_p11, %s1054_s7), 63  ;;  %v1280_v9 = vld [vmem:[%s1823_s1 + $0x28] sm:$0xff]  ;;  %v1283_v10 = vld [vmem:[%s1823_s1 + $0x40] sm:$0xff]  ;;  %vm514_vm2 = vcmask 154624   ;;  %v1278_v18 = vld [vmem:[%s1823_s1 + $0x18] sm:$0xff] }
  0x16   : > { %v565_v5 = vsel %vm563_vm0, 4294967295, %v1435_v4  ;;  %s1242_s12 = sshll.u32 %s1837_s7, 3  ;;  %v1279_v14 = vld [vmem:[%s1823_s1 + $0x20] sm:$0xff]  ;;  %v1277_v19 = vld [vmem:[%s1823_s1 + $0x10] sm:$0xff]  ;;  %v1276_v20 = vld [vmem:[%s1823_s1 + $0x8] sm:$0xff]  ;;  %vm884_vm3 = vcmask 519168  }
  0x17   : > { %v504_v6 = vpack.c.b16 %v494_v2, %v494_v2  ;;  %v566_v7 = vsel %vm564_vm1, %v565_v5, 0  ;;  %s1537_s24 = scalar_lea.vmem %s1822_s0, %s1242_s12  ;;  %v1275_v26 = vld [vmem:[%s1823_s1] sm:$0xff]  ;;  %s933_s7 = sshll.u32 %s930_s6, 4  ;;  %s934_s7 = int_to_ptr.hbm [resolvable:$true] %s933_s7 }
  0x18   : > { %v1243_v11 = vld [vmem:[%s1537_s24 + $0x4] sm:$0xf]  ;;  %v1061_v12 = vld [vmem:[%s1537_s24 + $0x8] sm:$0xf0]  ;;  %v1261_v15 = vld [vmem:[%s1537_s24 + $0x94] sm:$0xf] }
  0x19   : > { %v568_v8 = vand.u32 %v566_v7, %v504_v6  ;;  %571 = vmatpush.bf16.msra.mxu0 %v1281_v3  ;;  %1286 = vmatpush.bf16.msra.mxu2 %v1281_v3  ;;  %v1064_v13 = vor.u32 %v1243_v11, %v1061_v12  ;;  %v1133_v16 = vld [vmem:[%s1537_s24 + $0x98] sm:$0xf0]  ;;  %v1245_v21 = vld [vmem:[%s1537_s24 + $0x14] sm:$0xf]  ;;  %v1263_v23 = vld [vmem:[%s1537_s24 + $0xa4] sm:$0xf] }
  0x1a   : > { %v1136_v17 = vor.u32 %v1261_v15, %v1133_v16  ;;  %v1069_v22 = vld [vmem:[%s1537_s24 + $0x18] sm:$0xf0]  ;;  %v1141_v24 = vld [vmem:[%s1537_s24 + $0xa8] sm:$0xf0]  ;;  %v1059_v27 = vld [vmem:[%s1537_s24] sm:$0xf] }
  0x1b   : > { %665 = vmatpush.bf16.msra.mxu1 %v568_v8  ;;  %1293 = vmatpush.bf16.msra.mxu3 %v568_v8  ;;  %v1072_v25 = vor.u32 %v1245_v21, %v1069_v22  ;;  %v1244_v28 = vld [vmem:[%s1537_s24 + $0x4] sm:$0xf0]  ;;  %v1123_v29 = vld [vmem:[%s1537_s24 + $0x80] sm:$0xf]  ;;  %v1144_v31 = vor.u32 %v1263_v23, %v1141_v24  ;;  %v1247_v34 = vld [vmem:[%s1537_s24 + $0x24] sm:$0xf] }
  0x1c   : > { %v1260_v30 = vld [vmem:[%s1537_s24 + $0x84] sm:$0xf0]  ;;  %v1060_v32 = vor.u32 %v1244_v28, %v1059_v27  ;;  %v1077_v35 = vld [vmem:[%s1537_s24 + $0x28] sm:$0xf0]  ;;  %v1265_v36 = vld [vmem:[%s1537_s24 + $0xb4] sm:$0xf] }
  0x1d   : > { %572 = vmatpush.bf16.msra.mxu0 %v1280_v9  ;;  %1287 = vmatpush.bf16.msra.mxu2 %v1280_v9  ;;  %v1124_v33 = vor.u32 %v1260_v30, %v1123_v29  ;;  %v1149_v37 = vld [vmem:[%s1537_s24 + $0xb8] sm:$0xf0]  ;;  %v1080_v38 = vor.u32 %v1247_v34, %v1077_v35  ;;  %v1067_v39 = vld [vmem:[%s1537_s24 + $0x10] sm:$0xf]  ;;  %v1246_v40 = vld [vmem:[%s1537_s24 + $0x14] sm:$0xf0] }
  0x1e   : > { %v1131_v41 = vld [vmem:[%s1537_s24 + $0x90] sm:$0xf]  ;;  %v1262_v42 = vld [vmem:[%s1537_s24 + $0x94] sm:$0xf0]  ;;  %v1152_v43 = vor.u32 %v1265_v36, %v1149_v37  ;;  %v1068_v44 = vor.u32 %v1246_v40, %v1067_v39  ;;  %v1249_v46 = vld [vmem:[%s1537_s24 + $0x34] sm:$0xf] }
  0x1f   : > { %666 = vmatpush.bf16.msra.mxu1 %v1283_v10  ;;  %1294 = vmatpush.bf16.msra.mxu3 %v1283_v10  ;;  %v1132_v45 = vor.u32 %v1262_v42, %v1131_v41  ;;  %v1085_v47 = vld [vmem:[%s1537_s24 + $0x38] sm:$0xf0]  ;;  %v1267_v48 = vld [vmem:[%s1537_s24 + $0xc4] sm:$0xf]  ;;  %v1157_v49 = vld [vmem:[%s1537_s24 + $0xc8] sm:$0xf0] }
  0x20   : > { %v1088_v50 = vor.u32 %v1249_v46, %v1085_v47  ;;  %v1075_v51 = vld [vmem:[%s1537_s24 + $0x20] sm:$0xf]  ;;  %v1248_v52 = vld [vmem:[%s1537_s24 + $0x24] sm:$0xf0]  ;;  %v1160_v55 = vor.u32 %v1267_v48, %v1157_v49  ;;  %v1251_v58 = vld [vmem:[%s1537_s24 + $0x44] sm:$0xf] }
  0x21   : > { %573 = vmatpush.bf16.msra.mxu0 %v1279_v14  ;;  %1288 = vmatpush.bf16.msra.mxu2 %v1279_v14  ;;  %v1139_v53 = vld [vmem:[%s1537_s24 + $0xa0] sm:$0xf]  ;;  %v1264_v54 = vld [vmem:[%s1537_s24 + $0xa4] sm:$0xf0]  ;;  %v1076_v56 = vor.u32 %v1248_v52, %v1075_v51  ;;  %v1093_v59 = vld [vmem:[%s1537_s24 + $0x48] sm:$0xf0] }
  0x22   : > { %1221 = vmatmul.msk.bf16.vlgmr.msra.gmra.mxu1 %vm514_vm2, %v1064_v13  ;;  %1230 = vmatmul.msk.bf16.vlgmr.msra.gmra.mxu3 %vm514_vm2, %v1136_v17  ;;  %v1140_v57 = vor.u32 %v1264_v54, %v1139_v53  ;;  %v1269_v60 = vld [vmem:[%s1537_s24 + $0xd4] sm:$0xf]  ;;  %v1165_v61 = vld [vmem:[%s1537_s24 + $0xd8] sm:$0xf0]  ;;  %v1096_v62 = vor.u32 %v1251_v58, %v1093_v59  ;;  %v1083_v63 = vld [vmem:[%s1537_s24 + $0x30] sm:$0xf] }
  0x23   : > { %v1250_v0 = vld [vmem:[%s1537_s24 + $0x34] sm:$0xf0]  ;;  %v1147_v1 = vld [vmem:[%s1537_s24 + $0xb0] sm:$0xf]  ;;  %v1168_v3 = vor.u32 %v1269_v60, %v1165_v61  ;;  %v1253_v6 = vld [vmem:[%s1537_s24 + $0x54] sm:$0xf] }
  0x24   : > { %v1266_v2 = vld [vmem:[%s1537_s24 + $0xb4] sm:$0xf0]  ;;  %v1084_v4 = vor.u32 %v1250_v0, %v1083_v63  ;;  %v1101_v7 = vld [vmem:[%s1537_s24 + $0x58] sm:$0xf0]  ;;  %v1271_v8 = vld [vmem:[%s1537_s24 + $0xe4] sm:$0xf] }
  0x25   : > { %574 = vmatpush.bf16.msra.mxu0 %v1278_v18  ;;  %1289 = vmatpush.bf16.msra.mxu2 %v1278_v18  ;;  %v1148_v5 = vor.u32 %v1266_v2, %v1147_v1  ;;  %v1173_v9 = vld [vmem:[%s1537_s24 + $0xe8] sm:$0xf0]  ;;  %v1104_v10 = vor.u32 %v1253_v6, %v1101_v7  ;;  %v1091_v11 = vld [vmem:[%s1537_s24 + $0x40] sm:$0xf]  ;;  %v1252_v12 = vld [vmem:[%s1537_s24 + $0x44] sm:$0xf0] }
  0x26   : > { %v1155_v13 = vld [vmem:[%s1537_s24 + $0xc0] sm:$0xf]  ;;  %v1268_v14 = vld [vmem:[%s1537_s24 + $0xc4] sm:$0xf0]  ;;  %v1176_v15 = vor.u32 %v1271_v8, %v1173_v9  ;;  %v1092_v16 = vor.u32 %v1252_v12, %v1091_v11  ;;  %v1255_v18 = vld [vmem:[%s1537_s24 + $0x64] sm:$0xf] }
  0x27   : > { %v1156_v17 = vor.u32 %v1268_v14, %v1155_v13  ;;  %v1181_v21 = vld [vmem:[%s1537_s24 + $0xf8] sm:$0xf0]  ;;  %v1099_v23 = vld [vmem:[%s1537_s24 + $0x50] sm:$0xf]  ;;  %v1254_v24 = vld [vmem:[%s1537_s24 + $0x54] sm:$0xf0] }
  0x28   : > { %v1100_v28 = vor.u32 %v1254_v24, %v1099_v23  ;;  %v1257_v30 = vld [vmem:[%s1537_s24 + $0x74] sm:$0xf]  ;;  %v1256_v34 = vld [vmem:[%s1537_s24 + $0x64] sm:$0xf0]  ;;  %v1171_v35 = vld [vmem:[%s1537_s24 + $0xe0] sm:$0xf] }
  0x29   : > { %575 = vmatpush.bf16.msra.mxu0 %v1277_v19  ;;  %1290 = vmatpush.bf16.msra.mxu2 %v1277_v19  ;;  %v1109_v19 = vld [vmem:[%s1537_s24 + $0x68] sm:$0xf0]  ;;  %v1272_v36 = vld [vmem:[%s1537_s24 + $0xe4] sm:$0xf0]  ;;  %v1259_v39 = vld [vmem:[%s1537_s24 + $0x84] sm:$0xf] }
  0x2a   : > { %v1112_v22 = vor.u32 %v1255_v18, %v1109_v19  ;;  %v1125_v40 = vld [vmem:[%s1537_s24 + $0x88] sm:$0xf0]  ;;  %v1115_v42 = vld [vmem:[%s1537_s24 + $0x70] sm:$0xf]  ;;  %v1274_v46 = vld [vmem:[%s1537_s24 + $0xf4] sm:$0xf0] }
  0x2b   : > { %v1128_v41 = vor.u32 %v1259_v39, %v1125_v40  ;;  %v1637_v52 = vld [vmem:[%s1824_s2] ss:$0 sm:$0xff]  ;;  %s1369_s9 = sshra.s32 %s934_s7, 4  ;;  %s1370_s9 = int_to_ptr.hbm [resolvable:$true] %s1369_s9 }
  0x2c   : > { %s1371_s10 = scalar_lea.hbm %s1370_s9, 128  ;;  %p1376_p1 = scmp.lt.s32.totalorder %s1370_s9, %s1826_s4 }
  0x2d   : > { %576 = vmatpush.bf16.msra.mxu0 %v1276_v20  ;;  %1291 = vmatpush.bf16.msra.mxu2 %v1276_v20  ;;  %v1273_v20 = vld [vmem:[%s1537_s24 + $0xf4] sm:$0xf]  ;;  %p1372_p12 = scmp.ne.s32.totalorder %s1370_s9, %s1371_s10  ;;  %p1377_p2 = scmp.lt.s32.totalorder %s1375_s13, %s1371_s10 }
  0x2e   : > { %v1184_v27 = vor.u32 %v1273_v20, %v1181_v21 }
  0x2f   : > { %p1373_p13 = pnand %p1372_p12, %p1503_p4  ;;  %p1378_p3 = por %p1377_p2, %p1376_p1 }
  0x31   : > { %577 = vmatpush.bf16.msra.mxu0 %v1275_v26  ;;  %1292 = vmatpush.bf16.msra.mxu2 %v1275_v26  ;;  %v1270_v26 = vld [vmem:[%s1537_s24 + $0xd4] sm:$0xf0]  ;;  %p1374_p0 = pneg %p1373_p13 }
  0x32   : > { %1222 = vmatmul.msk.bf16.gmra.mxu1 %vm514_vm2, %v1072_v25  ;;  %1231 = vmatmul.msk.bf16.gmra.mxu3 %vm514_vm2, %v1144_v31  ;;  %v1163_v25 = vld [vmem:[%s1537_s24 + $0xd0] sm:$0xf]  ;;  %v1117_v31 = vld [vmem:[%s1537_s24 + $0x78] sm:$0xf0] }
  0x33   : > { %v1164_v29 = vor.u32 %v1270_v26, %v1163_v25  ;;  %p1379_p5 = pnand %p1378_p3, %p1374_p0 }
  0x34   : > { %578 = vmatmul.bf16.vlgmr.msra.gmra.mxu0 %v1060_v32  ;;  %618 = vmatmul.bf16.vlgmr.msra.gmra.mxu2 %v1124_v33  ;;  %v1120_v32 = vor.u32 %v1257_v30, %v1117_v31  ;;  %v1107_v33 = vld [vmem:[%s1537_s24 + $0x60] sm:$0xf] }
  0x35   : > { %v1108_v37 = vor.u32 %v1256_v34, %v1107_v33 }
  0x42   : > { %1223 = vmatmul.msk.bf16.gmra.mxu1 %vm514_vm2, %v1080_v38  ;;  %1232 = vmatmul.msk.bf16.gmra.mxu3 %vm514_vm2, %v1152_v43  ;;  %v1172_v38 = vor.u32 %v1272_v36, %v1171_v35  ;;  %v1258_v43 = vld [vmem:[%s1537_s24 + $0x74] sm:$0xf0] }
  0x43   : > { %v1116_v47 = vor.u32 %v1258_v43, %v1115_v42 }
  0x44   : > { %583 = vmatmul.bf16.gmra.mxu0 %v1068_v44  ;;  %623 = vmatmul.bf16.gmra.mxu2 %v1132_v45  ;;  %v1179_v45 = vld [vmem:[%s1537_s24 + $0xf0] sm:$0xf]  ;;  %s1053_s24 = sshll.u32 %s240_s22, 7 }
  0x45   : > { %v1180_v48 = vor.u32 %v1274_v46, %v1179_v45  ;;  %s1651_s26 = scalar_lea.vmem [#allocation2], %s1053_s24 }
  0x46   : > { %s931_s18 = sshll.u32 %s1651_s26, 4  ;;  %s932_s18 = int_to_ptr.vmem [resolvable:$true] %s931_s18 }
  0x52   : > { %1224 = vmatmul.msk.bf16.gmra.mxu1 %vm514_vm2, %v1088_v50  ;;  %1233 = vmatmul.msk.bf16.gmra.mxu3 %vm514_vm2, %v1160_v55  ;;  %v1642_v55 = vld [vmem:[%s1825_s3] ss:$0 sm:$0xff] }
  0x54   : > { %588 = vmatmul.bf16.gmra.mxu0 %v1076_v56  ;;  %628 = vmatmul.bf16.gmra.mxu2 %v1140_v57 }
  0x62   : > { %1225 = vmatmul.msk.bf16.gmra.mxu1 %vm514_vm2, %v1096_v62  ;;  %1234 = vmatmul.msk.bf16.gmra.mxu3 %vm514_vm2, %v1168_v3 }
  0x64   : > { %593 = vmatmul.bf16.gmra.mxu0 %v1084_v4  ;;  %633 = vmatmul.bf16.gmra.mxu2 %v1148_v5 }
  0x72   : > { %1226 = vmatmul.msk.bf16.gmra.mxu1 %vm514_vm2, %v1104_v10  ;;  %1235 = vmatmul.msk.bf16.gmra.mxu3 %vm514_vm2, %v1176_v15 }
  0x74   : > { %598 = vmatmul.bf16.gmra.mxu0 %v1092_v16  ;;  %638 = vmatmul.bf16.gmra.mxu2 %v1156_v17 }
  0x82   : > { %1227 = vmatmul.msk.bf16.gmra.mxu1 %vm514_vm2, %v1112_v22  ;;  %1236 = vmatmul.msk.bf16.gmra.mxu3 %vm514_vm2, %v1184_v27 }
  0x84   : > { %603 = vmatmul.bf16.gmra.mxu0 %v1100_v28  ;;  %643 = vmatmul.bf16.gmra.mxu2 %v1164_v29 }
  0x92   : > { %1228 = vmatmul.msk.bf16.gmra.mxu1 %vm514_vm2, %v1120_v32 }
  0x94   : > { %608 = vmatmul.bf16.gmra.mxu0 %v1108_v37  ;;  %648 = vmatmul.bf16.gmra.mxu2 %v1172_v38 }
  0x9f   : > { %v668_v44 = vpop.f32.mrf.mxu1 }
  0xa2   : > { %1229 = vmatmul.msk.bf16.gmra.mxu1 %vm514_vm2, %v1128_v41 }
  0xa4   : > { %613 = vmatmul.bf16.gmra.mxu0 %v1116_v47  ;;  %653 = vmatmul.bf16.gmra.mxu2 %v1180_v48 }
  0xa5   : > { %v713_v51 = vpop.f32.mrf.mxu3 }
  0xa7   : > { %v670_v49 = vpop.f32.mrf.mxu1 }
  0xad   : > { %v715_v61 = vpop.f32.mrf.mxu3 }
  0xaf   : > { %v673_v50 = vpop.f32.mrf.mxu1 }
  0xb1   : > { %v579_v53 = vpop.f32.mrf.mxu0 }
  0xb2   : > { %v669_v54 = vadd.f32 %v668_v44, %v579_v53 }
  0xb4   : > { %v752_v56 = vmul.f32 %v1637_v52, %v669_v54 }
  0xb5   : > { %v718_v9 = vpop.f32.mrf.mxu3 }
  0xb6   : > { %v788_v57 = vadd.f32 %v1642_v55, %v752_v56 }
  0xb7   : > { %v675_v58 = vpop.f32.mrf.mxu1  ;;  %v1649_v60 = vpop.f32.mrf.mxu2 }
  0xb8   : > { %v820_v59 = vmax.f32 %v788_v57, 0.0 }
  0xb9   : > { %v581_v62 = vpop.f32.mrf.mxu0 }
  0xba   : > { %v852_v63 = vpack.c.bf16 %v820_v59, %v820_v59  ;;  %v671_v0 = vadd.f32 %v670_v49, %v581_v62 }
  0xbc   : > { %885 = vst.msk [vmem:[%s1651_s26] sm:$0xf] %vm884_vm3, %v852_v63  ;;  %v753_v1 = vmul.f32 %v1637_v52, %v671_v0 }
  0xbd   : > { %v720_v21 = vpop.f32.mrf.mxu3 }
  0xbe   : > { %v789_v2 = vadd.f32 %v1642_v55, %v753_v1 }
  0xbf   : > { %v678_v3 = vpop.f32.mrf.mxu1  ;;  %v1657_v5 = vpop.f32.mrf.mxu2 }
  0xc0   : > { %v821_v4 = vmax.f32 %v789_v2, 0.0 }
  0xc1   : > { %v584_v6 = vpop.f32.mrf.mxu0 }
  0xc2   : > { %v853_v7 = vpack.c.bf16 %v821_v4, %v821_v4  ;;  %v674_v8 = vadd.f32 %v673_v50, %v584_v6 }
  0xc4   : > { %886 = vst.msk [vmem:[%s1651_s26 + $0x4] sm:$0xf] %vm884_vm3, %v853_v7  ;;  %v754_v10 = vmul.f32 %v1637_v52, %v674_v8 }
  0xc5   : > { %v723_v38 = vpop.f32.mrf.mxu3 }
  0xc6   : > { %v790_v11 = vadd.f32 %v1642_v55, %v754_v10 }
  0xc7   : > { %v680_v12 = vpop.f32.mrf.mxu1  ;;  %v624_v14 = vpop.f32.mrf.mxu2 }
  0xc8   : > { %v822_v13 = vmax.f32 %v790_v11, 0.0  ;;  %v714_v15 = vadd.f32 %v713_v51, %v624_v14 }
  0xc9   : > { %v586_v16 = vpop.f32.mrf.mxu0 }
  0xca   : > { %v854_v17 = vpack.c.bf16 %v822_v13, %v822_v13  ;;  %v676_v18 = vadd.f32 %v675_v58, %v586_v16  ;;  %v770_v19 = vmul.f32 %v1637_v52, %v714_v15 }
  0xcc   : > { %887 = vst.msk [vmem:[%s1651_s26 + $0x8] sm:$0xf] %vm884_vm3, %v854_v17  ;;  %v755_v20 = vmul.f32 %v1637_v52, %v676_v18  ;;  %v806_v22 = vadd.f32 %v1642_v55, %v770_v19 }
  0xcd   : > { %v725_v57 = vpop.f32.mrf.mxu3 }
  0xce   : > { %v791_v23 = vadd.f32 %v1642_v55, %v755_v20  ;;  %v838_v25 = vmax.f32 %v806_v22, 0.0 }
  0xcf   : > { %v683_v24 = vpop.f32.mrf.mxu1  ;;  %v626_v27 = vpop.f32.mrf.mxu2 }
  0xd0   : > { %v823_v26 = vmax.f32 %v791_v23, 0.0  ;;  %v870_v28 = vpack.c.bf16 %v838_v25, %v838_v25  ;;  %v716_v29 = vadd.f32 %v715_v61, %v626_v27 }
  0xd1   : > { %v589_v30 = vpop.f32.mrf.mxu0 }
  0xd2   : > { %v855_v31 = vpack.c.bf16 %v823_v26, %v823_v26  ;;  %v679_v32 = vadd.f32 %v678_v3, %v589_v30  ;;  %903 = vst.msk [vmem:[%s1651_s26 + $0x48] sm:$0xf] %vm884_vm3, %v870_v28  ;;  %v771_v33 = vmul.f32 %v1637_v52, %v716_v29 }
  0xd4   : > { %888 = vst.msk [vmem:[%s1651_s26 + $0xc] sm:$0xf] %vm884_vm3, %v855_v31  ;;  %v756_v34 = vmul.f32 %v1637_v52, %v679_v32  ;;  %v807_v35 = vadd.f32 %v1642_v55, %v771_v33 }
  0xd5   : > { %v728_v14 = vpop.f32.mrf.mxu3 }
  0xd6   : > { %v792_v36 = vadd.f32 %v1642_v55, %v756_v34  ;;  %v839_v39 = vmax.f32 %v807_v35, 0.0 }
  0xd7   : > { %v685_v37 = vpop.f32.mrf.mxu1  ;;  %v629_v41 = vpop.f32.mrf.mxu2 }
  0xd8   : > { %v824_v40 = vmax.f32 %v792_v36, 0.0  ;;  %v871_v42 = vpack.c.bf16 %v839_v39, %v839_v39  ;;  %v719_v43 = vadd.f32 %v718_v9, %v629_v41 }
  0xd9   : > { %v591_v44 = vpop.f32.mrf.mxu0 }
  0xda   : > { %v856_v45 = vpack.c.bf16 %v824_v40, %v824_v40  ;;  %v681_v46 = vadd.f32 %v680_v12, %v591_v44  ;;  %904 = vst.msk [vmem:[%s1651_s26 + $0x4c] sm:$0xf] %vm884_vm3, %v871_v42  ;;  %v772_v47 = vmul.f32 %v1637_v52, %v719_v43 }
  0xdc   : > { %889 = vst.msk [vmem:[%s1651_s26 + $0x10] sm:$0xf] %vm884_vm3, %v856_v45  ;;  %v757_v48 = vmul.f32 %v1637_v52, %v681_v46  ;;  %v808_v49 = vadd.f32 %v1642_v55, %v772_v47 }
  0xdd   : > { %v730_v30 = vpop.f32.mrf.mxu3 }
  0xde   : > { %v793_v50 = vadd.f32 %v1642_v55, %v757_v48  ;;  %v840_v53 = vmax.f32 %v808_v49, 0.0 }
  0xdf   : > { %v688_v51 = vpop.f32.mrf.mxu1  ;;  %v631_v56 = vpop.f32.mrf.mxu2 }
  0xe0   : > { %v825_v54 = vmax.f32 %v793_v50, 0.0  ;;  %v872_v58 = vpack.c.bf16 %v840_v53, %v840_v53  ;;  %v721_v59 = vadd.f32 %v720_v21, %v631_v56 }
  0xe1   : > { %v594_v61 = vpop.f32.mrf.mxu0 }
  0xe2   : > { %v857_v62 = vpack.c.bf16 %v825_v54, %v825_v54  ;;  %v684_v63 = vadd.f32 %v683_v24, %v594_v61  ;;  %905 = vst.msk [vmem:[%s1651_s26 + $0x50] sm:$0xf] %vm884_vm3, %v872_v58  ;;  %v773_v0 = vmul.f32 %v1637_v52, %v721_v59 }
  0xe4   : > { %890 = vst.msk [vmem:[%s1651_s26 + $0x14] sm:$0xf] %vm884_vm3, %v857_v62  ;;  %v758_v1 = vmul.f32 %v1637_v52, %v684_v63  ;;  %v809_v2 = vadd.f32 %v1642_v55, %v773_v0 }
  0xe5   : > { %v733_v47 = vpop.f32.mrf.mxu3 }
  0xe6   : > { %v794_v3 = vadd.f32 %v1642_v55, %v758_v1  ;;  %v841_v6 = vmax.f32 %v809_v2, 0.0 }
  0xe7   : > { %v690_v4 = vpop.f32.mrf.mxu1  ;;  %v634_v8 = vpop.f32.mrf.mxu2 }
  0xe8   : > { %v826_v7 = vmax.f32 %v794_v3, 0.0  ;;  %v873_v9 = vpack.c.bf16 %v841_v6, %v841_v6  ;;  %v724_v10 = vadd.f32 %v723_v38, %v634_v8 }
  0xe9   : > { %v596_v11 = vpop.f32.mrf.mxu0 }
  0xea   : > { %v858_v12 = vpack.c.bf16 %v826_v7, %v826_v7  ;;  %v686_v13 = vadd.f32 %v685_v37, %v596_v11  ;;  %906 = vst.msk [vmem:[%s1651_s26 + $0x54] sm:$0xf] %vm884_vm3, %v873_v9  ;;  %v774_v15 = vmul.f32 %v1637_v52, %v724_v10 }
  0xec   : > { %891 = vst.msk [vmem:[%s1651_s26 + $0x18] sm:$0xf] %vm884_vm3, %v858_v12  ;;  %v759_v16 = vmul.f32 %v1637_v52, %v686_v13  ;;  %v810_v17 = vadd.f32 %v1642_v55, %v774_v15 }
  0xed   : > { %v735_v3 = vpop.f32.mrf.mxu3 }
  0xee   : > { %v795_v18 = vadd.f32 %v1642_v55, %v759_v16  ;;  %v842_v20 = vmax.f32 %v810_v17, 0.0 }
  0xef   : > { %v693_v19 = vpop.f32.mrf.mxu1  ;;  %v636_v22 = vpop.f32.mrf.mxu2 }
  0xf0   : > { %v827_v21 = vmax.f32 %v795_v18, 0.0  ;;  %v874_v23 = vpack.c.bf16 %v842_v20, %v842_v20  ;;  %v726_v24 = vadd.f32 %v725_v57, %v636_v22 }
  0xf1   : > { %v599_v25 = vpop.f32.mrf.mxu0 }
  0xf2   : > { %v859_v26 = vpack.c.bf16 %v827_v21, %v827_v21  ;;  %v689_v27 = vadd.f32 %v688_v51, %v599_v25  ;;  %907 = vst.msk [vmem:[%s1651_s26 + $0x58] sm:$0xf] %vm884_vm3, %v874_v23  ;;  %v775_v28 = vmul.f32 %v1637_v52, %v726_v24 }
  0xf4   : > { %892 = vst.msk [vmem:[%s1651_s26 + $0x1c] sm:$0xf] %vm884_vm3, %v859_v26  ;;  %v760_v29 = vmul.f32 %v1637_v52, %v689_v27  ;;  %v811_v31 = vadd.f32 %v1642_v55, %v775_v28 }
  0xf5   : > { %v738_v22 = vpop.f32.mrf.mxu3 }
  0xf6   : > { %v796_v32 = vadd.f32 %v1642_v55, %v760_v29  ;;  %v843_v34 = vmax.f32 %v811_v31, 0.0 }
  0xf7   : > { %v695_v33 = vpop.f32.mrf.mxu1  ;;  %v639_v36 = vpop.f32.mrf.mxu2 }
  0xf8   : > { %v828_v35 = vmax.f32 %v796_v32, 0.0  ;;  %v875_v37 = vpack.c.bf16 %v843_v34, %v843_v34  ;;  %v729_v38 = vadd.f32 %v728_v14, %v639_v36 }
  0xf9   : > { %v601_v39 = vpop.f32.mrf.mxu0 }
  0xfa   : > { %v860_v40 = vpack.c.bf16 %v828_v35, %v828_v35  ;;  %v691_v41 = vadd.f32 %v690_v4, %v601_v39  ;;  %908 = vst.msk [vmem:[%s1651_s26 + $0x5c] sm:$0xf] %vm884_vm3, %v875_v37  ;;  %v776_v42 = vmul.f32 %v1637_v52, %v729_v38 }
  0xfc   : > { %893 = vst.msk [vmem:[%s1651_s26 + $0x20] sm:$0xf] %vm884_vm3, %v860_v40  ;;  %v761_v43 = vmul.f32 %v1637_v52, %v691_v41  ;;  %v812_v44 = vadd.f32 %v1642_v55, %v776_v42 }
  0xfd   : > { %v740_v38 = vpop.f32.mrf.mxu3 }
  0xfe   : > { %v797_v45 = vadd.f32 %v1642_v55, %v761_v43  ;;  %v844_v48 = vmax.f32 %v812_v44, 0.0 }
  0xff   : > { %v698_v46 = vpop.f32.mrf.mxu1  ;;  %v641_v50 = vpop.f32.mrf.mxu2 }
 0x100   : > { %v829_v49 = vmax.f32 %v797_v45, 0.0  ;;  %v876_v51 = vpack.c.bf16 %v844_v48, %v844_v48  ;;  %v731_v53 = vadd.f32 %v730_v30, %v641_v50 }
 0x101   : > { %v604_v54 = vpop.f32.mrf.mxu0 }
 0x102   : > { %v861_v56 = vpack.c.bf16 %v829_v49, %v829_v49  ;;  %v694_v57 = vadd.f32 %v693_v19, %v604_v54  ;;  %909 = vst.msk [vmem:[%s1651_s26 + $0x60] sm:$0xf] %vm884_vm3, %v876_v51  ;;  %v777_v58 = vmul.f32 %v1637_v52, %v731_v53 }
 0x104   : > { %894 = vst.msk [vmem:[%s1651_s26 + $0x24] sm:$0xf] %vm884_vm3, %v861_v56  ;;  %v762_v59 = vmul.f32 %v1637_v52, %v694_v57  ;;  %v813_v61 = vadd.f32 %v1642_v55, %v777_v58 }
 0x106   : > { %v798_v62 = vadd.f32 %v1642_v55, %v762_v59  ;;  %v845_v0 = vmax.f32 %v813_v61, 0.0  ;;  %v743_v59 = vpop.f32.mrf.mxu3 }
 0x107   : > { %v700_v63 = vpop.f32.mrf.mxu1  ;;  %v644_v2 = vpop.f32.mrf.mxu2 }
 0x108   : > { %v830_v1 = vmax.f32 %v798_v62, 0.0  ;;  %v877_v4 = vpack.c.bf16 %v845_v0, %v845_v0  ;;  %v734_v6 = vadd.f32 %v733_v47, %v644_v2 }
 0x109   : > { %v606_v7 = vpop.f32.mrf.mxu0 }
 0x10a   : > { %v862_v8 = vpack.c.bf16 %v830_v1, %v830_v1  ;;  %v696_v9 = vadd.f32 %v695_v33, %v606_v7  ;;  %910 = vst.msk [vmem:[%s1651_s26 + $0x64] sm:$0xf] %vm884_vm3, %v877_v4  ;;  %v778_v10 = vmul.f32 %v1637_v52, %v734_v6 }
 0x10c   : > { %895 = vst.msk [vmem:[%s1651_s26 + $0x28] sm:$0xf] %vm884_vm3, %v862_v8  ;;  %v763_v11 = vmul.f32 %v1637_v52, %v696_v9  ;;  %v814_v12 = vadd.f32 %v1642_v55, %v778_v10 }
 0x10e   : > { %v799_v13 = vadd.f32 %v1642_v55, %v763_v11  ;;  %v846_v15 = vmax.f32 %v814_v12, 0.0 }
 0x10f   : > { %v703_v14 = vpop.f32.mrf.mxu1  ;;  %v646_v17 = vpop.f32.mrf.mxu2 }
 0x110   : > { %v831_v16 = vmax.f32 %v799_v13, 0.0  ;;  %v878_v18 = vpack.c.bf16 %v846_v15, %v846_v15  ;;  %v736_v19 = vadd.f32 %v735_v3, %v646_v17 }
 0x111   : > { %v609_v20 = vpop.f32.mrf.mxu0 }
 0x112   : > { %v863_v21 = vpack.c.bf16 %v831_v16, %v831_v16  ;;  %v699_v23 = vadd.f32 %v698_v46, %v609_v20  ;;  %911 = vst.msk [vmem:[%s1651_s26 + $0x68] sm:$0xf] %vm884_vm3, %v878_v18  ;;  %v779_v24 = vmul.f32 %v1637_v52, %v736_v19  ;;  %v745_v18 = vpop.f32.mrf.mxu3 }
 0x114   : > { %896 = vst.msk [vmem:[%s1651_s26 + $0x2c] sm:$0xf] %vm884_vm3, %v863_v21  ;;  %v764_v25 = vmul.f32 %v1637_v52, %v699_v23  ;;  %v815_v26 = vadd.f32 %v1642_v55, %v779_v24 }
 0x116   : > { %v800_v27 = vadd.f32 %v1642_v55, %v764_v25  ;;  %v847_v29 = vmax.f32 %v815_v26, 0.0 }
 0x117   : > { %v705_v28 = vpop.f32.mrf.mxu1  ;;  %v649_v31 = vpop.f32.mrf.mxu2 }
 0x118   : > { %v832_v30 = vmax.f32 %v800_v27, 0.0  ;;  %v879_v32 = vpack.c.bf16 %v847_v29, %v847_v29  ;;  %v739_v33 = vadd.f32 %v738_v22, %v649_v31 }
 0x119   : > { %v611_v34 = vpop.f32.mrf.mxu0 }
 0x11a   : > { %v864_v35 = vpack.c.bf16 %v832_v30, %v832_v30  ;;  %v701_v36 = vadd.f32 %v700_v63, %v611_v34  ;;  %912 = vst.msk [vmem:[%s1651_s26 + $0x6c] sm:$0xf] %vm884_vm3, %v879_v32  ;;  %v780_v37 = vmul.f32 %v1637_v52, %v739_v33 }
 0x11c   : > { %897 = vst.msk [vmem:[%s1651_s26 + $0x30] sm:$0xf] %vm884_vm3, %v864_v35  ;;  %v765_v39 = vmul.f32 %v1637_v52, %v701_v36  ;;  %v816_v40 = vadd.f32 %v1642_v55, %v780_v37 }
 0x11e   : > { %v801_v41 = vadd.f32 %v1642_v55, %v765_v39  ;;  %v848_v43 = vmax.f32 %v816_v40, 0.0 }
 0x11f   : > { %v708_v42 = vpop.f32.mrf.mxu1  ;;  %v651_v46 = vpop.f32.mrf.mxu2 }
 0x120   : > { %v709_v44 = vadd.f32 %v708_v42, %v1649_v60  ;;  %v833_v45 = vmax.f32 %v801_v41, 0.0  ;;  %v880_v47 = vpack.c.bf16 %v848_v43, %v848_v43  ;;  %v741_v49 = vadd.f32 %v740_v38, %v651_v46 }
 0x121   : > { %v614_v50 = vpop.f32.mrf.mxu0 }
 0x122   : > { %v768_v48 = vmul.f32 %v1637_v52, %v709_v44  ;;  %v865_v51 = vpack.c.bf16 %v833_v45, %v833_v45  ;;  %v704_v53 = vadd.f32 %v703_v14, %v614_v50  ;;  %913 = vst.msk [vmem:[%s1651_s26 + $0x70] sm:$0xf] %vm884_vm3, %v880_v47  ;;  %v781_v56 = vmul.f32 %v1637_v52, %v741_v49 }
 0x124   : > { %v804_v54 = vadd.f32 %v1642_v55, %v768_v48  ;;  %898 = vst.msk [vmem:[%s1651_s26 + $0x34] sm:$0xf] %vm884_vm3, %v865_v51  ;;  %v766_v60 = vmul.f32 %v1637_v52, %v704_v53  ;;  %v817_v58 = vadd.f32 %v1642_v55, %v781_v56 }
 0x126   : > { %v836_v57 = vmax.f32 %v804_v54, 0.0  ;;  %v802_v61 = vadd.f32 %v1642_v55, %v766_v60  ;;  %v849_v0 = vmax.f32 %v817_v58, 0.0 }
 0x127   : > { %v710_v62 = vpop.f32.mrf.mxu1  ;;  %v654_v3 = vpop.f32.mrf.mxu2 }
 0x128   : > { %v868_v63 = vpack.c.bf16 %v836_v57, %v836_v57  ;;  %v711_v1 = vadd.f32 %v710_v62, %v1657_v5  ;;  %v834_v2 = vmax.f32 %v802_v61, 0.0  ;;  %v881_v4 = vpack.c.bf16 %v849_v0, %v849_v0 }
 0x129   : > { %v744_v7 = vadd.f32 %v743_v59, %v654_v3  ;;  %v616_v8 = vpop.f32.mrf.mxu0 }
 0x12a   : > { %901 = vst.msk [vmem:[%s1651_s26 + $0x40] sm:$0xf] %vm884_vm3, %v868_v63  ;;  %v769_v6 = vmul.f32 %v1637_v52, %v711_v1  ;;  %v866_v9 = vpack.c.bf16 %v834_v2, %v834_v2  ;;  %v706_v10 = vadd.f32 %v705_v28, %v616_v8 }
 0x12b   : > { %914 = vst.msk [vmem:[%s1651_s26 + $0x74] sm:$0xf] %vm884_vm3, %v881_v4  ;;  %v782_v12 = vmul.f32 %v1637_v52, %v744_v7 }
 0x12c   : > { %v805_v11 = vadd.f32 %v1642_v55, %v769_v6  ;;  %899 = vst.msk [vmem:[%s1651_s26 + $0x38] sm:$0xf] %vm884_vm3, %v866_v9  ;;  %v767_v5 = vmul.f32 %v1637_v52, %v706_v10 }
 0x12d   : > { %v818_v14 = vadd.f32 %v1642_v55, %v782_v12 }
 0x12e   : > { %v837_v13 = vmax.f32 %v805_v11, 0.0  ;;  %v803_v15 = vadd.f32 %v1642_v55, %v767_v5 }
 0x12f   : > { %v850_v17 = vmax.f32 %v818_v14, 0.0  ;;  %v656_v20 = vpop.f32.mrf.mxu2 }
 0x130   : > { %v869_v16 = vpack.c.bf16 %v837_v13, %v837_v13  ;;  %v835_v19 = vmax.f32 %v803_v15, 0.0  ;;  %v746_v22 = vadd.f32 %v745_v18, %v656_v20 }
 0x131   : > { %v882_v21 = vpack.c.bf16 %v850_v17, %v850_v17 }
 0x132   : > { %902 = vst.msk [vmem:[%s1651_s26 + $0x44] sm:$0xf] %vm884_vm3, %v869_v16  ;;  %v867_v23 = vpack.c.bf16 %v835_v19, %v835_v19  ;;  %v783_v24 = vmul.f32 %v1637_v52, %v746_v22 }
 0x133   : > { %915 = vst.msk [vmem:[%s1651_s26 + $0x78] sm:$0xf] %vm884_vm3, %v882_v21 }
 0x134   : > { %900 = vst.msk [vmem:[%s1651_s26 + $0x3c] sm:$0xf] %vm884_vm3, %v867_v23  ;;  %v819_v25 = vadd.f32 %v1642_v55, %v783_v24 }
 0x136   : > { %v851_v26 = vmax.f32 %v819_v25, 0.0 }
 0x138   : > { %v883_v27 = vpack.c.bf16 %v851_v26, %v851_v26 }
 0x13a   : > { %916 = vst.msk [vmem:[%s1651_s26 + $0x7c] sm:$0xf] %vm884_vm3, %v883_v27 }
 0x13b   : > { %1382 = shalt.err (!%p1379_p5)
}
 0x13c   : > { %s1436_s22 = smov 64   ;;  %s1437_s24 = smov 4  }
 0x13d   : > { %1295 = dma.vmem_to_hbm [thread:$0]  (%p1503_p4), %s932_s18, 2048, %s934_s7, %s918_s8, %s1436_s22, %s1436_s22, %s1437_s24  }
 0x13e PF: > { %p1301_p6 = scmp.ge.s32.totalorder %s1433_s20, 2  ;;  %s948_s26 = sand.u32 1, %s1413_s15  }
 0x13f   : > { %s949_s29 = scalar_lea.sflag [#allocation3], %s948_s26 }
 0x140   : > { %p1298_p7 = pnand %p1301_p6, %p1510_p8 }
 0x142   : > { %p1299_p9 = pneg %p1298_p7 }
 0x144   : > { %1408 = dma.done.wait (%p1299_p9), %s949_s29, 2048  }
 0x145   : > { %1410 = vsyncadd (%p1299_p9), %s949_s29, 4294965248  ;;  %s17_s20 = sadd.s32 1, %s1433_s20   ;;  %s1829_s15 = smov %s1417_s16 }
 0x146   : > { %p14_p10 = scmp.ge.s32.totalorder %s17_s20, 4   ;;  %s1830_s16 = smov %s1421_s17 }
 0x147   : > { %s1831_s17 = smov %s1516_s28  ;;  %s1832_s18 = smov %s1429_s19 }
 0x148   : > { %s1833_s19 = smov %s1835_s23  ;;  %16 = sbr.rel (!%p14_p10) target bundleno = 4 (0x4), region = 80 }
 0x14d   :  { %955 = vsyncpa [#allocation3], 1 }
 0x14e   :  { %957 = vsyncpa [#allocation3 + $0x1], 1 }

</bundles_post_ra>
